<compile_context>
chip_gen: v5e
topology: v5e:2x2
jax: 0.10.0
libtpu: 0.0.40
codegen_flags: <defaults>
</compile_context>

<pallas_src>
import functools

import numpy as np

import jax
import jax.numpy as jnp
from jax.experimental import pallas as pl
from jax.experimental.pallas import tpu as pltpu


STRIDE1 = (2, 5)   # resnet_block1: 32 -> 64
STRIDE2 = (2, 5)   # resnet_block2: 64 -> 64
#                    resnet_block3: 64 -> 32, stride (1, 1)


def _conv_out(size, stride):
    """Output size of a kernel-3, pad-1 conv."""
    return (size - 1) // stride + 1


# ---------------------------------------------------------------------------
# In-kernel helpers
# ---------------------------------------------------------------------------
def _sel(out_rows, in_rows, stride, offset):
    """0/1 bf16 selection matrix S (out_rows, in_rows): S[i, stride*i+offset]=1.

    Row gathers / strided H subsampling / halo shifts are done as S @ X on the
    MXU (which has huge slack at these sizes) instead of sublane-misaligned
    slices, rolls or concats.  Rows whose source index falls outside
    [0, in_rows) are all-zero, which implements the conv's zero padding.
    """
    i = jax.lax.broadcasted_iota(jnp.int32, (out_rows, in_rows), 0)
    j = jax.lax.broadcasted_iota(jnp.int32, (out_rows, in_rows), 1)
    return jnp.where(j == stride * i + offset, 1.0, 0.0).astype(jnp.bfloat16)


def _fused_layer_kernel(xg_ref,
                        w1a_ref, wda_ref, w2a_ref, affa_ref,
                        w1b_ref, wdb_ref, w2b_ref, affb_ref,
                        w1c_ref, wdc_ref, w2c_ref, affc_ref,
                        o_ref, *, Ho1, Ho2, Ho3, sh1, sh2):
    """Whole resnet_layer (3 BasicBlocks) for one batch element.

    Activations are carried as (rows, col*C + c) lane-folded 2-D matrices;
    every conv is a sum over 3 H-taps of  (row-selection @ X) @ W_big  where
    W_big already encodes all W taps (and the W zero padding) of that H tap.
    """
    f32, bf16 = jnp.float32, jnp.bfloat16

    def mm(a, b):
        return jnp.dot(a, b, preferred_element_type=f32)

    def gather_rows(xb, out_rows, stride, offset):
        if stride == 1 and offset == 0 and out_rows == xb.shape[0]:
            return xb                       # identity selection -> free
        return mm(_sel(out_rows, xb.shape[0], stride, offset), xb).astype(bf16)

    def basic_block(xb, ho_out, sh, pad_off, w1_ref, wd_ref, w2_ref, aff_ref):
        """One BasicBlock on a lane-folded bf16 activation xb (rows, K).

        pad_off = 0  : xb already carries the top zero-pad row (block1's
                       wrapper-padded input), conv1 tap kh reads row sh*i+kh.
        pad_off = -1 : unpadded activation, tap kh reads row sh*i+kh-1 with
                       the selection matrix supplying the halo zeros.
        """
        # conv1 (3x3, stride (sh, sw), pad 1) + bn1 + relu
        t = [gather_rows(xb, ho_out, sh, kh + pad_off) for kh in range(3)]
        acc = mm(t[0], w1_ref[0]) + mm(t[1], w1_ref[1]) + mm(t[2], w1_ref[2])
        y = jnp.maximum(acc * aff_ref[0:1] + aff_ref[1:2], 0.0)

        # downsample branch (1x1 conv, same stride) + bn -- its operand rows
        # are exactly conv1's middle H tap, so t[1] is reused.
        ident = mm(t[1], wd_ref[...]) * aff_ref[2:3] + aff_ref[3:4]

        # conv2 (3x3, stride 1, pad 1) + bn2 + residual + relu
        yb = y.astype(bf16)
        y_up = gather_rows(yb, ho_out, 1, -1)   # row i <- y[i-1] (0 at top)
        y_dn = gather_rows(yb, ho_out, 1, +1)   # row i <- y[i+1] (0 at bottom)
        acc = mm(y_up, w2_ref[0]) + mm(yb, w2_ref[1]) + mm(y_dn, w2_ref[2])
        return jnp.maximum(acc * aff_ref[4:5] + aff_ref[5:6] + ident, 0.0)

    xg = xg_ref[...]                                           # (Hp, Wk*Cin) bf16
    x1 = basic_block(xg, Ho1, sh1, 0, w1a_ref, wda_ref, w2a_ref, affa_ref)
    x2 = basic_block(x1.astype(bf16), Ho2, sh2, -1,
                     w1b_ref, wdb_ref, w2b_ref, affb_ref)
    x3 = basic_block(x2.astype(bf16), Ho3, 1, -1,
                     w1c_ref, wdc_ref, w2c_ref, affc_ref)
    o_ref[...] = x3.astype(o_ref.dtype)                        # (Ho3, 32) f32


# ---------------------------------------------------------------------------
# pallas_call wrapper
# ---------------------------------------------------------------------------
_WEIGHT_KEYS = ("w1a", "wda", "w2a", "affa",
                "w1b", "wdb", "w2b", "affb",
                "w1c", "wdc", "w2c", "affc")


def _whole_array_spec(arr):
    zeros = (0,) * arr.ndim
    return pl.BlockSpec(arr.shape, lambda n, _z=zeros: _z)


def resnet_layer_forward(x_nchw, prep):
    """x: (N, 32, H, W) f32 NCHW -> (N, 32, Ho3, 1) f32 NCHW."""
    N, Cin, H, W = x_nchw.shape
    sh1, sw1 = STRIDE1
    sh2, _ = STRIDE2
    Ho1, Wo1 = _conv_out(H, sh1), _conv_out(W, sw1)
    Ho2 = _conv_out(Ho1, sh2)
    Ho3, Wo3 = Ho2, 1                       # block3 has stride (1, 1), Wo == 1
    C3 = prep["affc"].shape[1]

    # Single cheap piece of XLA glue: NCHW->NHWC, cast to bf16, pad H/W by the
    # conv-1 halo, fold W into the lane axis (free reshape) so every conv tap
    # inside the kernel is a plain matmul.
    Wk = sw1 * Wo1
    Hp = -(-(H + 2) // 8) * 8               # pad rows to a sublane multiple
    x = jnp.transpose(x_nchw, (0, 2, 3, 1)).astype(jnp.bfloat16)
    x = jnp.pad(x, ((0, 0), (1, Hp - H - 1), (1, max(0, Wk - (W + 1))), (0, 0)))
    xg = x[:, :, :Wk, :].reshape(N, Hp, Wk * Cin)

    kernel = functools.partial(_fused_layer_kernel, Ho1=Ho1, Ho2=Ho2, Ho3=Ho3,
                               sh1=sh1, sh2=sh2)
    out = pl.pallas_call(
        kernel,
        out_shape=jax.ShapeDtypeStruct((N, Ho3, C3), jnp.float32),
        grid=(N,),
        in_specs=[pl.BlockSpec((None, Hp, Wk * Cin), lambda n: (n, 0, 0))]
        + [_whole_array_spec(prep[k]) for k in _WEIGHT_KEYS],
        out_specs=pl.BlockSpec((None, Ho3, C3), lambda n: (n, 0, 0)),
        compiler_params=pltpu.CompilerParams(
            dimension_semantics=("parallel",)),
    )(xg, *[prep[k] for k in _WEIGHT_KEYS])

    return jnp.transpose(out.reshape(N, Ho3, Wo3, C3), (0, 3, 1, 2))


# ---------------------------------------------------------------------------
# One-time weight preparation (outside the forward)
# ---------------------------------------------------------------------------
def _fold_conv1_weight(w, sw, wo):
    """Block-1 conv1 (3x3, stride (*, sw), pad 1) against the W-folded padded
    input (lane = padded_col*cin + c, padded_col = sw*ow + kw).
    Returns (3, sw*wo*cin, wo*cout) bf16 with zero rows for unused channels."""
    w = np.asarray(w, np.float32)
    cout, cin = w.shape[0], w.shape[1]
    out = np.zeros((3, sw * wo * cin, wo * cout), np.float32)
    for kh in range(3):
        for ow in range(wo):
            for kw in range(3):
                r0 = (sw * ow + kw) * cin
                out[kh, r0:r0 + cin, ow * cout:(ow + 1) * cout] = w[:, :, kh, kw].T
    return jnp.asarray(out, jnp.bfloat16)


def _fold_ds_weight(wd, sw, wo):
    """Block-1 downsample 1x1 (stride (*, sw)) on the same folded input:
    samples padded col sw*ow + 1 (= original col sw*ow)."""
    wd = np.asarray(wd, np.float32)
    cout, cin = wd.shape[0], wd.shape[1]
    out = np.zeros((sw * wo * cin, wo * cout), np.float32)
    for ow in range(wo):
        r0 = (sw * ow + 1) * cin
        out[r0:r0 + cin, ow * cout:(ow + 1) * cout] = wd[:, :, 0, 0].T
    return jnp.asarray(out, jnp.bfloat16)


def _fold_conv_s1_weight(w, wo):
    """3x3 stride-1 pad-1 conv whose input AND output are lane-folded with wo
    columns; the W zero padding is encoded by the absent (zero) blocks."""
    w = np.asarray(w, np.float32)
    cout, cin = w.shape[0], w.shape[1]
    out = np.zeros((3, wo * cin, wo * cout), np.float32)
    for kh in range(3):
        for ow in range(wo):
            for kw in range(3):
                win = ow + kw - 1
                if 0 <= win < wo:
                    out[kh, win * cin:(win + 1) * cin,
                        ow * cout:(ow + 1) * cout] = w[:, :, kh, kw].T
    return jnp.asarray(out, jnp.bfloat16)


def _fold_conv1_collapse_w_weight(w, wo_in):
    """3x3 pad-1 conv from a wo_in-column folded input to a single output
    column (Wo_out == 1): output col 0 taps input cols kw-1 (kw=0 is W pad)."""
    w = np.asarray(w, np.float32)
    cout, cin = w.shape[0], w.shape[1]
    out = np.zeros((3, wo_in * cin, cout), np.float32)
    for kh in range(3):
        for kw in range(3):
            win = kw - 1
            if 0 <= win < wo_in:
                out[kh, win * cin:(win + 1) * cin, :] = w[:, :, kh, kw].T
    return jnp.asarray(out, jnp.bfloat16)


def _fold_ds_collapse_w_weight(wd, wo_in):
    """1x1 strided downsample from a wo_in-column folded input to one output
    column: samples input col 0."""
    wd = np.asarray(wd, np.float32)
    cout, cin = wd.shape[0], wd.shape[1]
    out = np.zeros((wo_in * cin, cout), np.float32)
    out[0:cin, :] = wd[:, :, 0, 0].T
    return jnp.asarray(out, jnp.bfloat16)


def _conv_1d_weight(w):
    """3x3 pad-1 conv on a single-column (Wo == 1) map: only kw == 1 taps a
    real column, so it degenerates to a 3-tap 1-D conv along H."""
    w = np.asarray(w, np.float32)
    return jnp.asarray(np.stack([w[:, :, kh, 1].T for kh in range(3)], 0),
                       jnp.bfloat16)


def _pack_affine(blk, wo):
    """(6, wo*cout) f32 table, rows (s1, b1, sd, bd, s2, b2), each tiled wo
    times to match the lane-folded (col*cout + c) activation layout."""
    rows = [blk["s1"], blk["b1"], blk["sd"], blk["bd"], blk["s2"], blk["b2"]]
    rows = [np.tile(np.asarray(r, np.float32), wo) for r in rows]
    return jnp.asarray(np.stack(rows, 0), jnp.float32)


def prepare_layer_params(raw, H, W):
    """Fold conv weights into the fused kernel's zero-structured big-matmul
    layouts and pack the inference-mode BN affines (depends on H, W since
    they fix each block's Wo)."""
    _, sw1 = STRIDE1
    _, sw2 = STRIDE2
    Wo1 = _conv_out(W, sw1)
    Wo2 = _conv_out(Wo1, sw2)
    if sw1 < 3:
        # TODO(synk): general small-W-stride path (overlapping W taps) is not
        # needed for this module's (2,5)/(2,5)/(1,1) strides.
        raise NotImplementedError("W-fold requires stride_w >= kernel_w")
    if Wo2 != 1:
        raise NotImplementedError("fused kernel assumes blocks 2/3 have Wo == 1")
    b1, b2, b3 = raw["block1"], raw["block2"], raw["block3"]
    return dict(
        w1a=_fold_conv1_weight(b1["w1"], sw1, Wo1),
        wda=_fold_ds_weight(b1["wd"], sw1, Wo1),
        w2a=_fold_conv_s1_weight(b1["w2"], Wo1),
        affa=_pack_affine(b1, Wo1),
        w1b=_fold_conv1_collapse_w_weight(b2["w1"], Wo1),
        wdb=_fold_ds_collapse_w_weight(b2["wd"], Wo1),
        w2b=_conv_1d_weight(b2["w2"]),
        affb=_pack_affine(b2, 1),
        w1c=_conv_1d_weight(b3["w1"]),
        wdc=jnp.asarray(np.asarray(b3["wd"], np.float32)[:, :, 0, 0].T,
                        jnp.bfloat16),
        w2c=_conv_1d_weight(b3["w2"]),
        affc=_pack_affine(b3, 1),
    )


# ---------------------------------------------------------------------------
# Deterministic synthetic parameters
# ---------------------------------------------------------------------------
def make_bn(key, c):
    k1, k2, k3, k4 = jax.random.split(key, 4)
    gamma = 1.0 + 0.1 * jax.random.normal(k1, (c,), jnp.float32)
    beta = 0.1 * jax.random.normal(k2, (c,), jnp.float32)
    mean = 0.1 * jax.random.normal(k3, (c,), jnp.float32)
    var = jax.random.uniform(k4, (c,), jnp.float32, 0.5, 1.5)
    scale = gamma / jnp.sqrt(var + 1e-5)
    bias = beta - mean * scale
    return scale, bias


def make_basic_block_params(key, cin, cout):
    ks = jax.random.split(key, 6)
    w1 = 0.05 * jax.random.normal(ks[0], (cout, cin, 3, 3), jnp.float32)
    s1, b1 = make_bn(ks[1], cout)
    w2 = 0.05 * jax.random.normal(ks[2], (cout, cout, 3, 3), jnp.float32)
    s2, b2 = make_bn(ks[3], cout)
    wd = 0.05 * jax.random.normal(ks[4], (cout, cin, 1, 1), jnp.float32)
    sd, bd = make_bn(ks[5], cout)
    return dict(w1=w1, s1=s1, b1=b1, w2=w2, s2=s2, b2=b2, wd=wd, sd=sd, bd=bd)


# ---------------------------------------------------------------------------
if __name__ == "__main__":
    key = jax.random.PRNGKey(0)
    kx, k1, k2, k3 = jax.random.split(key, 4)

    # resnet_layer's first block takes 32 input channels; small N/H/W
    # compatible with its (2,5)/(2,5)/(1,1) strides.
    x = jax.random.normal(kx, (2, 32, 16, 20), jnp.float32)   # NCHW

    raw_params = {
        "block1": make_basic_block_params(k1, 32, 64),
        "block2": make_basic_block_params(k2, 64, 64),
        "block3": make_basic_block_params(k3, 64, 32),
    }
    prep_params = prepare_layer_params(raw_params, H=16, W=20)

    out = jax.jit(resnet_layer_forward)(x, prep_params)
    out = jax.block_until_ready(out)
    assert out.shape == (2, 32, 4, 1), out.shape
    assert bool(jnp.all(jnp.isfinite(out)))
    print("KERNEL_OK")
</pallas_src>

<mosaic_0001>
module attributes {stable_mosaic.version = 11 : i64} {
  func.func @_fused_layer_kernel(%arg0: i32, %arg1: memref<1x24x640xbf16, #tpu.memory_space<vmem>>, %arg2: memref<3x640x256xbf16, #tpu.memory_space<vmem>>, %arg3: memref<640x256xbf16, #tpu.memory_space<vmem>>, %arg4: memref<3x256x256xbf16, #tpu.memory_space<vmem>>, %arg5: memref<6x256xf32, #tpu.memory_space<vmem>>, %arg6: memref<3x256x64xbf16, #tpu.memory_space<vmem>>, %arg7: memref<256x64xbf16, #tpu.memory_space<vmem>>, %arg8: memref<3x64x64xbf16, #tpu.memory_space<vmem>>, %arg9: memref<6x64xf32, #tpu.memory_space<vmem>>, %arg10: memref<3x64x32xbf16, #tpu.memory_space<vmem>>, %arg11: memref<64x32xbf16, #tpu.memory_space<vmem>>, %arg12: memref<3x32x32xbf16, #tpu.memory_space<vmem>>, %arg13: memref<6x32xf32, #tpu.memory_space<vmem>>, %arg14: memref<1x4x32xf32, #tpu.memory_space<vmem>>) attributes {dimension_semantics = [#tpu.dimension_semantics<parallel>], iteration_bounds = array<i64: 2>, scalar_prefetch = 0 : i64, scratch_operands = 0 : i64, tpu.core_type = #tpu.core_type<tc>, window_params = [{transform_indices = @transform_0, window_bounds = array<i64: 1, 24, 640>}, {pipeline_mode = #tpu.pipeline_mode<synchronous>, transform_indices = @transform_1, window_bounds = array<i64: 3, 640, 256>}, {pipeline_mode = #tpu.pipeline_mode<synchronous>, transform_indices = @transform_2, window_bounds = array<i64: 640, 256>}, {pipeline_mode = #tpu.pipeline_mode<synchronous>, transform_indices = @transform_3, window_bounds = array<i64: 3, 256, 256>}, {pipeline_mode = #tpu.pipeline_mode<synchronous>, transform_indices = @transform_4, window_bounds = array<i64: 6, 256>}, {pipeline_mode = #tpu.pipeline_mode<synchronous>, transform_indices = @transform_5, window_bounds = array<i64: 3, 256, 64>}, {pipeline_mode = #tpu.pipeline_mode<synchronous>, transform_indices = @transform_6, window_bounds = array<i64: 256, 64>}, {pipeline_mode = #tpu.pipeline_mode<synchronous>, transform_indices = @transform_7, window_bounds = array<i64: 3, 64, 64>}, {pipeline_mode = #tpu.pipeline_mode<synchronous>, transform_indices = @transform_8, window_bounds = array<i64: 6, 64>}, {pipeline_mode = #tpu.pipeline_mode<synchronous>, transform_indices = @transform_9, window_bounds = array<i64: 3, 64, 32>}, {pipeline_mode = #tpu.pipeline_mode<synchronous>, transform_indices = @transform_10, window_bounds = array<i64: 64, 32>}, {pipeline_mode = #tpu.pipeline_mode<synchronous>, transform_indices = @transform_11, window_bounds = array<i64: 3, 32, 32>}, {pipeline_mode = #tpu.pipeline_mode<synchronous>, transform_indices = @transform_12, window_bounds = array<i64: 6, 32>}, {transform_indices = @transform_13, window_bounds = array<i64: 1, 4, 32>}]} {
    %c0 = arith.constant 0 : index
    %c0_0 = arith.constant 0 : index
    %c0_1 = arith.constant 0 : index
    %0 = vector.load %arg1[%c0, %c0_0, %c0_1] : memref<1x24x640xbf16, #tpu.memory_space<vmem>>, vector<1x24x640xbf16>
    %1 = vector.shape_cast %0 : vector<1x24x640xbf16> to vector<24x640xbf16>
    %2 = tpu.iota {dimensions = array<i32: 0>} : vector<8x24xi32>
    %3 = tpu.iota {dimensions = array<i32: 1>} : vector<8x24xi32>
    %c2_i32 = arith.constant 2 : i32
    %4 = vector.broadcast %c2_i32 : i32 to vector<8x24xi32>
    %5 = arith.muli %4, %2 : vector<8x24xi32>
    %c0_i32 = arith.constant 0 : i32
    %6 = vector.broadcast %c0_i32 : i32 to vector<8x24xi32>
    %7 = arith.addi %5, %6 : vector<8x24xi32>
    %8 = arith.cmpi eq, %3, %7 : vector<8x24xi32>
    %cst = arith.constant 1.000000e+00 : f32
    %cst_2 = arith.constant 0.000000e+00 : f32
    %9 = vector.broadcast %cst : f32 to vector<8x24xf32>
    %10 = vector.broadcast %cst_2 : f32 to vector<8x24xf32>
    %11 = arith.select %8, %9, %10 : vector<8x24xi1>, vector<8x24xf32>
    %12 = arith.truncf %11 : vector<8x24xf32> to vector<8x24xbf16>
    %cst_3 = arith.constant dense<0.000000e+00> : vector<8x640xf32>
    %13 = tpu.matmul %12, %1, %cst_3 {dimension_numbers = #tpu.dot_dimension_numbers<[1], [0], [0], [1], [0, 0, 1, 1], [], []>} : vector<8x24xbf16>, vector<24x640xbf16>, vector<8x640xf32> -> vector<8x640xf32>
    %14 = arith.truncf %13 : vector<8x640xf32> to vector<8x640xbf16>
    %15 = tpu.iota {dimensions = array<i32: 0>} : vector<8x24xi32>
    %16 = tpu.iota {dimensions = array<i32: 1>} : vector<8x24xi32>
    %c2_i32_4 = arith.constant 2 : i32
    %17 = vector.broadcast %c2_i32_4 : i32 to vector<8x24xi32>
    %18 = arith.muli %17, %15 : vector<8x24xi32>
    %c1_i32 = arith.constant 1 : i32
    %19 = vector.broadcast %c1_i32 : i32 to vector<8x24xi32>
    %20 = arith.addi %18, %19 : vector<8x24xi32>
    %21 = arith.cmpi eq, %16, %20 : vector<8x24xi32>
    %cst_5 = arith.constant 1.000000e+00 : f32
    %cst_6 = arith.constant 0.000000e+00 : f32
    %22 = vector.broadcast %cst_5 : f32 to vector<8x24xf32>
    %23 = vector.broadcast %cst_6 : f32 to vector<8x24xf32>
    %24 = arith.select %21, %22, %23 : vector<8x24xi1>, vector<8x24xf32>
    %25 = arith.truncf %24 : vector<8x24xf32> to vector<8x24xbf16>
    %cst_7 = arith.constant dense<0.000000e+00> : vector<8x640xf32>
    %26 = tpu.matmul %25, %1, %cst_7 {dimension_numbers = #tpu.dot_dimension_numbers<[1], [0], [0], [1], [0, 0, 1, 1], [], []>} : vector<8x24xbf16>, vector<24x640xbf16>, vector<8x640xf32> -> vector<8x640xf32>
    %27 = arith.truncf %26 : vector<8x640xf32> to vector<8x640xbf16>
    %28 = tpu.iota {dimensions = array<i32: 0>} : vector<8x24xi32>
    %29 = tpu.iota {dimensions = array<i32: 1>} : vector<8x24xi32>
    %c2_i32_8 = arith.constant 2 : i32
    %30 = vector.broadcast %c2_i32_8 : i32 to vector<8x24xi32>
    %31 = arith.muli %30, %28 : vector<8x24xi32>
    %c2_i32_9 = arith.constant 2 : i32
    %32 = vector.broadcast %c2_i32_9 : i32 to vector<8x24xi32>
    %33 = arith.addi %31, %32 : vector<8x24xi32>
    %34 = arith.cmpi eq, %29, %33 : vector<8x24xi32>
    %cst_10 = arith.constant 1.000000e+00 : f32
    %cst_11 = arith.constant 0.000000e+00 : f32
    %35 = vector.broadcast %cst_10 : f32 to vector<8x24xf32>
    %36 = vector.broadcast %cst_11 : f32 to vector<8x24xf32>
    %37 = arith.select %34, %35, %36 : vector<8x24xi1>, vector<8x24xf32>
    %38 = arith.truncf %37 : vector<8x24xf32> to vector<8x24xbf16>
    %cst_12 = arith.constant dense<0.000000e+00> : vector<8x640xf32>
    %39 = tpu.matmul %38, %1, %cst_12 {dimension_numbers = #tpu.dot_dimension_numbers<[1], [0], [0], [1], [0, 0, 1, 1], [], []>} : vector<8x24xbf16>, vector<24x640xbf16>, vector<8x640xf32> -> vector<8x640xf32>
    %40 = arith.truncf %39 : vector<8x640xf32> to vector<8x640xbf16>
    %c0_13 = arith.constant 0 : index
    %c0_14 = arith.constant 0 : index
    %c0_15 = arith.constant 0 : index
    %41 = vector.load %arg2[%c0_13, %c0_14, %c0_15] : memref<3x640x256xbf16, #tpu.memory_space<vmem>>, vector<1x640x256xbf16>
    %42 = vector.shape_cast %41 : vector<1x640x256xbf16> to vector<640x256xbf16>
    %cst_16 = arith.constant dense<0.000000e+00> : vector<8x256xf32>
    %43 = tpu.matmul %14, %42, %cst_16 {dimension_numbers = #tpu.dot_dimension_numbers<[1], [0], [0], [1], [0, 0, 1, 1], [], []>} : vector<8x640xbf16>, vector<640x256xbf16>, vector<8x256xf32> -> vector<8x256xf32>
    %c1 = arith.constant 1 : index
    %c0_17 = arith.constant 0 : index
    %c0_18 = arith.constant 0 : index
    %44 = vector.load %arg2[%c1, %c0_17, %c0_18] : memref<3x640x256xbf16, #tpu.memory_space<vmem>>, vector<1x640x256xbf16>
    %45 = vector.shape_cast %44 : vector<1x640x256xbf16> to vector<640x256xbf16>
    %cst_19 = arith.constant dense<0.000000e+00> : vector<8x256xf32>
    %46 = tpu.matmul %27, %45, %cst_19 {dimension_numbers = #tpu.dot_dimension_numbers<[1], [0], [0], [1], [0, 0, 1, 1], [], []>} : vector<8x640xbf16>, vector<640x256xbf16>, vector<8x256xf32> -> vector<8x256xf32>
    %47 = arith.addf %43, %46 : vector<8x256xf32>
    %c2 = arith.constant 2 : index
    %c0_20 = arith.constant 0 : index
    %c0_21 = arith.constant 0 : index
    %48 = vector.load %arg2[%c2, %c0_20, %c0_21] : memref<3x640x256xbf16, #tpu.memory_space<vmem>>, vector<1x640x256xbf16>
    %49 = vector.shape_cast %48 : vector<1x640x256xbf16> to vector<640x256xbf16>
    %cst_22 = arith.constant dense<0.000000e+00> : vector<8x256xf32>
    %50 = tpu.matmul %40, %49, %cst_22 {dimension_numbers = #tpu.dot_dimension_numbers<[1], [0], [0], [1], [0, 0, 1, 1], [], []>} : vector<8x640xbf16>, vector<640x256xbf16>, vector<8x256xf32> -> vector<8x256xf32>
    %51 = arith.addf %47, %50 : vector<8x256xf32>
    %c0_23 = arith.constant 0 : index
    %c0_24 = arith.constant 0 : index
    %52 = vector.load %arg5[%c0_23, %c0_24] : memref<6x256xf32, #tpu.memory_space<vmem>>, vector<1x256xf32>
    %53 = vector.broadcast %52 : vector<1x256xf32> to vector<8x256xf32>
    %54 = arith.mulf %51, %53 : vector<8x256xf32>
    %c1_25 = arith.constant 1 : index
    %c0_26 = arith.constant 0 : index
    %55 = vector.load %arg5[%c1_25, %c0_26] : memref<6x256xf32, #tpu.memory_space<vmem>>, vector<1x256xf32>
    %56 = vector.broadcast %55 : vector<1x256xf32> to vector<8x256xf32>
    %57 = arith.addf %54, %56 : vector<8x256xf32>
    %cst_27 = arith.constant 0.000000e+00 : f32
    %58 = vector.broadcast %cst_27 : f32 to vector<8x256xf32>
    %59 = arith.maximumf %57, %58 : vector<8x256xf32>
    %c0_28 = arith.constant 0 : index
    %c0_29 = arith.constant 0 : index
    %60 = vector.load %arg3[%c0_28, %c0_29] : memref<640x256xbf16, #tpu.memory_space<vmem>>, vector<640x256xbf16>
    %cst_30 = arith.constant dense<0.000000e+00> : vector<8x256xf32>
    %61 = tpu.matmul %27, %60, %cst_30 {dimension_numbers = #tpu.dot_dimension_numbers<[1], [0], [0], [1], [0, 0, 1, 1], [], []>} : vector<8x640xbf16>, vector<640x256xbf16>, vector<8x256xf32> -> vector<8x256xf32>
    %c2_31 = arith.constant 2 : index
    %c0_32 = arith.constant 0 : index
    %62 = vector.load %arg5[%c2_31, %c0_32] : memref<6x256xf32, #tpu.memory_space<vmem>>, vector<1x256xf32>
    %63 = vector.broadcast %62 : vector<1x256xf32> to vector<8x256xf32>
    %64 = arith.mulf %61, %63 : vector<8x256xf32>
    %c3 = arith.constant 3 : index
    %c0_33 = arith.constant 0 : index
    %65 = vector.load %arg5[%c3, %c0_33] : memref<6x256xf32, #tpu.memory_space<vmem>>, vector<1x256xf32>
    %66 = vector.broadcast %65 : vector<1x256xf32> to vector<8x256xf32>
    %67 = arith.addf %64, %66 : vector<8x256xf32>
    %68 = arith.truncf %59 : vector<8x256xf32> to vector<8x256xbf16>
    %69 = tpu.iota {dimensions = array<i32: 0>} : vector<8x8xi32>
    %70 = tpu.iota {dimensions = array<i32: 1>} : vector<8x8xi32>
    %c1_i32_34 = arith.constant 1 : i32
    %71 = vector.broadcast %c1_i32_34 : i32 to vector<8x8xi32>
    %72 = arith.muli %71, %69 : vector<8x8xi32>
    %c-1_i32 = arith.constant -1 : i32
    %73 = vector.broadcast %c-1_i32 : i32 to vector<8x8xi32>
    %74 = arith.addi %72, %73 : vector<8x8xi32>
    %75 = arith.cmpi eq, %70, %74 : vector<8x8xi32>
    %cst_35 = arith.constant 1.000000e+00 : f32
    %cst_36 = arith.constant 0.000000e+00 : f32
    %76 = vector.broadcast %cst_35 : f32 to vector<8x8xf32>
    %77 = vector.broadcast %cst_36 : f32 to vector<8x8xf32>
    %78 = arith.select %75, %76, %77 : vector<8x8xi1>, vector<8x8xf32>
    %79 = arith.truncf %78 : vector<8x8xf32> to vector<8x8xbf16>
    %cst_37 = arith.constant dense<0.000000e+00> : vector<8x256xf32>
    %80 = tpu.matmul %79, %68, %cst_37 {dimension_numbers = #tpu.dot_dimension_numbers<[1], [0], [0], [1], [0, 0, 1, 1], [], []>} : vector<8x8xbf16>, vector<8x256xbf16>, vector<8x256xf32> -> vector<8x256xf32>
    %81 = arith.truncf %80 : vector<8x256xf32> to vector<8x256xbf16>
    %82 = tpu.iota {dimensions = array<i32: 0>} : vector<8x8xi32>
    %83 = tpu.iota {dimensions = array<i32: 1>} : vector<8x8xi32>
    %c1_i32_38 = arith.constant 1 : i32
    %84 = vector.broadcast %c1_i32_38 : i32 to vector<8x8xi32>
    %85 = arith.muli %84, %82 : vector<8x8xi32>
    %c1_i32_39 = arith.constant 1 : i32
    %86 = vector.broadcast %c1_i32_39 : i32 to vector<8x8xi32>
    %87 = arith.addi %85, %86 : vector<8x8xi32>
    %88 = arith.cmpi eq, %83, %87 : vector<8x8xi32>
    %cst_40 = arith.constant 1.000000e+00 : f32
    %cst_41 = arith.constant 0.000000e+00 : f32
    %89 = vector.broadcast %cst_40 : f32 to vector<8x8xf32>
    %90 = vector.broadcast %cst_41 : f32 to vector<8x8xf32>
    %91 = arith.select %88, %89, %90 : vector<8x8xi1>, vector<8x8xf32>
    %92 = arith.truncf %91 : vector<8x8xf32> to vector<8x8xbf16>
    %cst_42 = arith.constant dense<0.000000e+00> : vector<8x256xf32>
    %93 = tpu.matmul %92, %68, %cst_42 {dimension_numbers = #tpu.dot_dimension_numbers<[1], [0], [0], [1], [0, 0, 1, 1], [], []>} : vector<8x8xbf16>, vector<8x256xbf16>, vector<8x256xf32> -> vector<8x256xf32>
    %94 = arith.truncf %93 : vector<8x256xf32> to vector<8x256xbf16>
    %c0_43 = arith.constant 0 : index
    %c0_44 = arith.constant 0 : index
    %c0_45 = arith.constant 0 : index
    %95 = vector.load %arg4[%c0_43, %c0_44, %c0_45] : memref<3x256x256xbf16, #tpu.memory_space<vmem>>, vector<1x256x256xbf16>
    %96 = vector.shape_cast %95 : vector<1x256x256xbf16> to vector<256x256xbf16>
    %cst_46 = arith.constant dense<0.000000e+00> : vector<8x256xf32>
    %97 = tpu.matmul %81, %96, %cst_46 {dimension_numbers = #tpu.dot_dimension_numbers<[1], [0], [0], [1], [0, 0, 1, 1], [], []>} : vector<8x256xbf16>, vector<256x256xbf16>, vector<8x256xf32> -> vector<8x256xf32>
    %c1_47 = arith.constant 1 : index
    %c0_48 = arith.constant 0 : index
    %c0_49 = arith.constant 0 : index
    %98 = vector.load %arg4[%c1_47, %c0_48, %c0_49] : memref<3x256x256xbf16, #tpu.memory_space<vmem>>, vector<1x256x256xbf16>
    %99 = vector.shape_cast %98 : vector<1x256x256xbf16> to vector<256x256xbf16>
    %cst_50 = arith.constant dense<0.000000e+00> : vector<8x256xf32>
    %100 = tpu.matmul %68, %99, %cst_50 {dimension_numbers = #tpu.dot_dimension_numbers<[1], [0], [0], [1], [0, 0, 1, 1], [], []>} : vector<8x256xbf16>, vector<256x256xbf16>, vector<8x256xf32> -> vector<8x256xf32>
    %101 = arith.addf %97, %100 : vector<8x256xf32>
    %c2_51 = arith.constant 2 : index
    %c0_52 = arith.constant 0 : index
    %c0_53 = arith.constant 0 : index
    %102 = vector.load %arg4[%c2_51, %c0_52, %c0_53] : memref<3x256x256xbf16, #tpu.memory_space<vmem>>, vector<1x256x256xbf16>
    %103 = vector.shape_cast %102 : vector<1x256x256xbf16> to vector<256x256xbf16>
    %cst_54 = arith.constant dense<0.000000e+00> : vector<8x256xf32>
    %104 = tpu.matmul %94, %103, %cst_54 {dimension_numbers = #tpu.dot_dimension_numbers<[1], [0], [0], [1], [0, 0, 1, 1], [], []>} : vector<8x256xbf16>, vector<256x256xbf16>, vector<8x256xf32> -> vector<8x256xf32>
    %105 = arith.addf %101, %104 : vector<8x256xf32>
    %c4 = arith.constant 4 : index
    %c0_55 = arith.constant 0 : index
    %106 = vector.load %arg5[%c4, %c0_55] : memref<6x256xf32, #tpu.memory_space<vmem>>, vector<1x256xf32>
    %107 = vector.broadcast %106 : vector<1x256xf32> to vector<8x256xf32>
    %108 = arith.mulf %105, %107 : vector<8x256xf32>
    %c5 = arith.constant 5 : index
    %c0_56 = arith.constant 0 : index
    %109 = vector.load %arg5[%c5, %c0_56] : memref<6x256xf32, #tpu.memory_space<vmem>>, vector<1x256xf32>
    %110 = vector.broadcast %109 : vector<1x256xf32> to vector<8x256xf32>
    %111 = arith.addf %108, %110 : vector<8x256xf32>
    %112 = arith.addf %111, %67 : vector<8x256xf32>
    %cst_57 = arith.constant 0.000000e+00 : f32
    %113 = vector.broadcast %cst_57 : f32 to vector<8x256xf32>
    %114 = arith.maximumf %112, %113 : vector<8x256xf32>
    %115 = arith.truncf %114 : vector<8x256xf32> to vector<8x256xbf16>
    %116 = tpu.iota {dimensions = array<i32: 0>} : vector<4x8xi32>
    %117 = tpu.iota {dimensions = array<i32: 1>} : vector<4x8xi32>
    %c2_i32_58 = arith.constant 2 : i32
    %118 = vector.broadcast %c2_i32_58 : i32 to vector<4x8xi32>
    %119 = arith.muli %118, %116 : vector<4x8xi32>
    %c-1_i32_59 = arith.constant -1 : i32
    %120 = vector.broadcast %c-1_i32_59 : i32 to vector<4x8xi32>
    %121 = arith.addi %119, %120 : vector<4x8xi32>
    %122 = arith.cmpi eq, %117, %121 : vector<4x8xi32>
    %cst_60 = arith.constant 1.000000e+00 : f32
    %cst_61 = arith.constant 0.000000e+00 : f32
    %123 = vector.broadcast %cst_60 : f32 to vector<4x8xf32>
    %124 = vector.broadcast %cst_61 : f32 to vector<4x8xf32>
    %125 = arith.select %122, %123, %124 : vector<4x8xi1>, vector<4x8xf32>
    %126 = arith.truncf %125 : vector<4x8xf32> to vector<4x8xbf16>
    %cst_62 = arith.constant dense<0.000000e+00> : vector<4x256xf32>
    %127 = tpu.matmul %126, %115, %cst_62 {dimension_numbers = #tpu.dot_dimension_numbers<[1], [0], [0], [1], [0, 0, 1, 1], [], []>} : vector<4x8xbf16>, vector<8x256xbf16>, vector<4x256xf32> -> vector<4x256xf32>
    %128 = arith.truncf %127 : vector<4x256xf32> to vector<4x256xbf16>
    %129 = tpu.iota {dimensions = array<i32: 0>} : vector<4x8xi32>
    %130 = tpu.iota {dimensions = array<i32: 1>} : vector<4x8xi32>
    %c2_i32_63 = arith.constant 2 : i32
    %131 = vector.broadcast %c2_i32_63 : i32 to vector<4x8xi32>
    %132 = arith.muli %131, %129 : vector<4x8xi32>
    %c0_i32_64 = arith.constant 0 : i32
    %133 = vector.broadcast %c0_i32_64 : i32 to vector<4x8xi32>
    %134 = arith.addi %132, %133 : vector<4x8xi32>
    %135 = arith.cmpi eq, %130, %134 : vector<4x8xi32>
    %cst_65 = arith.constant 1.000000e+00 : f32
    %cst_66 = arith.constant 0.000000e+00 : f32
    %136 = vector.broadcast %cst_65 : f32 to vector<4x8xf32>
    %137 = vector.broadcast %cst_66 : f32 to vector<4x8xf32>
    %138 = arith.select %135, %136, %137 : vector<4x8xi1>, vector<4x8xf32>
    %139 = arith.truncf %138 : vector<4x8xf32> to vector<4x8xbf16>
    %cst_67 = arith.constant dense<0.000000e+00> : vector<4x256xf32>
    %140 = tpu.matmul %139, %115, %cst_67 {dimension_numbers = #tpu.dot_dimension_numbers<[1], [0], [0], [1], [0, 0, 1, 1], [], []>} : vector<4x8xbf16>, vector<8x256xbf16>, vector<4x256xf32> -> vector<4x256xf32>
    %141 = arith.truncf %140 : vector<4x256xf32> to vector<4x256xbf16>
    %142 = tpu.iota {dimensions = array<i32: 0>} : vector<4x8xi32>
    %143 = tpu.iota {dimensions = array<i32: 1>} : vector<4x8xi32>
    %c2_i32_68 = arith.constant 2 : i32
    %144 = vector.broadcast %c2_i32_68 : i32 to vector<4x8xi32>
    %145 = arith.muli %144, %142 : vector<4x8xi32>
    %c1_i32_69 = arith.constant 1 : i32
    %146 = vector.broadcast %c1_i32_69 : i32 to vector<4x8xi32>
    %147 = arith.addi %145, %146 : vector<4x8xi32>
    %148 = arith.cmpi eq, %143, %147 : vector<4x8xi32>
    %cst_70 = arith.constant 1.000000e+00 : f32
    %cst_71 = arith.constant 0.000000e+00 : f32
    %149 = vector.broadcast %cst_70 : f32 to vector<4x8xf32>
    %150 = vector.broadcast %cst_71 : f32 to vector<4x8xf32>
    %151 = arith.select %148, %149, %150 : vector<4x8xi1>, vector<4x8xf32>
    %152 = arith.truncf %151 : vector<4x8xf32> to vector<4x8xbf16>
    %cst_72 = arith.constant dense<0.000000e+00> : vector<4x256xf32>
    %153 = tpu.matmul %152, %115, %cst_72 {dimension_numbers = #tpu.dot_dimension_numbers<[1], [0], [0], [1], [0, 0, 1, 1], [], []>} : vector<4x8xbf16>, vector<8x256xbf16>, vector<4x256xf32> -> vector<4x256xf32>
    %154 = arith.truncf %153 : vector<4x256xf32> to vector<4x256xbf16>
    %c0_73 = arith.constant 0 : index
    %c0_74 = arith.constant 0 : index
    %c0_75 = arith.constant 0 : index
    %155 = vector.load %arg6[%c0_73, %c0_74, %c0_75] : memref<3x256x64xbf16, #tpu.memory_space<vmem>>, vector<1x256x64xbf16>
    %156 = vector.shape_cast %155 : vector<1x256x64xbf16> to vector<256x64xbf16>
    %cst_76 = arith.constant dense<0.000000e+00> : vector<4x64xf32>
    %157 = tpu.matmul %128, %156, %cst_76 {dimension_numbers = #tpu.dot_dimension_numbers<[1], [0], [0], [1], [0, 0, 1, 1], [], []>} : vector<4x256xbf16>, vector<256x64xbf16>, vector<4x64xf32> -> vector<4x64xf32>
    %c1_77 = arith.constant 1 : index
    %c0_78 = arith.constant 0 : index
    %c0_79 = arith.constant 0 : index
    %158 = vector.load %arg6[%c1_77, %c0_78, %c0_79] : memref<3x256x64xbf16, #tpu.memory_space<vmem>>, vector<1x256x64xbf16>
    %159 = vector.shape_cast %158 : vector<1x256x64xbf16> to vector<256x64xbf16>
    %cst_80 = arith.constant dense<0.000000e+00> : vector<4x64xf32>
    %160 = tpu.matmul %141, %159, %cst_80 {dimension_numbers = #tpu.dot_dimension_numbers<[1], [0], [0], [1], [0, 0, 1, 1], [], []>} : vector<4x256xbf16>, vector<256x64xbf16>, vector<4x64xf32> -> vector<4x64xf32>
    %161 = arith.addf %157, %160 : vector<4x64xf32>
    %c2_81 = arith.constant 2 : index
    %c0_82 = arith.constant 0 : index
    %c0_83 = arith.constant 0 : index
    %162 = vector.load %arg6[%c2_81, %c0_82, %c0_83] : memref<3x256x64xbf16, #tpu.memory_space<vmem>>, vector<1x256x64xbf16>
    %163 = vector.shape_cast %162 : vector<1x256x64xbf16> to vector<256x64xbf16>
    %cst_84 = arith.constant dense<0.000000e+00> : vector<4x64xf32>
    %164 = tpu.matmul %154, %163, %cst_84 {dimension_numbers = #tpu.dot_dimension_numbers<[1], [0], [0], [1], [0, 0, 1, 1], [], []>} : vector<4x256xbf16>, vector<256x64xbf16>, vector<4x64xf32> -> vector<4x64xf32>
    %165 = arith.addf %161, %164 : vector<4x64xf32>
    %c0_85 = arith.constant 0 : index
    %c0_86 = arith.constant 0 : index
    %166 = vector.load %arg9[%c0_85, %c0_86] : memref<6x64xf32, #tpu.memory_space<vmem>>, vector<1x64xf32>
    %167 = vector.broadcast %166 : vector<1x64xf32> to vector<4x64xf32>
    %168 = arith.mulf %165, %167 : vector<4x64xf32>
    %c1_87 = arith.constant 1 : index
    %c0_88 = arith.constant 0 : index
    %169 = vector.load %arg9[%c1_87, %c0_88] : memref<6x64xf32, #tpu.memory_space<vmem>>, vector<1x64xf32>
    %170 = vector.broadcast %169 : vector<1x64xf32> to vector<4x64xf32>
    %171 = arith.addf %168, %170 : vector<4x64xf32>
    %cst_89 = arith.constant 0.000000e+00 : f32
    %172 = vector.broadcast %cst_89 : f32 to vector<4x64xf32>
    %173 = arith.maximumf %171, %172 : vector<4x64xf32>
    %c0_90 = arith.constant 0 : index
    %c0_91 = arith.constant 0 : index
    %174 = vector.load %arg7[%c0_90, %c0_91] : memref<256x64xbf16, #tpu.memory_space<vmem>>, vector<256x64xbf16>
    %cst_92 = arith.constant dense<0.000000e+00> : vector<4x64xf32>
    %175 = tpu.matmul %141, %174, %cst_92 {dimension_numbers = #tpu.dot_dimension_numbers<[1], [0], [0], [1], [0, 0, 1, 1], [], []>} : vector<4x256xbf16>, vector<256x64xbf16>, vector<4x64xf32> -> vector<4x64xf32>
    %c2_93 = arith.constant 2 : index
    %c0_94 = arith.constant 0 : index
    %176 = vector.load %arg9[%c2_93, %c0_94] : memref<6x64xf32, #tpu.memory_space<vmem>>, vector<1x64xf32>
    %177 = vector.broadcast %176 : vector<1x64xf32> to vector<4x64xf32>
    %178 = arith.mulf %175, %177 : vector<4x64xf32>
    %c3_95 = arith.constant 3 : index
    %c0_96 = arith.constant 0 : index
    %179 = vector.load %arg9[%c3_95, %c0_96] : memref<6x64xf32, #tpu.memory_space<vmem>>, vector<1x64xf32>
    %180 = vector.broadcast %179 : vector<1x64xf32> to vector<4x64xf32>
    %181 = arith.addf %178, %180 : vector<4x64xf32>
    %182 = arith.truncf %173 : vector<4x64xf32> to vector<4x64xbf16>
    %183 = tpu.iota {dimensions = array<i32: 0>} : vector<4x4xi32>
    %184 = tpu.iota {dimensions = array<i32: 1>} : vector<4x4xi32>
    %c1_i32_97 = arith.constant 1 : i32
    %185 = vector.broadcast %c1_i32_97 : i32 to vector<4x4xi32>
    %186 = arith.muli %185, %183 : vector<4x4xi32>
    %c-1_i32_98 = arith.constant -1 : i32
    %187 = vector.broadcast %c-1_i32_98 : i32 to vector<4x4xi32>
    %188 = arith.addi %186, %187 : vector<4x4xi32>
    %189 = arith.cmpi eq, %184, %188 : vector<4x4xi32>
    %cst_99 = arith.constant 1.000000e+00 : f32
    %cst_100 = arith.constant 0.000000e+00 : f32
    %190 = vector.broadcast %cst_99 : f32 to vector<4x4xf32>
    %191 = vector.broadcast %cst_100 : f32 to vector<4x4xf32>
    %192 = arith.select %189, %190, %191 : vector<4x4xi1>, vector<4x4xf32>
    %193 = arith.truncf %192 : vector<4x4xf32> to vector<4x4xbf16>
    %cst_101 = arith.constant dense<0.000000e+00> : vector<4x64xf32>
    %194 = tpu.matmul %193, %182, %cst_101 {dimension_numbers = #tpu.dot_dimension_numbers<[1], [0], [0], [1], [0, 0, 1, 1], [], []>} : vector<4x4xbf16>, vector<4x64xbf16>, vector<4x64xf32> -> vector<4x64xf32>
    %195 = arith.truncf %194 : vector<4x64xf32> to vector<4x64xbf16>
    %196 = tpu.iota {dimensions = array<i32: 0>} : vector<4x4xi32>
    %197 = tpu.iota {dimensions = array<i32: 1>} : vector<4x4xi32>
    %c1_i32_102 = arith.constant 1 : i32
    %198 = vector.broadcast %c1_i32_102 : i32 to vector<4x4xi32>
    %199 = arith.muli %198, %196 : vector<4x4xi32>
    %c1_i32_103 = arith.constant 1 : i32
    %200 = vector.broadcast %c1_i32_103 : i32 to vector<4x4xi32>
    %201 = arith.addi %199, %200 : vector<4x4xi32>
    %202 = arith.cmpi eq, %197, %201 : vector<4x4xi32>
    %cst_104 = arith.constant 1.000000e+00 : f32
    %cst_105 = arith.constant 0.000000e+00 : f32
    %203 = vector.broadcast %cst_104 : f32 to vector<4x4xf32>
    %204 = vector.broadcast %cst_105 : f32 to vector<4x4xf32>
    %205 = arith.select %202, %203, %204 : vector<4x4xi1>, vector<4x4xf32>
    %206 = arith.truncf %205 : vector<4x4xf32> to vector<4x4xbf16>
    %cst_106 = arith.constant dense<0.000000e+00> : vector<4x64xf32>
    %207 = tpu.matmul %206, %182, %cst_106 {dimension_numbers = #tpu.dot_dimension_numbers<[1], [0], [0], [1], [0, 0, 1, 1], [], []>} : vector<4x4xbf16>, vector<4x64xbf16>, vector<4x64xf32> -> vector<4x64xf32>
    %208 = arith.truncf %207 : vector<4x64xf32> to vector<4x64xbf16>
    %c0_107 = arith.constant 0 : index
    %c0_108 = arith.constant 0 : index
    %c0_109 = arith.constant 0 : index
    %209 = vector.load %arg8[%c0_107, %c0_108, %c0_109] : memref<3x64x64xbf16, #tpu.memory_space<vmem>>, vector<1x64x64xbf16>
    %210 = vector.shape_cast %209 : vector<1x64x64xbf16> to vector<64x64xbf16>
    %cst_110 = arith.constant dense<0.000000e+00> : vector<4x64xf32>
    %211 = tpu.matmul %195, %210, %cst_110 {dimension_numbers = #tpu.dot_dimension_numbers<[1], [0], [0], [1], [0, 0, 1, 1], [], []>} : vector<4x64xbf16>, vector<64x64xbf16>, vector<4x64xf32> -> vector<4x64xf32>
    %c1_111 = arith.constant 1 : index
    %c0_112 = arith.constant 0 : index
    %c0_113 = arith.constant 0 : index
    %212 = vector.load %arg8[%c1_111, %c0_112, %c0_113] : memref<3x64x64xbf16, #tpu.memory_space<vmem>>, vector<1x64x64xbf16>
    %213 = vector.shape_cast %212 : vector<1x64x64xbf16> to vector<64x64xbf16>
    %cst_114 = arith.constant dense<0.000000e+00> : vector<4x64xf32>
    %214 = tpu.matmul %182, %213, %cst_114 {dimension_numbers = #tpu.dot_dimension_numbers<[1], [0], [0], [1], [0, 0, 1, 1], [], []>} : vector<4x64xbf16>, vector<64x64xbf16>, vector<4x64xf32> -> vector<4x64xf32>
    %215 = arith.addf %211, %214 : vector<4x64xf32>
    %c2_115 = arith.constant 2 : index
    %c0_116 = arith.constant 0 : index
    %c0_117 = arith.constant 0 : index
    %216 = vector.load %arg8[%c2_115, %c0_116, %c0_117] : memref<3x64x64xbf16, #tpu.memory_space<vmem>>, vector<1x64x64xbf16>
    %217 = vector.shape_cast %216 : vector<1x64x64xbf16> to vector<64x64xbf16>
    %cst_118 = arith.constant dense<0.000000e+00> : vector<4x64xf32>
    %218 = tpu.matmul %208, %217, %cst_118 {dimension_numbers = #tpu.dot_dimension_numbers<[1], [0], [0], [1], [0, 0, 1, 1], [], []>} : vector<4x64xbf16>, vector<64x64xbf16>, vector<4x64xf32> -> vector<4x64xf32>
    %219 = arith.addf %215, %218 : vector<4x64xf32>
    %c4_119 = arith.constant 4 : index
    %c0_120 = arith.constant 0 : index
    %220 = vector.load %arg9[%c4_119, %c0_120] : memref<6x64xf32, #tpu.memory_space<vmem>>, vector<1x64xf32>
    %221 = vector.broadcast %220 : vector<1x64xf32> to vector<4x64xf32>
    %222 = arith.mulf %219, %221 : vector<4x64xf32>
    %c5_121 = arith.constant 5 : index
    %c0_122 = arith.constant 0 : index
    %223 = vector.load %arg9[%c5_121, %c0_122] : memref<6x64xf32, #tpu.memory_space<vmem>>, vector<1x64xf32>
    %224 = vector.broadcast %223 : vector<1x64xf32> to vector<4x64xf32>
    %225 = arith.addf %222, %224 : vector<4x64xf32>
    %226 = arith.addf %225, %181 : vector<4x64xf32>
    %cst_123 = arith.constant 0.000000e+00 : f32
    %227 = vector.broadcast %cst_123 : f32 to vector<4x64xf32>
    %228 = arith.maximumf %226, %227 : vector<4x64xf32>
    %229 = arith.truncf %228 : vector<4x64xf32> to vector<4x64xbf16>
    %230 = tpu.iota {dimensions = array<i32: 0>} : vector<4x4xi32>
    %231 = tpu.iota {dimensions = array<i32: 1>} : vector<4x4xi32>
    %c1_i32_124 = arith.constant 1 : i32
    %232 = vector.broadcast %c1_i32_124 : i32 to vector<4x4xi32>
    %233 = arith.muli %232, %230 : vector<4x4xi32>
    %c-1_i32_125 = arith.constant -1 : i32
    %234 = vector.broadcast %c-1_i32_125 : i32 to vector<4x4xi32>
    %235 = arith.addi %233, %234 : vector<4x4xi32>
    %236 = arith.cmpi eq, %231, %235 : vector<4x4xi32>
    %cst_126 = arith.constant 1.000000e+00 : f32
    %cst_127 = arith.constant 0.000000e+00 : f32
    %237 = vector.broadcast %cst_126 : f32 to vector<4x4xf32>
    %238 = vector.broadcast %cst_127 : f32 to vector<4x4xf32>
    %239 = arith.select %236, %237, %238 : vector<4x4xi1>, vector<4x4xf32>
    %240 = arith.truncf %239 : vector<4x4xf32> to vector<4x4xbf16>
    %cst_128 = arith.constant dense<0.000000e+00> : vector<4x64xf32>
    %241 = tpu.matmul %240, %229, %cst_128 {dimension_numbers = #tpu.dot_dimension_numbers<[1], [0], [0], [1], [0, 0, 1, 1], [], []>} : vector<4x4xbf16>, vector<4x64xbf16>, vector<4x64xf32> -> vector<4x64xf32>
    %242 = arith.truncf %241 : vector<4x64xf32> to vector<4x64xbf16>
    %243 = tpu.iota {dimensions = array<i32: 0>} : vector<4x4xi32>
    %244 = tpu.iota {dimensions = array<i32: 1>} : vector<4x4xi32>
    %c1_i32_129 = arith.constant 1 : i32
    %245 = vector.broadcast %c1_i32_129 : i32 to vector<4x4xi32>
    %246 = arith.muli %245, %243 : vector<4x4xi32>
    %c1_i32_130 = arith.constant 1 : i32
    %247 = vector.broadcast %c1_i32_130 : i32 to vector<4x4xi32>
    %248 = arith.addi %246, %247 : vector<4x4xi32>
    %249 = arith.cmpi eq, %244, %248 : vector<4x4xi32>
    %cst_131 = arith.constant 1.000000e+00 : f32
    %cst_132 = arith.constant 0.000000e+00 : f32
    %250 = vector.broadcast %cst_131 : f32 to vector<4x4xf32>
    %251 = vector.broadcast %cst_132 : f32 to vector<4x4xf32>
    %252 = arith.select %249, %250, %251 : vector<4x4xi1>, vector<4x4xf32>
    %253 = arith.truncf %252 : vector<4x4xf32> to vector<4x4xbf16>
    %cst_133 = arith.constant dense<0.000000e+00> : vector<4x64xf32>
    %254 = tpu.matmul %253, %229, %cst_133 {dimension_numbers = #tpu.dot_dimension_numbers<[1], [0], [0], [1], [0, 0, 1, 1], [], []>} : vector<4x4xbf16>, vector<4x64xbf16>, vector<4x64xf32> -> vector<4x64xf32>
    %255 = arith.truncf %254 : vector<4x64xf32> to vector<4x64xbf16>
    %c0_134 = arith.constant 0 : index
    %c0_135 = arith.constant 0 : index
    %c0_136 = arith.constant 0 : index
    %256 = vector.load %arg10[%c0_134, %c0_135, %c0_136] : memref<3x64x32xbf16, #tpu.memory_space<vmem>>, vector<1x64x32xbf16>
    %257 = vector.shape_cast %256 : vector<1x64x32xbf16> to vector<64x32xbf16>
    %cst_137 = arith.constant dense<0.000000e+00> : vector<4x32xf32>
    %258 = tpu.matmul %242, %257, %cst_137 {dimension_numbers = #tpu.dot_dimension_numbers<[1], [0], [0], [1], [0, 0, 1, 1], [], []>} : vector<4x64xbf16>, vector<64x32xbf16>, vector<4x32xf32> -> vector<4x32xf32>
    %c1_138 = arith.constant 1 : index
    %c0_139 = arith.constant 0 : index
    %c0_140 = arith.constant 0 : index
    %259 = vector.load %arg10[%c1_138, %c0_139, %c0_140] : memref<3x64x32xbf16, #tpu.memory_space<vmem>>, vector<1x64x32xbf16>
    %260 = vector.shape_cast %259 : vector<1x64x32xbf16> to vector<64x32xbf16>
    %cst_141 = arith.constant dense<0.000000e+00> : vector<4x32xf32>
    %261 = tpu.matmul %229, %260, %cst_141 {dimension_numbers = #tpu.dot_dimension_numbers<[1], [0], [0], [1], [0, 0, 1, 1], [], []>} : vector<4x64xbf16>, vector<64x32xbf16>, vector<4x32xf32> -> vector<4x32xf32>
    %262 = arith.addf %258, %261 : vector<4x32xf32>
    %c2_142 = arith.constant 2 : index
    %c0_143 = arith.constant 0 : index
    %c0_144 = arith.constant 0 : index
    %263 = vector.load %arg10[%c2_142, %c0_143, %c0_144] : memref<3x64x32xbf16, #tpu.memory_space<vmem>>, vector<1x64x32xbf16>
    %264 = vector.shape_cast %263 : vector<1x64x32xbf16> to vector<64x32xbf16>
    %cst_145 = arith.constant dense<0.000000e+00> : vector<4x32xf32>
    %265 = tpu.matmul %255, %264, %cst_145 {dimension_numbers = #tpu.dot_dimension_numbers<[1], [0], [0], [1], [0, 0, 1, 1], [], []>} : vector<4x64xbf16>, vector<64x32xbf16>, vector<4x32xf32> -> vector<4x32xf32>
    %266 = arith.addf %262, %265 : vector<4x32xf32>
    %c0_146 = arith.constant 0 : index
    %c0_147 = arith.constant 0 : index
    %267 = vector.load %arg13[%c0_146, %c0_147] : memref<6x32xf32, #tpu.memory_space<vmem>>, vector<1x32xf32>
    %268 = vector.broadcast %267 : vector<1x32xf32> to vector<4x32xf32>
    %269 = arith.mulf %266, %268 : vector<4x32xf32>
    %c1_148 = arith.constant 1 : index
    %c0_149 = arith.constant 0 : index
    %270 = vector.load %arg13[%c1_148, %c0_149] : memref<6x32xf32, #tpu.memory_space<vmem>>, vector<1x32xf32>
    %271 = vector.broadcast %270 : vector<1x32xf32> to vector<4x32xf32>
    %272 = arith.addf %269, %271 : vector<4x32xf32>
    %cst_150 = arith.constant 0.000000e+00 : f32
    %273 = vector.broadcast %cst_150 : f32 to vector<4x32xf32>
    %274 = arith.maximumf %272, %273 : vector<4x32xf32>
    %c0_151 = arith.constant 0 : index
    %c0_152 = arith.constant 0 : index
    %275 = vector.load %arg11[%c0_151, %c0_152] : memref<64x32xbf16, #tpu.memory_space<vmem>>, vector<64x32xbf16>
    %cst_153 = arith.constant dense<0.000000e+00> : vector<4x32xf32>
    %276 = tpu.matmul %229, %275, %cst_153 {dimension_numbers = #tpu.dot_dimension_numbers<[1], [0], [0], [1], [0, 0, 1, 1], [], []>} : vector<4x64xbf16>, vector<64x32xbf16>, vector<4x32xf32> -> vector<4x32xf32>
    %c2_154 = arith.constant 2 : index
    %c0_155 = arith.constant 0 : index
    %277 = vector.load %arg13[%c2_154, %c0_155] : memref<6x32xf32, #tpu.memory_space<vmem>>, vector<1x32xf32>
    %278 = vector.broadcast %277 : vector<1x32xf32> to vector<4x32xf32>
    %279 = arith.mulf %276, %278 : vector<4x32xf32>
    %c3_156 = arith.constant 3 : index
    %c0_157 = arith.constant 0 : index
    %280 = vector.load %arg13[%c3_156, %c0_157] : memref<6x32xf32, #tpu.memory_space<vmem>>, vector<1x32xf32>
    %281 = vector.broadcast %280 : vector<1x32xf32> to vector<4x32xf32>
    %282 = arith.addf %279, %281 : vector<4x32xf32>
    %283 = arith.truncf %274 : vector<4x32xf32> to vector<4x32xbf16>
    %284 = tpu.iota {dimensions = array<i32: 0>} : vector<4x4xi32>
    %285 = tpu.iota {dimensions = array<i32: 1>} : vector<4x4xi32>
    %c1_i32_158 = arith.constant 1 : i32
    %286 = vector.broadcast %c1_i32_158 : i32 to vector<4x4xi32>
    %287 = arith.muli %286, %284 : vector<4x4xi32>
    %c-1_i32_159 = arith.constant -1 : i32
    %288 = vector.broadcast %c-1_i32_159 : i32 to vector<4x4xi32>
    %289 = arith.addi %287, %288 : vector<4x4xi32>
    %290 = arith.cmpi eq, %285, %289 : vector<4x4xi32>
    %cst_160 = arith.constant 1.000000e+00 : f32
    %cst_161 = arith.constant 0.000000e+00 : f32
    %291 = vector.broadcast %cst_160 : f32 to vector<4x4xf32>
    %292 = vector.broadcast %cst_161 : f32 to vector<4x4xf32>
    %293 = arith.select %290, %291, %292 : vector<4x4xi1>, vector<4x4xf32>
    %294 = arith.truncf %293 : vector<4x4xf32> to vector<4x4xbf16>
    %cst_162 = arith.constant dense<0.000000e+00> : vector<4x32xf32>
    %295 = tpu.matmul %294, %283, %cst_162 {dimension_numbers = #tpu.dot_dimension_numbers<[1], [0], [0], [1], [0, 0, 1, 1], [], []>} : vector<4x4xbf16>, vector<4x32xbf16>, vector<4x32xf32> -> vector<4x32xf32>
    %296 = arith.truncf %295 : vector<4x32xf32> to vector<4x32xbf16>
    %297 = tpu.iota {dimensions = array<i32: 0>} : vector<4x4xi32>
    %298 = tpu.iota {dimensions = array<i32: 1>} : vector<4x4xi32>
    %c1_i32_163 = arith.constant 1 : i32
    %299 = vector.broadcast %c1_i32_163 : i32 to vector<4x4xi32>
    %300 = arith.muli %299, %297 : vector<4x4xi32>
    %c1_i32_164 = arith.constant 1 : i32
    %301 = vector.broadcast %c1_i32_164 : i32 to vector<4x4xi32>
    %302 = arith.addi %300, %301 : vector<4x4xi32>
    %303 = arith.cmpi eq, %298, %302 : vector<4x4xi32>
    %cst_165 = arith.constant 1.000000e+00 : f32
    %cst_166 = arith.constant 0.000000e+00 : f32
    %304 = vector.broadcast %cst_165 : f32 to vector<4x4xf32>
    %305 = vector.broadcast %cst_166 : f32 to vector<4x4xf32>
    %306 = arith.select %303, %304, %305 : vector<4x4xi1>, vector<4x4xf32>
    %307 = arith.truncf %306 : vector<4x4xf32> to vector<4x4xbf16>
    %cst_167 = arith.constant dense<0.000000e+00> : vector<4x32xf32>
    %308 = tpu.matmul %307, %283, %cst_167 {dimension_numbers = #tpu.dot_dimension_numbers<[1], [0], [0], [1], [0, 0, 1, 1], [], []>} : vector<4x4xbf16>, vector<4x32xbf16>, vector<4x32xf32> -> vector<4x32xf32>
    %309 = arith.truncf %308 : vector<4x32xf32> to vector<4x32xbf16>
    %c0_168 = arith.constant 0 : index
    %c0_169 = arith.constant 0 : index
    %c0_170 = arith.constant 0 : index
    %310 = vector.load %arg12[%c0_168, %c0_169, %c0_170] : memref<3x32x32xbf16, #tpu.memory_space<vmem>>, vector<1x32x32xbf16>
    %311 = vector.shape_cast %310 : vector<1x32x32xbf16> to vector<32x32xbf16>
    %cst_171 = arith.constant dense<0.000000e+00> : vector<4x32xf32>
    %312 = tpu.matmul %296, %311, %cst_171 {dimension_numbers = #tpu.dot_dimension_numbers<[1], [0], [0], [1], [0, 0, 1, 1], [], []>} : vector<4x32xbf16>, vector<32x32xbf16>, vector<4x32xf32> -> vector<4x32xf32>
    %c1_172 = arith.constant 1 : index
    %c0_173 = arith.constant 0 : index
    %c0_174 = arith.constant 0 : index
    %313 = vector.load %arg12[%c1_172, %c0_173, %c0_174] : memref<3x32x32xbf16, #tpu.memory_space<vmem>>, vector<1x32x32xbf16>
    %314 = vector.shape_cast %313 : vector<1x32x32xbf16> to vector<32x32xbf16>
    %cst_175 = arith.constant dense<0.000000e+00> : vector<4x32xf32>
    %315 = tpu.matmul %283, %314, %cst_175 {dimension_numbers = #tpu.dot_dimension_numbers<[1], [0], [0], [1], [0, 0, 1, 1], [], []>} : vector<4x32xbf16>, vector<32x32xbf16>, vector<4x32xf32> -> vector<4x32xf32>
    %316 = arith.addf %312, %315 : vector<4x32xf32>
    %c2_176 = arith.constant 2 : index
    %c0_177 = arith.constant 0 : index
    %c0_178 = arith.constant 0 : index
    %317 = vector.load %arg12[%c2_176, %c0_177, %c0_178] : memref<3x32x32xbf16, #tpu.memory_space<vmem>>, vector<1x32x32xbf16>
    %318 = vector.shape_cast %317 : vector<1x32x32xbf16> to vector<32x32xbf16>
    %cst_179 = arith.constant dense<0.000000e+00> : vector<4x32xf32>
    %319 = tpu.matmul %309, %318, %cst_179 {dimension_numbers = #tpu.dot_dimension_numbers<[1], [0], [0], [1], [0, 0, 1, 1], [], []>} : vector<4x32xbf16>, vector<32x32xbf16>, vector<4x32xf32> -> vector<4x32xf32>
    %320 = arith.addf %316, %319 : vector<4x32xf32>
    %c4_180 = arith.constant 4 : index
    %c0_181 = arith.constant 0 : index
    %321 = vector.load %arg13[%c4_180, %c0_181] : memref<6x32xf32, #tpu.memory_space<vmem>>, vector<1x32xf32>
    %322 = vector.broadcast %321 : vector<1x32xf32> to vector<4x32xf32>
    %323 = arith.mulf %320, %322 : vector<4x32xf32>
    %c5_182 = arith.constant 5 : index
    %c0_183 = arith.constant 0 : index
    %324 = vector.load %arg13[%c5_182, %c0_183] : memref<6x32xf32, #tpu.memory_space<vmem>>, vector<1x32xf32>
    %325 = vector.broadcast %324 : vector<1x32xf32> to vector<4x32xf32>
    %326 = arith.addf %323, %325 : vector<4x32xf32>
    %327 = arith.addf %326, %282 : vector<4x32xf32>
    %cst_184 = arith.constant 0.000000e+00 : f32
    %328 = vector.broadcast %cst_184 : f32 to vector<4x32xf32>
    %329 = arith.maximumf %327, %328 : vector<4x32xf32>
    %c0_185 = arith.constant 0 : index
    %c0_186 = arith.constant 0 : index
    %c0_187 = arith.constant 0 : index
    %330 = vector.load %arg14[%c0_185, %c0_186, %c0_187] : memref<1x4x32xf32, #tpu.memory_space<vmem>>, vector<1x4x32xf32>
    %331 = vector.shape_cast %330 : vector<1x4x32xf32> to vector<4x32xf32>
    %332 = vector.shape_cast %329 : vector<4x32xf32> to vector<1x4x32xf32>
    tpu.vector_store %arg14[%c0_185, %c0_186, %c0_187], %332 {strides = array<i32>} : memref<1x4x32xf32, #tpu.memory_space<vmem>>, vector<1x4x32xf32>,
    return
  }
  func.func @transform_0(%arg0: i32) -> (i32, i32, i32) {
    %c0_i32 = arith.constant 0 : i32
    %c0_i32_0 = arith.constant 0 : i32
    %c0_i32_1 = arith.constant 0 : i32
    return %arg0, %c0_i32, %c0_i32_0 : i32, i32, i32
  }
  func.func @transform_1(%arg0: i32) -> (i32, i32, i32) {
    %c0_i32 = arith.constant 0 : i32
    %c0_i32_0 = arith.constant 0 : i32
    %c0_i32_1 = arith.constant 0 : i32
    %c0_i32_2 = arith.constant 0 : i32
    return %c0_i32, %c0_i32_0, %c0_i32_1 : i32, i32, i32
  }
  func.func @transform_2(%arg0: i32) -> (i32, i32) {
    %c0_i32 = arith.constant 0 : i32
    %c0_i32_0 = arith.constant 0 : i32
    %c0_i32_1 = arith.constant 0 : i32
    return %c0_i32, %c0_i32_0 : i32, i32
  }
  func.func @transform_3(%arg0: i32) -> (i32, i32, i32) {
    %c0_i32 = arith.constant 0 : i32
    %c0_i32_0 = arith.constant 0 : i32
    %c0_i32_1 = arith.constant 0 : i32
    %c0_i32_2 = arith.constant 0 : i32
    return %c0_i32, %c0_i32_0, %c0_i32_1 : i32, i32, i32
  }
  func.func @transform_4(%arg0: i32) -> (i32, i32) {
    %c0_i32 = arith.constant 0 : i32
    %c0_i32_0 = arith.constant 0 : i32
    %c0_i32_1 = arith.constant 0 : i32
    return %c0_i32, %c0_i32_0 : i32, i32
  }
  func.func @transform_5(%arg0: i32) -> (i32, i32, i32) {
    %c0_i32 = arith.constant 0 : i32
    %c0_i32_0 = arith.constant 0 : i32
    %c0_i32_1 = arith.constant 0 : i32
    %c0_i32_2 = arith.constant 0 : i32
    return %c0_i32, %c0_i32_0, %c0_i32_1 : i32, i32, i32
  }
  func.func @transform_6(%arg0: i32) -> (i32, i32) {
    %c0_i32 = arith.constant 0 : i32
    %c0_i32_0 = arith.constant 0 : i32
    %c0_i32_1 = arith.constant 0 : i32
    return %c0_i32, %c0_i32_0 : i32, i32
  }
  func.func @transform_7(%arg0: i32) -> (i32, i32, i32) {
    %c0_i32 = arith.constant 0 : i32
    %c0_i32_0 = arith.constant 0 : i32
    %c0_i32_1 = arith.constant 0 : i32
    %c0_i32_2 = arith.constant 0 : i32
    return %c0_i32, %c0_i32_0, %c0_i32_1 : i32, i32, i32
  }
  func.func @transform_8(%arg0: i32) -> (i32, i32) {
    %c0_i32 = arith.constant 0 : i32
    %c0_i32_0 = arith.constant 0 : i32
    %c0_i32_1 = arith.constant 0 : i32
    return %c0_i32, %c0_i32_0 : i32, i32
  }
  func.func @transform_9(%arg0: i32) -> (i32, i32, i32) {
    %c0_i32 = arith.constant 0 : i32
    %c0_i32_0 = arith.constant 0 : i32
    %c0_i32_1 = arith.constant 0 : i32
    %c0_i32_2 = arith.constant 0 : i32
    return %c0_i32, %c0_i32_0, %c0_i32_1 : i32, i32, i32
  }
  func.func @transform_10(%arg0: i32) -> (i32, i32) {
    %c0_i32 = arith.constant 0 : i32
    %c0_i32_0 = arith.constant 0 : i32
    %c0_i32_1 = arith.constant 0 : i32
    return %c0_i32, %c0_i32_0 : i32, i32
  }
  func.func @transform_11(%arg0: i32) -> (i32, i32, i32) {
    %c0_i32 = arith.constant 0 : i32
    %c0_i32_0 = arith.constant 0 : i32
    %c0_i32_1 = arith.constant 0 : i32
    %c0_i32_2 = arith.constant 0 : i32
    return %c0_i32, %c0_i32_0, %c0_i32_1 : i32, i32, i32
  }
  func.func @transform_12(%arg0: i32) -> (i32, i32) {
    %c0_i32 = arith.constant 0 : i32
    %c0_i32_0 = arith.constant 0 : i32
    %c0_i32_1 = arith.constant 0 : i32
    return %c0_i32, %c0_i32_0 : i32, i32
  }
  func.func @transform_13(%arg0: i32) -> (i32, i32, i32) {
    %c0_i32 = arith.constant 0 : i32
    %c0_i32_0 = arith.constant 0 : i32
    %c0_i32_1 = arith.constant 0 : i32
    return %arg0, %c0_i32, %c0_i32_0 : i32, i32, i32
  }
}

</mosaic_0001>

<bundles_post_ra>
// kernel: resnet_layer_forward.1
= control target key start
LH: loop header
LB: loop body
LE: loop exit
PB: predicated region body
PF: predicated region fallthrough
CT: control target
= control target key end

     0   :  { %s11834_s0 = inlined_call_operand.vmem [shape: bf16[2,24,640], index: 0, kind: input, shape index: {}]   ;;  %s11835_s1 = inlined_call_operand.vmem [shape: bf16[3,640,256], index: 1, kind: input, shape index: {}]   ;;  %s11836_s2 = inlined_call_operand.vmem [shape: bf16[640,256], index: 2, kind: input, shape index: {}]   ;;  %s11837_s3 = inlined_call_operand.vmem [shape: bf16[3,256,256], index: 3, kind: input, shape index: {}]   ;;  %s11838_s4 = inlined_call_operand.vmem [shape: f32[6,256], index: 4, kind: input, shape index: {}]   ;;  %s11839_s5 = inlined_call_operand.vmem [shape: bf16[3,256,64], index: 5, kind: input, shape index: {}]   ;;  %s11840_s6 = inlined_call_operand.vmem [shape: bf16[256,64], index: 6, kind: input, shape index: {}]   ;;  %s11841_s7 = inlined_call_operand.vmem [shape: bf16[3,64,64], index: 7, kind: input, shape index: {}]   ;;  %s11842_s8 = inlined_call_operand.vmem [shape: f32[6,64], index: 8, kind: input, shape index: {}]   ;;  %s11843_s9 = inlined_call_operand.vmem [shape: bf16[3,64,32], index: 9, kind: input, shape index: {}]   ;;  %s11844_s10 = inlined_call_operand.vmem [shape: bf16[64,32], index: 10, kind: input, shape index: {}]   ;;  %s11845_s11 = inlined_call_operand.vmem [shape: bf16[3,32,32], index: 11, kind: input, shape index: {}]   ;;  %s11846_s12 = inlined_call_operand.vmem [shape: f32[6,32], index: 12, kind: input, shape index: {}]   ;;  %s11847_s13 = inlined_call_operand.hbm [shape: f32[2,4,32], index: 13, kind: output, shape index: {}]  }
   0x1   :  { %11851 = sst [smem:[#allocation8_spill]] %s11834_s0 }
   0x2   :  { %18 = vsyncpa [#allocation3], 0 }
   0x3   :  { %20 = vsyncpa [#allocation3 + $0x1], 0  ;;  %s8605_s25 = smov 0   ;;  %s8607_s26 = smov 0  }
   0x4   :  { %s8609_s27 = smov 0   ;;  %s8611_s28 = smov 0  }
   0x5 LB: > { %11852 = sst [smem:[#allocation5_spill]] %s8528_s27  ;;  %s8626_s29 = sadd.s32 4294967295, %s8532_s28   ;;  %s8532_s28 = sphi %s8611_s28, %s11858_s28   ;;  %s8528_s27 = sphi %s8609_s27, %s11860_s27   ;;  %s8524_s26 = sphi %s8607_s26, %s11862_s26   ;;  %s8520_s25 = sphi %s8605_s25, %s11861_s25  }
   0x6   : > { %s5438_s30 = sadd.s32 4294967294, %s8532_s28   ;;  %s8630_s14 = sadd.s32 1, %s8532_s28  }
   0x7   : > { %11853 = sst [smem:[#allocation6_spill]] %s8630_s14  ;;  %s311_s15 = sadd.s32 1, %s8528_s27 }
   0x8   : > { %s308_s16 = ssub.s32 %s8532_s28, %s8630_s14  ;;  %p321_p0 = scmp.ne.s32.totalorder %s8528_s27, %s8524_s26 }
   0x9   : > { %p309_p1 = scmp.eq.s32.totalorder %s308_s16, 0  ;;  %p322_p2 = scmp.eq.s32.totalorder %s8626_s29, 1 }
   0xa   : > { %p327_p3 = scmp.ne.s32.totalorder %s8524_s26, %s8520_s25  ;;  %p328_p4 = scmp.eq.s32.totalorder %s5438_s30, 1 }
   0xb   : > { %s8641_s17 = scalar_select %p309_p1, %s8528_s27, %s311_s15  }
   0xc   : > { %p8643_p5 = por %p322_p2, %p321_p0  ;;  %p8647_p6 = por %p328_p4, %p327_p3 }
   0xd   : > { %11854 = sst [smem:[#allocation7_spill]] %s8641_s17  ;;  %p5441_p7 = scmp.ge.s32.totalorder %s8532_s28, 1 }
   0xe   : > { %p390_p8 = scmp.lt.s32.totalorder %s8532_s28, 3 }
  0x10   : > { %p391_p9 = pnand %p5441_p7, %p390_p8 }
  0x11   : > { %p434_p10 = scmp.lt.s32.totalorder (!%p391_p9), %s8626_s29, 1  ;;  %s11857_s0 = sld [smem:[#allocation8_spill]] (!%p391_p9) }
  0x12   : > { %394 = sbr.rel (%p391_p9) target bundleno = 1952 (0x7a0), region = 72  ;;  %s431_s16 = sand.u32 (!%p391_p9), 1, %s8524_s26  }
  0x13   : > { %s5442_s14 = sshll.u32 (!%p391_p9), %s431_s16, 2  ;;  %s5364_s17 = scalar_lea.sflag (!%p391_p9), [#allocation3], %s431_s16 }
  0x17   : > { %v449_v0 = vlaneseq  ;;  %s435_s20 = scalar_select %p434_p10, %s8626_s29, 1  ;;  %vm500_vm0 = vcmask 1043456   ;;  %v8534_v30 = vmov 0.0   ;;  %vm496_vm2 = vcmask 195584   ;;  %v5617_v42 = vld [vmem:[%s11835_s1 + $0x2f0] sm:$0xf] }
  0x18   : > { %v7998_v43 = vld [vmem:[%s11835_s1 + $0x2f4] sm:$0xf0]  ;;  %v5609_v46 = vld [vmem:[%s11835_s1 + $0x2e0] sm:$0xf]  ;;  %v7996_v47 = vld [vmem:[%s11835_s1 + $0x2e4] sm:$0xf0] }
  0x19   : > { %v8655_v1 = vshrl.u32 %v449_v0, 7  ;;  %s8417_s21 = smul.u32 60, %s435_s20  ;;  %v8657_v2 = vand.u32 127, %v449_v0  ;;  %v5618_v45 = vor.u32 %v7998_v43, %v5617_v42  ;;  %v5610_v48 = vor.u32 %v7996_v47, %v5609_v46  ;;  %v5601_v49 = vld [vmem:[%s11835_s1 + $0x2d0] sm:$0xf] }
  0x1a   : > { %v7994_v50 = vld [vmem:[%s11835_s1 + $0x2d4] sm:$0xf0]  ;;  %v5593_v53 = vld [vmem:[%s11835_s1 + $0x2c0] sm:$0xf]  ;;  %v7992_v54 = vld [vmem:[%s11835_s1 + $0x2c4] sm:$0xf0] }
  0x1b   : > { %v8660_v3 = vmul.u32 2, %v8655_v1  ;;  %s8665_s24 = scalar_lea.vmem %s11857_s0, %s8417_s21  ;;  %v5602_v52 = vor.u32 %v7994_v50, %v5601_v49  ;;  %v5681_v55 = vld [vmem:[%s11835_s1 + $0x370] sm:$0xf]  ;;  %v8014_v56 = vld [vmem:[%s11835_s1 + $0x374] sm:$0xf0]  ;;  %v5594_v59 = vor.u32 %v7992_v54, %v5593_v53  ;;  %vm3227_vm7 = vcmask 64512  }
  0x1c   : > { %v446_v4 = vld [vmem:[%s8665_s24 + $0x28] sm:$0xff]  ;;  %v447_v5 = vld [vmem:[%s8665_s24 + $0x30] sm:$0xff]  ;;  %v5446_v10 = vld [vmem:[%s8665_s24] sm:$0xf]  ;;  %vm4872_vm9 = vcmask 523264   ;;  %vm4797_vm10 = vcmask 1041408  }
  0x1d   : > { %v476_v6 = vunpack.c.l.b16 %v446_v4  ;;  %v477_v7 = vunpack.c.h.b16 %v446_v4  ;;  %v478_v8 = vunpack.c.l.b16 %v447_v5  ;;  %v479_v9 = vunpack.c.h.b16 %v447_v5  ;;  %v7900_v11 = vld [vmem:[%s8665_s24 + $0x10] sm:$0xf0]  ;;  %v7898_v12 = vld [vmem:[%s8665_s24 + $0x4] sm:$0xf]  ;;  %v5448_v17 = vld [vmem:[%s8665_s24 + $0x14] sm:$0xf0] }
  0x1e   : > { %vm454_vm1 = vcmp.eq.s32.totalorder %v8657_v2, %v8660_v3  ;;  %v5454_v18 = vld [vmem:[%s8665_s24 + $0x8] sm:$0xf]  ;;  %v448_v19 = vld [vmem:[%s8665_s24 + $0x38] sm:$0xf]  ;;  %v7901_v20 = vld [vmem:[%s8665_s24 + $0x18] sm:$0xf0]  ;;  %v5447_v28 = vor.u32 %v7900_v11, %v5446_v10  ;;  %v5451_v29 = vor.u32 %v7898_v12, %v5448_v17  ;;  %v5682_v4 = vor.u32 %v8014_v56, %v5681_v55 }
  0x1f   : > { %v486_v13 = vpack.c.b16 %v476_v6, %v476_v6  ;;  %v487_v14 = vpack.c.b16 %v477_v7, %v477_v7  ;;  %v488_v15 = vpack.c.b16 %v478_v8, %v478_v8  ;;  %v489_v16 = vpack.c.b16 %v479_v9, %v479_v9  ;;  %v7899_v21 = vld [vmem:[%s8665_s24 + $0xc] sm:$0xf]  ;;  %v5456_v22 = vld [vmem:[%s8665_s24 + $0x1c] sm:$0xf0]  ;;  %v5462_v37 = vld [vmem:[%s8665_s24 + $0x10] sm:$0xf] }
  0x20   : > { %v480_v23 = vunpack.c.l.b16 %v448_v19  ;;  %v455_v31 = vsel %vm454_vm1, 1.0, %v8534_v30  ;;  %v5455_v33 = vor.u32 %v7901_v20, %v5454_v18  ;;  %v5459_v34 = vor.u32 %v7899_v21, %v5456_v22  ;;  %v7902_v38 = vld [vmem:[%s8665_s24 + $0x20] sm:$0xf0]  ;;  %v5745_v57 = vld [vmem:[%s11835_s1 + $0x3f0] sm:$0xf]  ;;  %s7895_s0 = sshll.u32 %s8626_s29, 2 }
  0x21   : > { %v502_v24 = vsel %vm500_vm0, %v486_v13, 0  ;;  %v505_v25 = vsel %vm500_vm0, %v487_v14, 0  ;;  %v508_v26 = vsel %vm500_vm0, %v488_v15, 0  ;;  %v511_v27 = vsel %vm500_vm0, %v489_v16, 0  ;;  %v8030_v58 = vld [vmem:[%s11835_s1 + $0x3f4] sm:$0xf0]  ;;  %s5374_s15 = scalar_lea.hbm %s11847_s13, %s7895_s0 }
  0x22   : > { %522 = vmatpush.bf16.msra.mxu0 %v502_v24  ;;  %535 = vmatpush.bf16.msra.mxu1 %v505_v25  ;;  %v490_v32 = vpack.c.b16 %v480_v23, %v480_v23  ;;  %v8688_v35 = vpack.c.bf16 %v455_v31, %v455_v31  ;;  %v5463_v39 = vor.u32 %v7902_v38, %v5462_v37  ;;  %v586_v40 = vadd.s32 1, %v8660_v3  ;;  %v5585_v61 = vld [vmem:[%s11835_s1 + $0x2b0] sm:$0xf]  ;;  %v7990_v62 = vld [vmem:[%s11835_s1 + $0x2b4] sm:$0xf0]  ;;  %s433_s29 = scalar_lea.vmem [#allocation2], %s5442_s14 }
  0x23   : > { %548 = vmatpush.bf16.msra.mxu2 %v508_v26  ;;  %561 = vmatpush.bf16.msra.mxu3 %v511_v27  ;;  %v663_v51 = vadd.s32 2, %v8660_v3  ;;  %v5809_v63 = vld [vmem:[%s11835_s1 + $0x470] sm:$0xf]  ;;  %v8046_v0 = vld [vmem:[%s11835_s1 + $0x474] sm:$0xf0]  ;;  %v5746_v5 = vor.u32 %v8030_v58, %v5745_v57  ;;  %v5586_v11 = vor.u32 %v7990_v62, %v5585_v61  ;;  %vm4794_vm11 = vcmask 31744  }
  0x24   : > { %v514_v36 = vsel %vm500_vm0, %v490_v32, 0  ;;  %vm587_vm3 = vcmp.eq.s32.totalorder %v8657_v2, %v586_v40  ;;  %v5673_v6 = vld [vmem:[%s11835_s1 + $0x360] sm:$0xf]  ;;  %v8012_v7 = vld [vmem:[%s11835_s1 + $0x364] sm:$0xf0]  ;;  %v5810_v12 = vor.u32 %v8046_v0, %v5809_v63  ;;  %vm5275_vm12 = vcmask 261120  }
  0x25   : > { %v588_v41 = vsel %vm587_vm3, 1.0, %v8534_v30  ;;  %vm664_vm4 = vcmp.eq.s32.totalorder %v8657_v2, %v663_v51  ;;  %v5737_v8 = vld [vmem:[%s11835_s1 + $0x3e0] sm:$0xf]  ;;  %v8028_v9 = vld [vmem:[%s11835_s1 + $0x3e4] sm:$0xf0]  ;;  %v5674_v17 = vor.u32 %v8012_v7, %v5673_v6  ;;  %s5376_s20 = sshll.u32 %s433_s29, 4  ;;  %s5377_s20 = int_to_ptr.vmem [resolvable:$true] %s5376_s20 }
  0x26   : > { %523 = vmatpush.bf16.msra.mxu0 %v5447_v28  ;;  %536 = vmatpush.bf16.msra.mxu1 %v5451_v29  ;;  %v8710_v44 = vpack.c.bf16 %v588_v41, %v588_v41  ;;  %v665_v60 = vsel %vm664_vm4, 1.0, %v8534_v30  ;;  %v5577_v13 = vld [vmem:[%s11835_s1 + $0x2a0] sm:$0xf]  ;;  %v7988_v14 = vld [vmem:[%s11835_s1 + $0x2a4] sm:$0xf0]  ;;  %v5738_v18 = vor.u32 %v8028_v9, %v5737_v8  ;;  %s5378_s27 = sshll.u32 %s5374_s15, 4  ;;  %s5379_s27 = int_to_ptr.hbm [resolvable:$true] %s5378_s27 }
  0x27   : > { %549 = vmatpush.bf16.msra.mxu2 %v5455_v33  ;;  %562 = vmatpush.bf16.msra.mxu3 %v5459_v34  ;;  %v8777_v10 = vpack.c.bf16 %v665_v60, %v665_v60  ;;  %v5801_v15 = vld [vmem:[%s11835_s1 + $0x460] sm:$0xf]  ;;  %v8044_v16 = vld [vmem:[%s11835_s1 + $0x464] sm:$0xf0]  ;;  %v5665_v19 = vld [vmem:[%s11835_s1 + $0x350] sm:$0xf]  ;;  %v5578_v23 = vor.u32 %v7988_v14, %v5577_v13 }
  0x28   : > { %v8010_v20 = vld [vmem:[%s11835_s1 + $0x354] sm:$0xf0]  ;;  %v5729_v21 = vld [vmem:[%s11835_s1 + $0x3d0] sm:$0xf]  ;;  %v5657_v32 = vld [vmem:[%s11835_s1 + $0x340] sm:$0xf] }
  0x29   : > { %5464 = vmatmul.msk.bf16.vlgmr.msra.gmra.mxu0 %vm496_vm2, %v8688_v35  ;;  %5465 = vmatmul.msk.bf16.vlgmr.msra.gmra.mxu1 %vm496_vm2, %v8688_v35  ;;  %v8026_v22 = vld [vmem:[%s11835_s1 + $0x3d4] sm:$0xf0]  ;;  %v7984_v40 = vld [vmem:[%s11835_s1 + $0x284] sm:$0xf0]  ;;  %v5785_v41 = vld [vmem:[%s11835_s1 + $0x440] sm:$0xf] }
  0x2a   : > { %574 = vmatpush.bf16.msrb.mxu0 %v514_v36  ;;  %599 = vmatpush.bf16.msrb.mxu1 %v502_v24  ;;  %v5730_v31 = vor.u32 %v8026_v22, %v5729_v21  ;;  %v8040_v42 = vld [vmem:[%s11835_s1 + $0x444] sm:$0xf0]  ;;  %v5873_v43 = vld [vmem:[%s11835_s1 + $0x4f0] sm:$0xf]  ;;  %v8006_v49 = vld [vmem:[%s11835_s1 + $0x334] sm:$0xf0] }
  0x2b   : > { %5466 = vmatmul.msk.bf16.vlgmr.msra.gmra.mxu2 %vm496_vm2, %v8688_v35  ;;  %5467 = vmatmul.msk.bf16.vlgmr.msra.gmra.mxu3 %vm496_vm2, %v8688_v35  ;;  %v5713_v50 = vld [vmem:[%s11835_s1 + $0x3b0] sm:$0xf]  ;;  %v8022_v51 = vld [vmem:[%s11835_s1 + $0x3b4] sm:$0xf0]  ;;  %v5786_v53 = vor.u32 %v8040_v42, %v5785_v41  ;;  %v5865_v57 = vld [vmem:[%s11835_s1 + $0x4e0] sm:$0xf] }
  0x2c   : > { %612 = vmatpush.bf16.msrb.mxu2 %v505_v25  ;;  %625 = vmatpush.bf16.msrb.mxu3 %v508_v26  ;;  %v5777_v55 = vld [vmem:[%s11835_s1 + $0x430] sm:$0xf]  ;;  %v8038_v56 = vld [vmem:[%s11835_s1 + $0x434] sm:$0xf0]  ;;  %v8060_v58 = vld [vmem:[%s11835_s1 + $0x4e4] sm:$0xf0]  ;;  %v5714_v60 = vor.u32 %v8022_v51, %v5713_v50 }
  0x2d   : > { %v5641_v61 = vld [vmem:[%s11835_s1 + $0x320] sm:$0xf]  ;;  %v8004_v62 = vld [vmem:[%s11835_s1 + $0x324] sm:$0xf0]  ;;  %v5857_v8 = vld [vmem:[%s11835_s1 + $0x4d0] sm:$0xf] }
  0x2e   : > { %575 = vmatpush.bf16.msrb.mxu0 %v5463_v39  ;;  %600 = vmatpush.bf16.msrb.mxu1 %v5447_v28  ;;  %v5705_v63 = vld [vmem:[%s11835_s1 + $0x3a0] sm:$0xf]  ;;  %v8020_v0 = vld [vmem:[%s11835_s1 + $0x3a4] sm:$0xf0]  ;;  %v8058_v9 = vld [vmem:[%s11835_s1 + $0x4d4] sm:$0xf0] }
  0x2f   : > { %v5769_v6 = vld [vmem:[%s11835_s1 + $0x420] sm:$0xf]  ;;  %v8036_v7 = vld [vmem:[%s11835_s1 + $0x424] sm:$0xf0]  ;;  %v5633_v13 = vld [vmem:[%s11835_s1 + $0x310] sm:$0xf] }
  0x30   : > { %613 = vmatpush.bf16.msrb.mxu2 %v5451_v29  ;;  %626 = vmatpush.bf16.msrb.mxu3 %v5455_v33  ;;  %v8002_v14 = vld [vmem:[%s11835_s1 + $0x314] sm:$0xf0]  ;;  %v5625_v21 = vld [vmem:[%s11835_s1 + $0x300] sm:$0xf]  ;;  %v8000_v22 = vld [vmem:[%s11835_s1 + $0x304] sm:$0xf0] }
  0x31   : > { %v5667_v51 = vld [vmem:[%s11835_s1 + $0x358] sm:$0xf0]  ;;  %vm5361_vm13 = vcmask 257024   ;;  %s8484_s21 = sshra.s32 %s5379_s27, 4  ;;  %s8490_s14 = scalar_lea.hbm %s11847_s13, 8  ;;  %s8485_s21 = int_to_ptr.hbm [resolvable:$true] %s8484_s21 }
  0x32   : > { %638 = vmatpush.bf16.msra.mxu0 %v511_v27  ;;  %651 = vmatpush.bf16.msra.mxu1 %v514_v36  ;;  %s8486_s22 = scalar_lea.hbm %s8485_s21, 4  ;;  %p8491_p0 = scmp.lt.s32.totalorder %s8485_s21, %s11847_s13 }
  0x33   : > { %p8487_p11 = scmp.ne.s32.totalorder %s8485_s21, %s8486_s22  ;;  %p8492_p1 = scmp.lt.s32.totalorder %s8490_s14, %s8486_s22 }
  0x34   : > { %689 = vmatpush.bf16.msra.mxu3 %v505_v25  ;;  %676 = vmatpush.bf16.msra.mxu2 %v502_v24  ;;  %v5802_v24 = vor.u32 %v8044_v16, %v5801_v15  ;;  %v5569_v25 = vld [vmem:[%s11835_s1 + $0x290] sm:$0xf]  ;;  %v8018_v16 = vld [vmem:[%s11835_s1 + $0x394] sm:$0xf0] }
  0x35   : > { %v5697_v15 = vld [vmem:[%s11835_s1 + $0x390] sm:$0xf]  ;;  %p8488_p12 = pnand %p8487_p11, %p8643_p5  ;;  %p8493_p2 = por %p8492_p1, %p8491_p0 }
  0x36   : > { %639 = vmatpush.bf16.msra.mxu0 %v5459_v34  ;;  %652 = vmatpush.bf16.msra.mxu1 %v5463_v39 }
  0x37   : > { %p8489_p13 = pneg %p8488_p12 }
  0x38   : > { %690 = vmatpush.bf16.msra.mxu3 %v5451_v29  ;;  %677 = vmatpush.bf16.msra.mxu2 %v5447_v28  ;;  %v8042_v28 = vld [vmem:[%s11835_s1 + $0x454] sm:$0xf0]  ;;  %v5666_v29 = vor.u32 %v8010_v20, %v5665_v19  ;;  %v5634_v19 = vor.u32 %v8002_v14, %v5633_v13  ;;  %v5698_v20 = vor.u32 %v8018_v16, %v5697_v15  ;;  %v7989_v13 = vld [vmem:[%s11835_s1 + $0x2b4] sm:$0xf]  ;;  %v5587_v14 = vld [vmem:[%s11835_s1 + $0x2b8] sm:$0xf0] }
  0x39   : > { %5468 = vmatmul.msk.bf16.vlgmr.msrb.gmra.mxu0 %vm496_vm2, %v8688_v35  ;;  %5469 = vmatmul.msk.bf16.vlgmr.msrb.gmra.mxu1 %vm496_vm2, %v8710_v44  ;;  %v5590_v16 = vor.u32 %v7989_v13, %v5587_v14  ;;  %p8494_p3 = pnand %p8493_p2, %p8489_p13 }
  0x3a   : > { %702 = vmatpush.bf16.msrb.mxu0 %v508_v26  ;;  %715 = vmatpush.bf16.msrb.mxu1 %v511_v27  ;;  %v7986_v26 = vld [vmem:[%s11835_s1 + $0x294] sm:$0xf0]  ;;  %v5793_v27 = vld [vmem:[%s11835_s1 + $0x450] sm:$0xf] }
  0x3b   : > { %5470 = vmatmul.msk.bf16.vlgmr.msrb.gmra.mxu2 %vm496_vm2, %v8710_v44  ;;  %5471 = vmatmul.msk.bf16.vlgmr.msrb.gmra.mxu3 %vm496_vm2, %v8710_v44  ;;  %v5570_v37 = vor.u32 %v7986_v26, %v5569_v25  ;;  %v5794_v38 = vor.u32 %v8042_v28, %v5793_v27  ;;  %v5619_v25 = vld [vmem:[%s11835_s1 + $0x2f8] sm:$0xf0]  ;;  %v8013_v26 = vld [vmem:[%s11835_s1 + $0x374] sm:$0xf]  ;;  %v5626_v28 = vor.u32 %v8000_v22, %v5625_v21  ;;  %v8050_v21 = vld [vmem:[%s11835_s1 + $0x494] sm:$0xf0] }
  0x3c   : > { %1301 = vmatpush.bf16.msrb.mxu3 %v5618_v45  ;;  %728 = vmatpush.bf16.msrb.mxu2 %v514_v36  ;;  %v8024_v36 = vld [vmem:[%s11835_s1 + $0x3c4] sm:$0xf0]  ;;  %v8062_v45 = vld [vmem:[%s11835_s1 + $0x4f4] sm:$0xf0]  ;;  %v5683_v27 = vld [vmem:[%s11835_s1 + $0x378] sm:$0xf0] }
  0x3d   : > { %v5874_v54 = vor.u32 %v8062_v45, %v5873_v43  ;;  %v5849_v43 = vld [vmem:[%s11835_s1 + $0x4c0] sm:$0xf]  ;;  %v8056_v45 = vld [vmem:[%s11835_s1 + $0x4c4] sm:$0xf0]  ;;  %v8025_v22 = vld [vmem:[%s11835_s1 + $0x3d4] sm:$0xf] }
  0x3e   : > { %703 = vmatpush.bf16.msrb.mxu0 %v5455_v33  ;;  %716 = vmatpush.bf16.msrb.mxu1 %v5459_v34  ;;  %v8008_v33 = vld [vmem:[%s11835_s1 + $0x344] sm:$0xf0]  ;;  %v5721_v34 = vld [vmem:[%s11835_s1 + $0x3c0] sm:$0xf] }
  0x3f   : > { %v5658_v46 = vor.u32 %v8008_v33, %v5657_v32  ;;  %v5722_v47 = vor.u32 %v8024_v36, %v5721_v34  ;;  %v5686_v32 = vor.u32 %v8013_v26, %v5683_v27  ;;  %v7995_v33 = vld [vmem:[%s11835_s1 + $0x2e4] sm:$0xf]  ;;  %v5611_v34 = vld [vmem:[%s11835_s1 + $0x2e8] sm:$0xf0] }
  0x40   : > { %1302 = vmatpush.bf16.msrb.mxu3 %v5610_v48  ;;  %729 = vmatpush.bf16.msrb.mxu2 %v5463_v39  ;;  %v5561_v39 = vld [vmem:[%s11835_s1 + $0x280] sm:$0xf]  ;;  %v5649_v48 = vld [vmem:[%s11835_s1 + $0x330] sm:$0xf]  ;;  %v8011_v36 = vld [vmem:[%s11835_s1 + $0x364] sm:$0xf] }
  0x41   : > { %v5579_v26 = vld [vmem:[%s11835_s1 + $0x2a8] sm:$0xf0]  ;;  %v8003_v27 = vld [vmem:[%s11835_s1 + $0x324] sm:$0xf] }
  0x44   : > { %1303 = vmatpush.bf16.msrb.mxu3 %v5602_v52  ;;  %v5562_v52 = vor.u32 %v7984_v40, %v5561_v39  ;;  %v5761_v39 = vld [vmem:[%s11835_s1 + $0x410] sm:$0xf]  ;;  %v8034_v40 = vld [vmem:[%s11835_s1 + $0x414] sm:$0xf0] }
  0x45   : > { %v5762_v42 = vor.u32 %v8034_v40, %v5761_v39  ;;  %v7985_v39 = vld [vmem:[%s11835_s1 + $0x294] sm:$0xf]  ;;  %v5571_v40 = vld [vmem:[%s11835_s1 + $0x298] sm:$0xf0] }
  0x48   : > { %1304 = vmatpush.bf16.msrb.mxu3 %v5594_v59  ;;  %v5650_v59 = vor.u32 %v8006_v49, %v5649_v48  ;;  %v5603_v48 = vld [vmem:[%s11835_s1 + $0x2d8] sm:$0xf0]  ;;  %v8009_v49 = vld [vmem:[%s11835_s1 + $0x354] sm:$0xf] }
  0x49   : > { %5472 = vmatmul.msk.bf16.vlgmr.msra.gmra.mxu0 %vm496_vm2, %v8710_v44  ;;  %5473 = vmatmul.msk.bf16.vlgmr.msra.gmra.mxu1 %vm496_vm2, %v8710_v44 }
  0x4a   : > { %1314 = vmatpush.bf16.msra.mxu0 %v5682_v4  ;;  %1327 = vmatpush.bf16.msra.mxu1 %v5746_v5  ;;  %v5778_v4 = vor.u32 %v8038_v56, %v5777_v55  ;;  %v5866_v5 = vor.u32 %v8060_v58, %v5865_v57  ;;  %v5841_v56 = vld [vmem:[%s11835_s1 + $0x4b0] sm:$0xf]  ;;  %v8054_v57 = vld [vmem:[%s11835_s1 + $0x4b4] sm:$0xf0]  ;;  %v8029_v58 = vld [vmem:[%s11835_s1 + $0x3f4] sm:$0xf] }
  0x4b   : > { %5474 = vmatmul.msk.bf16.vlgmr.msra.gmra.mxu2 %vm496_vm2, %v8777_v10  ;;  %5475 = vmatmul.msk.bf16.vlgmr.msra.gmra.mxu3 %vm496_vm2, %v8777_v10 }
  0x4c   : > { %1305 = vmatpush.bf16.msrb.mxu3 %v5586_v11  ;;  %1340 = vmatpush.bf16.msra.mxu2 %v5810_v12  ;;  %v5642_v11 = vor.u32 %v8004_v62, %v5641_v61  ;;  %v5706_v12 = vor.u32 %v8020_v0, %v5705_v63  ;;  %v7991_v62 = vld [vmem:[%s11835_s1 + $0x2c4] sm:$0xf]  ;;  %v5595_v63 = vld [vmem:[%s11835_s1 + $0x2c8] sm:$0xf0] }
  0x4d   : > { %v8007_v0 = vld [vmem:[%s11835_s1 + $0x344] sm:$0xf] }
  0x4e   : > { %1315 = vmatpush.bf16.msra.mxu0 %v5674_v17  ;;  %1328 = vmatpush.bf16.msra.mxu1 %v5738_v18  ;;  %v5770_v17 = vor.u32 %v8036_v7, %v5769_v6  ;;  %v5858_v18 = vor.u32 %v8058_v9, %v5857_v8  ;;  %v5833_v7 = vld [vmem:[%s11835_s1 + $0x4a0] sm:$0xf]  ;;  %v8052_v8 = vld [vmem:[%s11835_s1 + $0x4a4] sm:$0xf0]  ;;  %v8027_v9 = vld [vmem:[%s11835_s1 + $0x3e4] sm:$0xf] }
  0x50   : > { %1306 = vmatpush.bf16.msrb.mxu3 %v5578_v23  ;;  %1341 = vmatpush.bf16.msra.mxu2 %v5802_v24  ;;  %v8016_v23 = vld [vmem:[%s11835_s1 + $0x384] sm:$0xf0]  ;;  %v7997_v24 = vld [vmem:[%s11835_s1 + $0x2f4] sm:$0xf] }
  0x52   : > { %1316 = vmatpush.bf16.msra.mxu0 %v5666_v29  ;;  %1329 = vmatpush.bf16.msra.mxu1 %v5730_v31  ;;  %v5622_v31 = vor.u32 %v7997_v24, %v5619_v25  ;;  %v7987_v25 = vld [vmem:[%s11835_s1 + $0x2a4] sm:$0xf] }
  0x54   : > { %1307 = vmatpush.bf16.msrb.mxu3 %v5570_v37  ;;  %1342 = vmatpush.bf16.msra.mxu2 %v5794_v38  ;;  %v5614_v37 = vor.u32 %v7995_v33, %v5611_v34  ;;  %v5675_v38 = vld [vmem:[%s11835_s1 + $0x368] sm:$0xf0]  ;;  %v8048_v33 = vld [vmem:[%s11835_s1 + $0x484] sm:$0xf0]  ;;  %v8023_v34 = vld [vmem:[%s11835_s1 + $0x3c4] sm:$0xf] }
  0x55   : > { %v5678_v41 = vor.u32 %v8011_v36, %v5675_v38 }
  0x56   : > { %1317 = vmatpush.bf16.msra.mxu0 %v5658_v46  ;;  %1330 = vmatpush.bf16.msra.mxu1 %v5722_v47  ;;  %v5850_v46 = vor.u32 %v8056_v45, %v5849_v43  ;;  %v7993_v47 = vld [vmem:[%s11835_s1 + $0x2d4] sm:$0xf]  ;;  %v5635_v43 = vld [vmem:[%s11835_s1 + $0x318] sm:$0xf0] }
  0x57   : > { %v5606_v50 = vor.u32 %v7993_v47, %v5603_v48  ;;  %v5715_v47 = vld [vmem:[%s11835_s1 + $0x3b8] sm:$0xf0] }
  0x58   : > { %1308 = vmatpush.bf16.msrb.mxu3 %v5562_v52  ;;  %1343 = vmatpush.bf16.msra.mxu2 %v5786_v53  ;;  %v5753_v52 = vld [vmem:[%s11835_s1 + $0x400] sm:$0xf]  ;;  %v8032_v53 = vld [vmem:[%s11835_s1 + $0x404] sm:$0xf0] }
  0x59   : > { %5476 = vmatmul.msk.bf16.vlgmr.msrb.gmra.mxu0 %vm496_vm2, %v8777_v10  ;;  %5477 = vmatmul.msk.bf16.vlgmr.msrb.gmra.mxu1 %vm496_vm2, %v8777_v10  ;;  %v5754_v55 = vor.u32 %v8032_v53, %v5753_v52  ;;  %v5627_v53 = vld [vmem:[%s11835_s1 + $0x308] sm:$0xf0] }
  0x5a   : > { %1318 = vmatpush.bf16.msra.mxu0 %v5650_v59  ;;  %1331 = vmatpush.bf16.msra.mxu1 %v5714_v60  ;;  %v5842_v59 = vor.u32 %v8054_v57, %v5841_v56  ;;  %v5747_v60 = vld [vmem:[%s11835_s1 + $0x3f8] sm:$0xf0]  ;;  %v5707_v56 = vld [vmem:[%s11835_s1 + $0x3a8] sm:$0xf0] }
  0x5b   : > { %5478 = vmatmul.msk.bf16.vlgmr.msrb.gmra.mxu2 %vm496_vm2, %v8777_v10  ;;  %v5689_v10 = vld [vmem:[%s11835_s1 + $0x380] sm:$0xf]  ;;  %v5750_v61 = vor.u32 %v8029_v58, %v5747_v60  ;;  %v8017_v58 = vld [vmem:[%s11835_s1 + $0x394] sm:$0xf] }
  0x5c   : > { %1353 = vmatpush.bf16.msra.mxu3 %v5874_v54  ;;  %1344 = vmatpush.bf16.msra.mxu2 %v5778_v4  ;;  %v5690_v29 = vor.u32 %v8016_v23, %v5689_v10  ;;  %v5670_v54 = vor.u32 %v8009_v49, %v5667_v51  ;;  %v5598_v4 = vor.u32 %v7991_v62, %v5595_v63  ;;  %v5731_v23 = vld [vmem:[%s11835_s1 + $0x3d8] sm:$0xf0]  ;;  %v7983_v49 = vld [vmem:[%s11835_s1 + $0x284] sm:$0xf] }
  0x5d   : > { %v5734_v24 = vor.u32 %v8025_v22, %v5731_v23  ;;  %v7999_v51 = vld [vmem:[%s11835_s1 + $0x304] sm:$0xf]  ;;  %v5875_v22 = vld [vmem:[%s11835_s1 + $0x4f8] sm:$0xf0]  ;;  %v7918_v23 = vld [vmem:[%s11835_s1 + $0x74] sm:$0xf0] }
  0x5e   : > { %1319 = vmatpush.bf16.msra.mxu0 %v5642_v11  ;;  %1332 = vmatpush.bf16.msra.mxu1 %v5706_v12  ;;  %v5834_v11 = vor.u32 %v8052_v8, %v5833_v7  ;;  %v5739_v12 = vld [vmem:[%s11835_s1 + $0x3e8] sm:$0xf0]  ;;  %v8015_v63 = vld [vmem:[%s11835_s1 + $0x384] sm:$0xf] }
  0x5f   : > { %v5742_v15 = vor.u32 %v8027_v9, %v5739_v12  ;;  %v8045_v9 = vld [vmem:[%s11835_s1 + $0x474] sm:$0xf] }
  0x60   : > { %1354 = vmatpush.bf16.msra.mxu3 %v5866_v5  ;;  %1345 = vmatpush.bf16.msra.mxu2 %v5770_v17  ;;  %v5659_v5 = vld [vmem:[%s11835_s1 + $0x348] sm:$0xf0]  ;;  %v8005_v17 = vld [vmem:[%s11835_s1 + $0x334] sm:$0xf] }
  0x61   : > { %v5662_v6 = vor.u32 %v8007_v0, %v5659_v5  ;;  %v5691_v0 = vld [vmem:[%s11835_s1 + $0x388] sm:$0xf0] }
  0x62   : > { %1320 = vmatpush.bf16.msra.mxu0 %v5634_v19  ;;  %1333 = vmatpush.bf16.msra.mxu1 %v5698_v20  ;;  %v5825_v20 = vld [vmem:[%s11835_s1 + $0x490] sm:$0xf] }
  0x63   : > { %v5826_v10 = vor.u32 %v8050_v21, %v5825_v20  ;;  %v8061_v20 = vld [vmem:[%s11835_s1 + $0x4f4] sm:$0xf] }
  0x64   : > { %1355 = vmatpush.bf16.msra.mxu3 %v5858_v18  ;;  %1346 = vmatpush.bf16.msra.mxu2 %v5762_v42  ;;  %v5651_v18 = vld [vmem:[%s11835_s1 + $0x338] sm:$0xf0]  ;;  %v5574_v42 = vor.u32 %v7985_v39, %v5571_v40  ;;  %v5929_v39 = vld [vmem:[%s11835_s1 + $0x60] sm:$0xf]  ;;  %v7916_v40 = vld [vmem:[%s11835_s1 + $0x64] sm:$0xf0] }
  0x65   : > { %v5654_v19 = vor.u32 %v8005_v17, %v5651_v18  ;;  %v8043_v18 = vld [vmem:[%s11835_s1 + $0x464] sm:$0xf] }
  0x66   : > { %1321 = vmatpush.bf16.msra.mxu0 %v5626_v28  ;;  %1334 = vmatpush.bf16.msra.mxu1 %v5690_v29  ;;  %v5582_v28 = vor.u32 %v7987_v25, %v5579_v26  ;;  %v5643_v29 = vld [vmem:[%s11835_s1 + $0x328] sm:$0xf0]  ;;  %v5795_v25 = vld [vmem:[%s11835_s1 + $0x458] sm:$0xf0] }
  0x68   : > { %1356 = vmatpush.bf16.msra.mxu3 %v5850_v46  ;;  %1347 = vmatpush.bf16.msra.mxu2 %v5754_v55  ;;  %v8021_v46 = vld [vmem:[%s11835_s1 + $0x3b4] sm:$0xf]  ;;  %v8019_v55 = vld [vmem:[%s11835_s1 + $0x3a4] sm:$0xf] }
  0x69   : > { %v5718_v48 = vor.u32 %v8021_v46, %v5715_v47  ;;  %v5710_v57 = vor.u32 %v8019_v55, %v5707_v56  ;;  %v8057_v46 = vld [vmem:[%s11835_s1 + $0x4d4] sm:$0xf] }
  0x6a   : > { %1366 = vmatpush.bf16.msrb.mxu0 %v5622_v31  ;;  %1379 = vmatpush.bf16.msrb.mxu1 %v5686_v32  ;;  %v5646_v31 = vor.u32 %v8003_v27, %v5643_v29  ;;  %v5817_v32 = vld [vmem:[%s11835_s1 + $0x480] sm:$0xf] }
  0x6b   : > { %v5818_v36 = vor.u32 %v8048_v33, %v5817_v32 }
  0x6c   : > { %1357 = vmatpush.bf16.msra.mxu3 %v5842_v59  ;;  %1392 = vmatpush.bf16.msrb.mxu2 %v5750_v61  ;;  %v5699_v59 = vld [vmem:[%s11835_s1 + $0x398] sm:$0xf0] }
  0x6d   : > { %v5702_v60 = vor.u32 %v8017_v58, %v5699_v59  ;;  %v8055_v58 = vld [vmem:[%s11835_s1 + $0x4c4] sm:$0xf] }
  0x6e   : > { %1367 = vmatpush.bf16.msrb.mxu0 %v5614_v37  ;;  %1380 = vmatpush.bf16.msrb.mxu1 %v5678_v41  ;;  %v5723_v37 = vld [vmem:[%s11835_s1 + $0x3c8] sm:$0xf0]  ;;  %v8001_v41 = vld [vmem:[%s11835_s1 + $0x314] sm:$0xf] }
  0x6f   : > { %v5726_v38 = vor.u32 %v8023_v34, %v5723_v37  ;;  %v5638_v45 = vor.u32 %v8001_v41, %v5635_v43  ;;  %v8039_v41 = vld [vmem:[%s11835_s1 + $0x444] sm:$0xf] }
  0x70   : > { %1358 = vmatpush.bf16.msra.mxu3 %v5834_v11  ;;  %1393 = vmatpush.bf16.msrb.mxu2 %v5742_v15  ;;  %v5811_v11 = vld [vmem:[%s11835_s1 + $0x478] sm:$0xf0] }
  0x72   : > { %1368 = vmatpush.bf16.msrb.mxu0 %v5606_v50  ;;  %1381 = vmatpush.bf16.msrb.mxu1 %v5670_v54  ;;  %v5563_v50 = vld [vmem:[%s11835_s1 + $0x288] sm:$0xf0]  ;;  %v5630_v54 = vor.u32 %v7999_v51, %v5627_v53  ;;  %v8037_v51 = vld [vmem:[%s11835_s1 + $0x434] sm:$0xf]  ;;  %v6001_v53 = vld [vmem:[%s11835_s1 + $0xf0] sm:$0xf] }
  0x73   : > { %v5566_v52 = vor.u32 %v7983_v49, %v5563_v50  ;;  %v5921_v49 = vld [vmem:[%s11835_s1 + $0x50] sm:$0xf]  ;;  %v7914_v50 = vld [vmem:[%s11835_s1 + $0x54] sm:$0xf0] }
  0x74   : > { %1359 = vmatpush.bf16.msra.mxu3 %v5826_v10  ;;  %1394 = vmatpush.bf16.msrb.mxu2 %v5734_v24  ;;  %v5937_v10 = vld [vmem:[%s11835_s1 + $0x70] sm:$0xf]  ;;  %v8041_v24 = vld [vmem:[%s11835_s1 + $0x454] sm:$0xf] }
  0x75   : > { %v5938_v29 = vor.u32 %v7918_v23, %v5937_v10  ;;  %v5798_v37 = vor.u32 %v8041_v24, %v5795_v25  ;;  %v5905_v10 = vld [vmem:[%s11835_s1 + $0x30] sm:$0xf]  ;;  %v7910_v23 = vld [vmem:[%s11835_s1 + $0x34] sm:$0xf0] }
  0x76   : > { %1369 = vmatpush.bf16.msrb.mxu0 %v5598_v4  ;;  %1382 = vmatpush.bf16.msrb.mxu1 %v5662_v6  ;;  %v5694_v4 = vor.u32 %v8015_v63, %v5691_v0  ;;  %v5851_v0 = vld [vmem:[%s11835_s1 + $0x4c8] sm:$0xf0] }
  0x78   : > { %1360 = vmatpush.bf16.msra.mxu3 %v5818_v36  ;;  %1395 = vmatpush.bf16.msrb.mxu2 %v5726_v38  ;;  %v5867_v38 = vld [vmem:[%s11835_s1 + $0x4e8] sm:$0xf0] }
  0x7a   : > { %1370 = vmatpush.bf16.msrb.mxu0 %v5590_v16  ;;  %1383 = vmatpush.bf16.msrb.mxu1 %v5654_v19  ;;  %v5814_v16 = vor.u32 %v8045_v9, %v5811_v11  ;;  %v5803_v19 = vld [vmem:[%s11835_s1 + $0x468] sm:$0xf0] }
  0x7b   : > { %v5806_v21 = vor.u32 %v8043_v18, %v5803_v19  ;;  %v7932_v18 = vld [vmem:[%s11835_s1 + $0xe4] sm:$0xf0]  ;;  %v5854_v19 = vor.u32 %v8055_v58, %v5851_v0  ;;  %v6057_v0 = vld [vmem:[%s11835_s1 + $0x160] sm:$0xf] }
  0x7c   : > { %1396 = vmatpush.bf16.msrb.mxu2 %v5718_v48  ;;  %v5859_v48 = vld [vmem:[%s11835_s1 + $0x4d8] sm:$0xf0] }
  0x7d   : > { %v5862_v56 = vor.u32 %v8057_v46, %v5859_v48  ;;  %v5755_v46 = vld [vmem:[%s11835_s1 + $0x408] sm:$0xf0]  ;;  %v7928_v48 = vld [vmem:[%s11835_s1 + $0xc4] sm:$0xf0] }
  0x7e   : > { %1371 = vmatpush.bf16.msrb.mxu0 %v5582_v28  ;;  %1384 = vmatpush.bf16.msrb.mxu1 %v5646_v31  ;;  %v5878_v28 = vor.u32 %v8061_v20, %v5875_v22  ;;  %v8059_v31 = vld [vmem:[%s11835_s1 + $0x4e4] sm:$0xf]  ;;  %v5843_v22 = vld [vmem:[%s11835_s1 + $0x4b8] sm:$0xf0] }
  0x7f   : > { %v5870_v43 = vor.u32 %v8059_v31, %v5867_v38 }
  0x80   : > { %1397 = vmatpush.bf16.msrb.mxu2 %v5710_v57  ;;  %v5922_v57 = vor.u32 %v7914_v50, %v5921_v49 }
  0x82   : > { %1372 = vmatpush.bf16.msrb.mxu0 %v5574_v42  ;;  %1385 = vmatpush.bf16.msrb.mxu1 %v5638_v45  ;;  %v5787_v42 = vld [vmem:[%s11835_s1 + $0x448] sm:$0xf0]  ;;  %v5930_v45 = vor.u32 %v7916_v40, %v5929_v39  ;;  %v5897_v40 = vld [vmem:[%s11835_s1 + $0x20] sm:$0xf] }
  0x83   : > { %v5790_v47 = vor.u32 %v8039_v41, %v5787_v42  ;;  %v5835_v39 = vld [vmem:[%s11835_s1 + $0x4a8] sm:$0xf0]  ;;  %v7908_v41 = vld [vmem:[%s11835_s1 + $0x24] sm:$0xf0] }
  0x84   : > { %1398 = vmatpush.bf16.msrb.mxu2 %v5702_v60  ;;  %v5898_v50 = vor.u32 %v7908_v41, %v5897_v40  ;;  %v5953_v41 = vld [vmem:[%s11835_s1 + $0x90] sm:$0xf] }
  0x86   : > { %1373 = vmatpush.bf16.msrb.mxu0 %v5566_v52  ;;  %1386 = vmatpush.bf16.msrb.mxu1 %v5630_v54  ;;  %v5779_v52 = vld [vmem:[%s11835_s1 + $0x438] sm:$0xf0]  ;;  %v7934_v54 = vld [vmem:[%s11835_s1 + $0xf4] sm:$0xf0] }
  0x87   : > { %v5782_v11 = vor.u32 %v8037_v51, %v5779_v52  ;;  %v6065_v51 = vld [vmem:[%s11835_s1 + $0x170] sm:$0xf]  ;;  %v7950_v52 = vld [vmem:[%s11835_s1 + $0x174] sm:$0xf0] }
  0x88   : > { %1399 = vmatpush.bf16.msrb.mxu2 %v5694_v4  ;;  %v5913_v4 = vld [vmem:[%s11835_s1 + $0x40] sm:$0xf] }
  0xa6   : > { %v9111_v61 = vpop.f32.mrf.mxu0  ;;  %v9113_v62 = vpop.f32.mrf.mxu1 }
  0xae   : > { %v9121_v5 = vpop.f32.mrf.mxu2  ;;  %v9123_v6 = vpop.f32.mrf.mxu3 }
  0xaf   : > { %v527_v7 = vpop.f32.mrf.mxu0  ;;  %v540_v8 = vpop.f32.mrf.mxu1 }
  0xb0   : > { %v7912_v7 = vld [vmem:[%s11835_s1 + $0x44] sm:$0xf0] }
  0xb1   : > { %v5914_v20 = vor.u32 %v7912_v7, %v5913_v4 }
  0xb6   : > { %v553_v12 = vpop.f32.mrf.mxu2  ;;  %v566_v13 = vpop.f32.mrf.mxu3 }
  0xb7   : > { %v9131_v14 = vpop.f32.mrf.mxu0  ;;  %v602_v15 = vpop.f32.mrf.mxu1  ;;  %v6002_v12 = vor.u32 %v7934_v54, %v6001_v53  ;;  %v8035_v13 = vld [vmem:[%s11835_s1 + $0x424] sm:$0xf]  ;;  %v8049_v53 = vld [vmem:[%s11835_s1 + $0x494] sm:$0xf]  ;;  %v5827_v54 = vld [vmem:[%s11835_s1 + $0x498] sm:$0xf0] }
  0xb8   : > { %v9133_v17 = vpack.c.bf16 %v602_v15, %v602_v15  ;;  %v5771_v15 = vld [vmem:[%s11835_s1 + $0x428] sm:$0xf0]  ;;  %v5830_v4 = vor.u32 %v8049_v53, %v5827_v54  ;;  %v7978_v53 = vld [vmem:[%s11835_s1 + $0x254] sm:$0xf0] }
  0xb9   : > { %v5774_v24 = vor.u32 %v8035_v13, %v5771_v15  ;;  %v5819_v13 = vld [vmem:[%s11835_s1 + $0x488] sm:$0xf0]  ;;  %v5881_v15 = vld [vmem:[%s11835_s1] sm:$0xf] }
  0xba   : > { %1309 = vmatmul.bf16.vlgmr.msrb.gmra.mxu3 %v9133_v17 }
  0xbb   : > { %1405 = vmatpush.bf16.msrb.mxu3 %v5814_v16  ;;  %v5993_v16 = vld [vmem:[%s11835_s1 + $0xe0] sm:$0xf] }
  0xbc   : > { %v5994_v25 = vor.u32 %v7932_v18, %v5993_v16  ;;  %v7904_v16 = vld [vmem:[%s11835_s1 + $0x4] sm:$0xf0]  ;;  %v6129_v18 = vld [vmem:[%s11835_s1 + $0x1f0] sm:$0xf] }
  0xbe   : > { %v615_v26 = vpop.f32.mrf.mxu2  ;;  %v628_v27 = vpop.f32.mrf.mxu3 }
  0xbf   : > { %v9163_v32 = vpack.c.bf16 %v615_v26, %v615_v26  ;;  %v9165_v33 = vpack.c.bf16 %v628_v27, %v628_v27  ;;  %1406 = vmatpush.bf16.msrb.mxu3 %v5806_v21  ;;  %v579_v34 = vpop.f32.mrf.mxu0  ;;  %v604_v36 = vpop.f32.mrf.mxu1  ;;  %v8053_v21 = vld [vmem:[%s11835_s1 + $0x4b4] sm:$0xf]  ;;  %v5763_v27 = vld [vmem:[%s11835_s1 + $0x418] sm:$0xf0] }
  0xc0   : > { %v8033_v26 = vld [vmem:[%s11835_s1 + $0x414] sm:$0xf]  ;;  %v5846_v31 = vor.u32 %v8053_v21, %v5843_v22  ;;  %v5906_v34 = vor.u32 %v7910_v23, %v5905_v10  ;;  %v8051_v36 = vld [vmem:[%s11835_s1 + $0x4a4] sm:$0xf]  ;;  %v6193_v21 = vld [vmem:[%s11835_s1 + $0x270] sm:$0xf] }
  0xc1   : > { %1322 = vmatmul.bf16.vlgmr.msra.gmra.mxu0 %v9163_v32  ;;  %1335 = vmatmul.bf16.vlgmr.msra.gmra.mxu1 %v9165_v33  ;;  %v5766_v42 = vor.u32 %v8033_v26, %v5763_v27  ;;  %v5838_v49 = vor.u32 %v8051_v36, %v5835_v39  ;;  %v7982_v22 = vld [vmem:[%s11835_s1 + $0x274] sm:$0xf0]  ;;  %v5961_v23 = vld [vmem:[%s11835_s1 + $0xa0] sm:$0xf]  ;;  %v5882_v26 = vor.u32 %v7904_v16, %v5881_v15  ;;  %v6049_v27 = vld [vmem:[%s11835_s1 + $0x150] sm:$0xf] }
  0xc2   : > { %1418 = vmatpush.bf16.msra.mxu0 %v5878_v28  ;;  %1831 = vmatpush.bf16.msra.mxu1 %v5938_v29  ;;  %v5985_v28 = vld [vmem:[%s11835_s1 + $0xd0] sm:$0xf]  ;;  %v7930_v29 = vld [vmem:[%s11835_s1 + $0xd4] sm:$0xf0]  ;;  %v7980_v39 = vld [vmem:[%s11835_s1 + $0x264] sm:$0xf0] }
  0xc3   : > { %1407 = vmatpush.bf16.msrb.mxu3 %v5798_v37  ;;  %v6025_v16 = vld [vmem:[%s11835_s1 + $0x120] sm:$0xf] }
  0xc6   : > { %1419 = vmatpush.bf16.msra.mxu0 %v5870_v43  ;;  %1832 = vmatpush.bf16.msra.mxu1 %v5930_v45  ;;  %v617_v55 = vpop.f32.mrf.mxu2  ;;  %v630_v59 = vpop.f32.mrf.mxu3  ;;  %v5986_v43 = vor.u32 %v7930_v29, %v5985_v28  ;;  %v8031_v45 = vld [vmem:[%s11835_s1 + $0x404] sm:$0xf]  ;;  %v7946_v28 = vld [vmem:[%s11835_s1 + $0x154] sm:$0xf0] }
  0xc7   : > { %1408 = vmatpush.bf16.msrb.mxu3 %v5790_v47  ;;  %v641_v60 = vpop.f32.mrf.mxu0  ;;  %v654_v63 = vpop.f32.mrf.mxu1  ;;  %v5977_v47 = vld [vmem:[%s11835_s1 + $0xc0] sm:$0xf]  ;;  %v5889_v55 = vld [vmem:[%s11835_s1 + $0x10] sm:$0xf]  ;;  %v6066_v59 = vor.u32 %v7950_v52, %v6065_v51  ;;  %v6050_v40 = vor.u32 %v7946_v28, %v6049_v27  ;;  %v7962_v51 = vld [vmem:[%s11835_s1 + $0x1d4] sm:$0xf0] }
  0xc8   : > { %v9220_v8 = vpack.c.bf16 %v641_v60, %v641_v60  ;;  %v9222_v9 = vpack.c.bf16 %v654_v63, %v654_v63  ;;  %v5978_v58 = vor.u32 %v7928_v48, %v5977_v47  ;;  %v5969_v60 = vld [vmem:[%s11835_s1 + $0xb0] sm:$0xf]  ;;  %v7926_v63 = vld [vmem:[%s11835_s1 + $0xb4] sm:$0xf0] }
  0xc9   : > { %v6113_v48 = vld [vmem:[%s11835_s1 + $0x1d0] sm:$0xf] }
  0xca   : > { %1420 = vmatpush.bf16.msra.mxu0 %v5862_v56  ;;  %1833 = vmatpush.bf16.msra.mxu1 %v5922_v57  ;;  %v7906_v56 = vld [vmem:[%s11835_s1 + $0x14] sm:$0xf0]  ;;  %v5758_v57 = vor.u32 %v8031_v45, %v5755_v46  ;;  %v7944_v45 = vld [vmem:[%s11835_s1 + $0x144] sm:$0xf0]  ;;  %v6177_v52 = vld [vmem:[%s11835_s1 + $0x250] sm:$0xf] }
  0xcb   : > { %1348 = vmatmul.bf16.vlgmr.msra.gmra.mxu2 %v9220_v8  ;;  %1361 = vmatmul.bf16.vlgmr.msra.gmra.mxu3 %v9222_v9  ;;  %v5890_v7 = vor.u32 %v7906_v56, %v5889_v55  ;;  %v7920_v55 = vld [vmem:[%s11835_s1 + $0x84] sm:$0xf0]  ;;  %v6033_v56 = vld [vmem:[%s11835_s1 + $0x130] sm:$0xf] }
  0xcc   : > { %1409 = vmatpush.bf16.msrb.mxu3 %v5782_v11  ;;  %1844 = vmatpush.bf16.msra.mxu2 %v6002_v12  ;;  %v7948_v11 = vld [vmem:[%s11835_s1 + $0x164] sm:$0xf0]  ;;  %v8047_v12 = vld [vmem:[%s11835_s1 + $0x484] sm:$0xf]  ;;  %v6017_v28 = vld [vmem:[%s11835_s1 + $0x110] sm:$0xf] }
  0xcd   : > { %v6058_v10 = vor.u32 %v7948_v11, %v6057_v0  ;;  %v6105_v0 = vld [vmem:[%s11835_s1 + $0x1c0] sm:$0xf] }
  0xce   : > { %1421 = vmatpush.bf16.msra.mxu0 %v5854_v19  ;;  %1834 = vmatpush.bf16.msra.mxu1 %v5914_v20  ;;  %v5970_v19 = vor.u32 %v7926_v63, %v5969_v60  ;;  %v7966_v20 = vld [vmem:[%s11835_s1 + $0x1f4] sm:$0xf0]  ;;  %v6114_v60 = vor.u32 %v7962_v51, %v6113_v48  ;;  %v6178_v63 = vor.u32 %v7978_v53, %v6177_v52  ;;  %v6169_v11 = vld [vmem:[%s11835_s1 + $0x240] sm:$0xf]  ;;  %v5915_v48 = vld [vmem:[%s11835_s1 + $0x48] sm:$0xf0] }
  0xcf   : > { %v643_v37 = vpop.f32.mrf.mxu0  ;;  %v656_v38 = vpop.f32.mrf.mxu1  ;;  %v6130_v29 = vor.u32 %v7966_v20, %v6129_v18  ;;  %v7940_v18 = vld [vmem:[%s11835_s1 + $0x124] sm:$0xf0]  ;;  %v5931_v20 = vld [vmem:[%s11835_s1 + $0x68] sm:$0xf0]  ;;  %v7933_v52 = vld [vmem:[%s11835_s1 + $0xf4] sm:$0xf] }
  0xd0   : > { %1410 = vmatpush.bf16.msrb.mxu3 %v5774_v24  ;;  %1845 = vmatpush.bf16.msra.mxu2 %v5994_v25  ;;  %v7924_v24 = vld [vmem:[%s11835_s1 + $0xa4] sm:$0xf0]  ;;  %v5822_v25 = vor.u32 %v8047_v12, %v5819_v13  ;;  %v6185_v38 = vld [vmem:[%s11835_s1 + $0x260] sm:$0xf]  ;;  %v6003_v53 = vld [vmem:[%s11835_s1 + $0xf8] sm:$0xf0] }
  0xd1   : > { %1374 = vmatmul.bf16.vlgmr.msrb.gmra.mxu0 %v9133_v17  ;;  %1387 = vmatmul.bf16.vlgmr.msrb.gmra.mxu1 %v9163_v32  ;;  %v5962_v36 = vor.u32 %v7924_v24, %v5961_v23  ;;  %v7964_v37 = vld [vmem:[%s11835_s1 + $0x1e4] sm:$0xf0]  ;;  %v6186_v47 = vor.u32 %v7980_v39, %v6185_v38  ;;  %v7958_v23 = vld [vmem:[%s11835_s1 + $0x1b4] sm:$0xf0]  ;;  %v6161_v24 = vld [vmem:[%s11835_s1 + $0x230] sm:$0xf] }
  0xd2   : > { %1422 = vmatpush.bf16.msra.mxu0 %v5846_v31  ;;  %1835 = vmatpush.bf16.msra.mxu1 %v5906_v34  ;;  %v6194_v31 = vor.u32 %v7982_v22, %v6193_v21  ;;  %v6121_v34 = vld [vmem:[%s11835_s1 + $0x1e0] sm:$0xf]  ;;  %v7976_v12 = vld [vmem:[%s11835_s1 + $0x244] sm:$0xf0] }
  0xd3   : > { %v6122_v46 = vor.u32 %v7964_v37, %v6121_v34  ;;  %v6170_v22 = vor.u32 %v7976_v12, %v6169_v11  ;;  %v7913_v34 = vld [vmem:[%s11835_s1 + $0x54] sm:$0xf]  ;;  %v7956_v39 = vld [vmem:[%s11835_s1 + $0x1a4] sm:$0xf0]  ;;  %v5995_v11 = vld [vmem:[%s11835_s1 + $0xe8] sm:$0xf0] }
  0xd4   : > { %1411 = vmatpush.bf16.msrb.mxu3 %v5766_v42  ;;  %1846 = vmatpush.bf16.msra.mxu2 %v5986_v43  ;;  %v7922_v42 = vld [vmem:[%s11835_s1 + $0x94] sm:$0xf0]  ;;  %v6041_v43 = vld [vmem:[%s11835_s1 + $0x140] sm:$0xf] }
  0xd5   : > { %v6042_v54 = vor.u32 %v7944_v45, %v6041_v43  ;;  %v6009_v45 = vld [vmem:[%s11835_s1 + $0x100] sm:$0xf] }
  0xd6   : > { %1423 = vmatpush.bf16.msra.mxu0 %v5838_v49  ;;  %1836 = vmatpush.bf16.msra.mxu1 %v5898_v50  ;;  %v9385_v49 = vpack.c.bf16 %v9111_v61, %v9111_v61  ;;  %v5954_v50 = vor.u32 %v7922_v42, %v5953_v41  ;;  %v5945_v61 = vld [vmem:[%s11835_s1 + $0x80] sm:$0xf]  ;;  %v7972_v41 = vld [vmem:[%s11835_s1 + $0x224] sm:$0xf0] }
  0xd7   : > { %v6073_v12 = vld [vmem:[%s11835_s1 + $0x180] sm:$0xf] }
  0xd8   : > { %1412 = vmatpush.bf16.msrb.mxu3 %v5758_v57  ;;  %1847 = vmatpush.bf16.msra.mxu2 %v5978_v58  ;;  %v7942_v57 = vld [vmem:[%s11835_s1 + $0x134] sm:$0xf0]  ;;  %v7917_v58 = vld [vmem:[%s11835_s1 + $0x74] sm:$0xf] }
  0xd9   : > { %v6034_v13 = vor.u32 %v7942_v57, %v6033_v56  ;;  %v7970_v56 = vld [vmem:[%s11835_s1 + $0x214] sm:$0xf0] }
  0xda   : > { %1424 = vmatpush.bf16.msra.mxu0 %v5830_v4  ;;  %1837 = vmatpush.bf16.msra.mxu1 %v5890_v7  ;;  %v5946_v4 = vor.u32 %v7920_v55, %v5945_v61  ;;  %v7960_v7 = vld [vmem:[%s11835_s1 + $0x1c4] sm:$0xf0]  ;;  %v7954_v61 = vld [vmem:[%s11835_s1 + $0x194] sm:$0xf0]  ;;  %v6145_v55 = vld [vmem:[%s11835_s1 + $0x210] sm:$0xf] }
  0xdb   : > { %1400 = vmatmul.bf16.vlgmr.msrb.gmra.mxu2 %v9165_v33  ;;  %1413 = vmatmul.bf16.vlgmr.msrb.gmra.mxu3 %v9220_v8  ;;  %v6106_v21 = vor.u32 %v7960_v7, %v6105_v0  ;;  %v7931_v0 = vld [vmem:[%s11835_s1 + $0xe4] sm:$0xf]  ;;  %v6146_v7 = vor.u32 %v7970_v56, %v6145_v55  ;;  %v6115_v55 = vld [vmem:[%s11835_s1 + $0x1d8] sm:$0xf0] }
  0xdc   : > { %1857 = vmatpush.bf16.msra.mxu3 %v6066_v59  ;;  %1848 = vmatpush.bf16.msra.mxu2 %v5970_v19  ;;  %v5939_v59 = vld [vmem:[%s11835_s1 + $0x78] sm:$0xf0]  ;;  %v7915_v19 = vld [vmem:[%s11835_s1 + $0x64] sm:$0xf] }
  0xdd   : > { %v5942_v15 = vor.u32 %v7917_v58, %v5939_v59  ;;  %v5934_v27 = vor.u32 %v7915_v19, %v5931_v20  ;;  %v6006_v59 = vor.u32 %v7933_v52, %v6003_v53  ;;  %v6067_v20 = vld [vmem:[%s11835_s1 + $0x178] sm:$0xf0]  ;;  %v7945_v52 = vld [vmem:[%s11835_s1 + $0x154] sm:$0xf]  ;;  %v9603_v53 = vpop.f32.mrf.mxu0  ;;  %v7903_v56 = vld [vmem:[%s11835_s1 + $0x4] sm:$0xf] }
  0xde   : > { %1425 = vmatpush.bf16.msra.mxu0 %v5822_v25  ;;  %1838 = vmatpush.bf16.msra.mxu1 %v5882_v26  ;;  %v7974_v25 = vld [vmem:[%s11835_s1 + $0x234] sm:$0xf0]  ;;  %v6026_v26 = vor.u32 %v7940_v18, %v6025_v16  ;;  %v7968_v16 = vld [vmem:[%s11835_s1 + $0x204] sm:$0xf0]  ;;  %v7949_v18 = vld [vmem:[%s11835_s1 + $0x174] sm:$0xf] }
  0xdf   : > { %v6162_v38 = vor.u32 %v7974_v25, %v6161_v24  ;;  %v7907_v24 = vld [vmem:[%s11835_s1 + $0x24] sm:$0xf]  ;;  %v5899_v25 = vld [vmem:[%s11835_s1 + $0x28] sm:$0xf0] }
  0xe0   : > { %1858 = vmatpush.bf16.msra.mxu3 %v6058_v10  ;;  %1849 = vmatpush.bf16.msra.mxu2 %v5962_v36  ;;  %v6097_v10 = vld [vmem:[%s11835_s1 + $0x1b0] sm:$0xf]  ;;  %v5923_v36 = vld [vmem:[%s11835_s1 + $0x58] sm:$0xf0] }
  0xe1   : > { %1426 = vmatmul.bf16.vlgmr.msra.gmra.mxu0 %v9222_v9  ;;  %1839 = vmatmul.bf16.vlgmr.msra.gmra.mxu1 %v9385_v49  ;;  %v6098_v37 = vor.u32 %v7958_v23, %v6097_v10  ;;  %v5926_v43 = vor.u32 %v7913_v34, %v5923_v36  ;;  %v9549_v10 = vpack.c.bf16 %v9121_v5, %v9121_v5  ;;  %v7929_v5 = vld [vmem:[%s11835_s1 + $0xd4] sm:$0xf]  ;;  %v5987_v34 = vld [vmem:[%s11835_s1 + $0xd8] sm:$0xf0]  ;;  %v7947_v36 = vld [vmem:[%s11835_s1 + $0x164] sm:$0xf] }
  0xe2   : > { %1870 = vmatpush.bf16.msrb.mxu0 %v6130_v29  ;;  %1883 = vmatpush.bf16.msrb.mxu1 %v6194_v31  ;;  %v9457_v29 = vpack.c.bf16 %v9113_v62, %v9113_v62  ;;  %v7938_v31 = vld [vmem:[%s11835_s1 + $0x114] sm:$0xf0]  ;;  %v6089_v62 = vld [vmem:[%s11835_s1 + $0x1a0] sm:$0xf]  ;;  %v5998_v23 = vor.u32 %v7931_v0, %v5995_v11 }
  0xe3   : > { %v6018_v42 = vor.u32 %v7938_v31, %v6017_v28  ;;  %v6070_v28 = vor.u32 %v7949_v18, %v6067_v20  ;;  %v7959_v18 = vld [vmem:[%s11835_s1 + $0x1c4] sm:$0xf] }
  0xe4   : > { %1859 = vmatpush.bf16.msra.mxu3 %v6050_v40  ;;  %1850 = vmatpush.bf16.msra.mxu2 %v5954_v50  ;;  %v6153_v40 = vld [vmem:[%s11835_s1 + $0x220] sm:$0xf]  ;;  %v6090_v50 = vor.u32 %v7956_v39, %v6089_v62  ;;  %v6059_v62 = vld [vmem:[%s11835_s1 + $0x168] sm:$0xf0]  ;;  %v7963_v39 = vld [vmem:[%s11835_s1 + $0x1e4] sm:$0xf] }
  0xe5   : > { %v6154_v51 = vor.u32 %v7972_v41, %v6153_v40  ;;  %v6123_v40 = vld [vmem:[%s11835_s1 + $0x1e8] sm:$0xf0]  ;;  %v7905_v41 = vld [vmem:[%s11835_s1 + $0x14] sm:$0xf] }
  0xe6   : > { %1871 = vmatpush.bf16.msrb.mxu0 %v6122_v46  ;;  %1884 = vmatpush.bf16.msrb.mxu1 %v6186_v47  ;;  %v7936_v46 = vld [vmem:[%s11835_s1 + $0x104] sm:$0xf0]  ;;  %v7911_v47 = vld [vmem:[%s11835_s1 + $0x44] sm:$0xf] }
  0xe7   : > { %v6010_v57 = vor.u32 %v7936_v46, %v6009_v45  ;;  %v5918_v58 = vor.u32 %v7911_v47, %v5915_v48  ;;  %v9588_v45 = vpack.c.bf16 %v9123_v6, %v9123_v6  ;;  %v5990_v46 = vor.u32 %v7929_v5, %v5987_v34  ;;  %v5979_v6 = vld [vmem:[%s11835_s1 + $0xc8] sm:$0xf0]  ;;  %v6035_v5 = vld [vmem:[%s11835_s1 + $0x138] sm:$0xf0] }
  0xe8   : > { %1860 = vmatpush.bf16.msra.mxu3 %v6042_v54  ;;  %1851 = vmatpush.bf16.msra.mxu2 %v5946_v4  ;;  %v6081_v54 = vld [vmem:[%s11835_s1 + $0x190] sm:$0xf]  ;;  %v9592_v47 = vpack.c.bf16 %v9131_v14, %v9131_v14  ;;  %v6062_v48 = vor.u32 %v7947_v36, %v6059_v62  ;;  %v7957_v36 = vld [vmem:[%s11835_s1 + $0x1b4] sm:$0xf] }
  0xe9   : > { %v6082_v4 = vor.u32 %v7954_v61, %v6081_v54  ;;  %v6051_v54 = vld [vmem:[%s11835_s1 + $0x158] sm:$0xf0]  ;;  %v7961_v61 = vld [vmem:[%s11835_s1 + $0x1d4] sm:$0xf] }
  0xea   : > { %1872 = vmatpush.bf16.msrb.mxu0 %v6114_v60  ;;  %1885 = vmatpush.bf16.msrb.mxu1 %v6178_v63  ;;  %v7909_v60 = vld [vmem:[%s11835_s1 + $0x34] sm:$0xf]  ;;  %v5907_v63 = vld [vmem:[%s11835_s1 + $0x38] sm:$0xf0]  ;;  %v6118_v0 = vor.u32 %v7961_v61, %v6115_v55  ;;  %v6171_v61 = vld [vmem:[%s11835_s1 + $0x248] sm:$0xf0] }
  0xeb   : > { %1852 = vmatmul.bf16.vlgmr.msra.gmra.mxu2 %v9457_v29  ;;  %v5910_v19 = vor.u32 %v7909_v60, %v5907_v63  ;;  %v6195_v60 = vld [vmem:[%s11835_s1 + $0x278] sm:$0xf0]  ;;  %v6054_v63 = vor.u32 %v7945_v52, %v6051_v54  ;;  %v6091_v52 = vld [vmem:[%s11835_s1 + $0x1a8] sm:$0xf0]  ;;  %v7975_v54 = vld [vmem:[%s11835_s1 + $0x244] sm:$0xf] }
  0xec   : > { %1861 = vmatpush.bf16.msra.mxu3 %v6034_v13  ;;  %1896 = vmatpush.bf16.msrb.mxu2 %v5942_v15  ;;  %v7952_v13 = vld [vmem:[%s11835_s1 + $0x184] sm:$0xf0]  ;;  %v6137_v15 = vld [vmem:[%s11835_s1 + $0x200] sm:$0xf] }
  0xee   : > { %1873 = vmatpush.bf16.msrb.mxu0 %v6106_v21  ;;  %1886 = vmatpush.bf16.msrb.mxu1 %v6170_v22  ;;  %v7965_v21 = vld [vmem:[%s11835_s1 + $0x1f4] sm:$0xf]  ;;  %v6131_v22 = vld [vmem:[%s11835_s1 + $0x1f8] sm:$0xf0] }
  0xef   : > { %v6134_v31 = vor.u32 %v7965_v21, %v6131_v22  ;;  %v7979_v22 = vld [vmem:[%s11835_s1 + $0x264] sm:$0xf] }
  0xf0   : > { %1862 = vmatpush.bf16.msra.mxu3 %v6026_v26  ;;  %1897 = vmatpush.bf16.msrb.mxu2 %v5934_v27  ;;  %v6074_v26 = vor.u32 %v7952_v13, %v6073_v12  ;;  %v6138_v27 = vor.u32 %v7968_v16, %v6137_v15  ;;  %v7943_v13 = vld [vmem:[%s11835_s1 + $0x144] sm:$0xf]  ;;  %v6043_v15 = vld [vmem:[%s11835_s1 + $0x148] sm:$0xf0] }
  0xf2   : > { %1874 = vmatpush.bf16.msrb.mxu0 %v6098_v37  ;;  %1887 = vmatpush.bf16.msrb.mxu1 %v6162_v38  ;;  %v9567_v37 = vpop.f32.mrf.mxu2  ;;  %v5902_v38 = vor.u32 %v7907_v24, %v5899_v25  ;;  %v6046_v24 = vor.u32 %v7943_v13, %v6043_v15  ;;  %v7923_v25 = vld [vmem:[%s11835_s1 + $0xa4] sm:$0xf]  ;;  %v7973_v15 = vld [vmem:[%s11835_s1 + $0x234] sm:$0xf] }
  0xf4   : > { %1863 = vmatpush.bf16.msra.mxu3 %v6018_v42  ;;  %1898 = vmatpush.bf16.msrb.mxu2 %v5926_v43  ;;  %v5891_v42 = vld [vmem:[%s11835_s1 + $0x18] sm:$0xf0]  ;;  %v9584_v43 = vpop.f32.mrf.mxu3 }
  0xf5   : > { %v5894_v14 = vor.u32 %v7905_v41, %v5891_v42  ;;  %v7921_v42 = vld [vmem:[%s11835_s1 + $0x94] sm:$0xf] }
  0xf6   : > { %1875 = vmatpush.bf16.msrb.mxu0 %v6090_v50  ;;  %1888 = vmatpush.bf16.msrb.mxu1 %v6154_v51  ;;  %v6126_v50 = vor.u32 %v7963_v39, %v6123_v40  ;;  %v7927_v51 = vld [vmem:[%s11835_s1 + $0xc4] sm:$0xf]  ;;  %v7977_v39 = vld [vmem:[%s11835_s1 + $0x254] sm:$0xf]  ;;  %v6179_v40 = vld [vmem:[%s11835_s1 + $0x258] sm:$0xf0] }
  0xf8   : > { %1864 = vmatpush.bf16.msra.mxu3 %v6010_v57  ;;  %1899 = vmatpush.bf16.msrb.mxu2 %v5918_v58  ;;  %v5883_v57 = vld [vmem:[%s11835_s1 + $0x8] sm:$0xf0]  ;;  %v5982_v58 = vor.u32 %v7927_v51, %v5979_v6  ;;  %v6182_v51 = vor.u32 %v7977_v39, %v6179_v40  ;;  %v7955_v6 = vld [vmem:[%s11835_s1 + $0x1a4] sm:$0xf] }
  0xf9   : > { %v5886_v12 = vor.u32 %v7903_v56, %v5883_v57  ;;  %v7919_v56 = vld [vmem:[%s11835_s1 + $0x84] sm:$0xf]  ;;  %v5947_v57 = vld [vmem:[%s11835_s1 + $0x88] sm:$0xf0] }
  0xfa   : > { %1876 = vmatpush.bf16.msrb.mxu0 %v6082_v4  ;;  %1889 = vmatpush.bf16.msrb.mxu1 %v6146_v7  ;;  %v7925_v4 = vld [vmem:[%s11835_s1 + $0xb4] sm:$0xf]  ;;  %v5971_v7 = vld [vmem:[%s11835_s1 + $0xb8] sm:$0xf0]  ;;  %v681_v11 = vpop.f32.mrf.mxu2  ;;  %v5950_v13 = vor.u32 %v7919_v56, %v5947_v57  ;;  %v6313_v57 = vld [vmem:[%s11835_s1 + $0x540] sm:$0xf] }
  0xfb   : > { %1865 = vmatmul.bf16.vlgmr.msra.gmra.mxu3 %v9549_v10  ;;  %v5974_v21 = vor.u32 %v7925_v4, %v5971_v7  ;;  %v6174_v4 = vor.u32 %v7975_v54, %v6171_v61  ;;  %v7953_v7 = vld [vmem:[%s11835_s1 + $0x194] sm:$0xf]  ;;  %v6083_v11 = vld [vmem:[%s11835_s1 + $0x198] sm:$0xf0] }
  0xfc   : > { %1909 = vmatpush.bf16.msrb.mxu3 %v6006_v59  ;;  %1900 = vmatpush.bf16.msrb.mxu2 %v5910_v19  ;;  %v7981_v59 = vld [vmem:[%s11835_s1 + $0x274] sm:$0xf]  ;;  %v6107_v19 = vld [vmem:[%s11835_s1 + $0x1c8] sm:$0xf0]  ;;  %v694_v20 = vpop.f32.mrf.mxu3  ;;  %v6147_v61 = vld [vmem:[%s11835_s1 + $0x218] sm:$0xf0] }
  0xfd   : > { %v6198_v16 = vor.u32 %v7981_v59, %v6195_v60  ;;  %v6094_v59 = vor.u32 %v7955_v6, %v6091_v52  ;;  %v8078_v60 = vld [vmem:[%s11835_s1 + $0x574] sm:$0xf0]  ;;  %v6329_v20 = vld [vmem:[%s11835_s1 + $0x560] sm:$0xf]  ;;  %v8092_v6 = vld [vmem:[%s11835_s1 + $0x5e4] sm:$0xf0] }
  0xfe   : > { %1877 = vmatpush.bf16.msrb.mxu0 %v6074_v26  ;;  %1890 = vmatpush.bf16.msrb.mxu1 %v6138_v27  ;;  %v5963_v26 = vld [vmem:[%s11835_s1 + $0xa8] sm:$0xf0]  ;;  %v707_v27 = vpop.f32.mrf.mxu0  ;;  %v6457_v52 = vld [vmem:[%s11835_s1 + $0x660] sm:$0xf]  ;;  %v7969_v54 = vld [vmem:[%s11835_s1 + $0x214] sm:$0xf] }
  0xff   : > { %v5966_v62 = vor.u32 %v7923_v25, %v5963_v26  ;;  %v7951_v25 = vld [vmem:[%s11835_s1 + $0x184] sm:$0xf]  ;;  %v6075_v26 = vld [vmem:[%s11835_s1 + $0x188] sm:$0xf0] }
 0x100   : > { %1910 = vmatpush.bf16.msrb.mxu3 %v5998_v23  ;;  %1901 = vmatpush.bf16.msrb.mxu2 %v5902_v38  ;;  %v6187_v23 = vld [vmem:[%s11835_s1 + $0x268] sm:$0xf0]  ;;  %v6099_v38 = vld [vmem:[%s11835_s1 + $0x1b8] sm:$0xf0]  ;;  %v6078_v40 = vor.u32 %v7951_v25, %v6075_v26  ;;  %v6441_v26 = vld [vmem:[%s11835_s1 + $0x640] sm:$0xf] }
 0x101   : > { %1878 = vmatmul.bf16.vlgmr.msrb.gmra.mxu0 %v9588_v45  ;;  %1891 = vmatmul.bf16.vlgmr.msrb.gmra.mxu1 %v9592_v47  ;;  %v6190_v34 = vor.u32 %v7979_v22, %v6187_v23  ;;  %v7935_v22 = vld [vmem:[%s11835_s1 + $0x104] sm:$0xf]  ;;  %v6086_v23 = vor.u32 %v7953_v7, %v6083_v11  ;;  %v8106_v7 = vld [vmem:[%s11835_s1 + $0x654] sm:$0xf0] }
 0x102   : > { %1922 = vmatpush.bf16.msra.mxu0 %v6070_v28  ;;  %1935 = vmatpush.bf16.msra.mxu1 %v6134_v31  ;;  %v6110_v28 = vor.u32 %v7959_v18, %v6107_v19  ;;  %v7941_v31 = vld [vmem:[%s11835_s1 + $0x134] sm:$0xf]  ;;  %v7967_v11 = vld [vmem:[%s11835_s1 + $0x204] sm:$0xf] }
 0x103   : > { %v6038_v41 = vor.u32 %v7941_v31, %v6035_v5  ;;  %v8094_v31 = vld [vmem:[%s11835_s1 + $0x5f4] sm:$0xf0]  ;;  %v6465_v5 = vld [vmem:[%s11835_s1 + $0x670] sm:$0xf] }
 0x104   : > { %1911 = vmatpush.bf16.msrb.mxu3 %v5990_v46  ;;  %1902 = vmatpush.bf16.msrb.mxu2 %v5894_v14  ;;  %v5955_v46 = vld [vmem:[%s11835_s1 + $0x98] sm:$0xf0] }
 0x105   : > { %v5958_v14 = vor.u32 %v7921_v42, %v5955_v46  ;;  %v6321_v42 = vld [vmem:[%s11835_s1 + $0x550] sm:$0xf]  ;;  %v8074_v46 = vld [vmem:[%s11835_s1 + $0x554] sm:$0xf0] }
 0x106   : > { %1923 = vmatpush.bf16.msra.mxu0 %v6062_v48  ;;  %1936 = vmatpush.bf16.msra.mxu1 %v6126_v50  ;;  %v6102_v48 = vor.u32 %v7957_v36, %v6099_v38  ;;  %v7939_v50 = vld [vmem:[%s11835_s1 + $0x124] sm:$0xf]  ;;  %v6155_v38 = vld [vmem:[%s11835_s1 + $0x228] sm:$0xf0] }
 0x107   : > { %v7971_v36 = vld [vmem:[%s11835_s1 + $0x224] sm:$0xf] }
 0x108   : > { %1912 = vmatpush.bf16.msrb.mxu3 %v5982_v58  ;;  %1903 = vmatpush.bf16.msrb.mxu2 %v5886_v12  ;;  %v6337_v58 = vld [vmem:[%s11835_s1 + $0x570] sm:$0xf]  ;;  %v9725_v12 = vpop.f32.mrf.mxu1 }
 0x109   : > { %v6338_v18 = vor.u32 %v8078_v60, %v6337_v58  ;;  %v8072_v58 = vld [vmem:[%s11835_s1 + $0x544] sm:$0xf0]  ;;  %v6150_v60 = vor.u32 %v7969_v54, %v6147_v61  ;;  %v6361_v54 = vld [vmem:[%s11835_s1 + $0x5a0] sm:$0xf] }
 0x10a   : > { %1924 = vmatpush.bf16.msra.mxu0 %v6054_v63  ;;  %1937 = vmatpush.bf16.msra.mxu1 %v6118_v0  ;;  %v7937_v63 = vld [vmem:[%s11835_s1 + $0x114] sm:$0xf]  ;;  %v6019_v0 = vld [vmem:[%s11835_s1 + $0x118] sm:$0xf0] }
 0x10b   : > { %1904 = vmatmul.bf16.vlgmr.msrb.gmra.mxu2 %v9385_v49  ;;  %v6027_v49 = vld [vmem:[%s11835_s1 + $0x128] sm:$0xf0]  ;;  %v6022_v19 = vor.u32 %v7937_v63, %v6019_v0  ;;  %v6385_v63 = vld [vmem:[%s11835_s1 + $0x5d0] sm:$0xf]  ;;  %v8090_v0 = vld [vmem:[%s11835_s1 + $0x5d4] sm:$0xf0] }
 0x10c   : > { %1948 = vmatpush.bf16.msra.mxu2 %v6198_v16  ;;  %1913 = vmatpush.bf16.msrb.mxu3 %v5974_v21  ;;  %v6030_v55 = vor.u32 %v7939_v50, %v6027_v49  ;;  %v6163_v16 = vld [vmem:[%s11835_s1 + $0x238] sm:$0xf0]  ;;  %v8076_v21 = vld [vmem:[%s11835_s1 + $0x564] sm:$0xf0]  ;;  %v6158_v49 = vor.u32 %v7971_v36, %v6155_v38  ;;  %v6297_v36 = vld [vmem:[%s11835_s1 + $0x520] sm:$0xf] }
 0x10d   : > { %v6166_v27 = vor.u32 %v7973_v15, %v6163_v16  ;;  %v6314_v15 = vor.u32 %v8072_v58, %v6313_v57  ;;  %v8126_v16 = vld [vmem:[%s11835_s1 + $0x6f4] sm:$0xf0]  ;;  %v8068_v38 = vld [vmem:[%s11835_s1 + $0x524] sm:$0xf0]  ;;  %v6505_v58 = vld [vmem:[%s11835_s1 + $0x6c0] sm:$0xf] }
 0x10e   : > { %1925 = vmatpush.bf16.msra.mxu0 %v6046_v24  ;;  %1938 = vmatpush.bf16.msra.mxu1 %v6110_v28  ;;  %v6011_v24 = vld [vmem:[%s11835_s1 + $0x108] sm:$0xf0]  ;;  %v6401_v28 = vld [vmem:[%s11835_s1 + $0x5f0] sm:$0xf] }
 0x10f   : > { %v6014_v39 = vor.u32 %v7935_v22, %v6011_v24  ;;  %v8088_v24 = vld [vmem:[%s11835_s1 + $0x5c4] sm:$0xf0] }
 0x110   : > { %1949 = vmatpush.bf16.msra.mxu2 %v6190_v34  ;;  %1914 = vmatpush.bf16.msrb.mxu3 %v5966_v62  ;;  %v8110_v34 = vld [vmem:[%s11835_s1 + $0x674] sm:$0xf0]  ;;  %v6330_v62 = vor.u32 %v8076_v21, %v6329_v20 }
 0x111   : > { %v6466_v50 = vor.u32 %v8110_v34, %v6465_v5  ;;  %v8124_v5 = vld [vmem:[%s11835_s1 + $0x6e4] sm:$0xf0] }
 0x112   : > { %1926 = vmatpush.bf16.msra.mxu0 %v6038_v41  ;;  %1939 = vmatpush.bf16.msra.mxu1 %v6102_v48  ;;  %v6402_v41 = vor.u32 %v8094_v31, %v6401_v28  ;;  %v9775_v48 = vpop.f32.mrf.mxu2  ;;  %v6521_v31 = vld [vmem:[%s11835_s1 + $0x6e0] sm:$0xf] }
 0x114   : > { %1950 = vmatpush.bf16.msra.mxu2 %v6182_v51  ;;  %1915 = vmatpush.bf16.msrb.mxu3 %v5958_v14  ;;  %v6393_v51 = vld [vmem:[%s11835_s1 + $0x5e0] sm:$0xf]  ;;  %v720_v14 = vpop.f32.mrf.mxu1 }
 0x115   : > { %v6394_v56 = vor.u32 %v8092_v6, %v6393_v51  ;;  %v8122_v51 = vld [vmem:[%s11835_s1 + $0x6d4] sm:$0xf0] }
 0x116   : > { %1927 = vmatpush.bf16.msra.mxu0 %v6030_v55  ;;  %1940 = vmatpush.bf16.msra.mxu1 %v6094_v59  ;;  %v6322_v55 = vor.u32 %v8074_v46, %v6321_v42  ;;  %v6433_v42 = vld [vmem:[%s11835_s1 + $0x630] sm:$0xf]  ;;  %v8102_v46 = vld [vmem:[%s11835_s1 + $0x634] sm:$0xf0] }
 0x117   : > { %v8066_v14 = vld [vmem:[%s11835_s1 + $0x514] sm:$0xf0] }
 0x118   : > { %1951 = vmatpush.bf16.msra.mxu2 %v6174_v4  ;;  %1916 = vmatpush.bf16.msrb.mxu3 %v5950_v13  ;;  %v6449_v4 = vld [vmem:[%s11835_s1 + $0x650] sm:$0xf]  ;;  %v6139_v13 = vld [vmem:[%s11835_s1 + $0x208] sm:$0xf0] }
 0x119   : > { %v6450_v21 = vor.u32 %v8106_v7, %v6449_v4  ;;  %v6142_v22 = vor.u32 %v7967_v11, %v6139_v13  ;;  %v6593_v4 = vld [vmem:[%s11835_s1 + $0x770] sm:$0xf]  ;;  %v8142_v11 = vld [vmem:[%s11835_s1 + $0x774] sm:$0xf0] }
 0x11a   : > { %1928 = vmatpush.bf16.msra.mxu0 %v6022_v19  ;;  %1941 = vmatpush.bf16.msra.mxu1 %v6086_v23  ;;  %v6305_v19 = vld [vmem:[%s11835_s1 + $0x530] sm:$0xf]  ;;  %v733_v20 = vpop.f32.mrf.mxu2  ;;  %v6377_v23 = vld [vmem:[%s11835_s1 + $0x5c0] sm:$0xf] }
 0x11b   : > { %1917 = vmatmul.bf16.vlgmr.msrb.gmra.mxu3 %v9457_v29  ;;  %v8108_v29 = vld [vmem:[%s11835_s1 + $0x664] sm:$0xf0]  ;;  %v6378_v34 = vor.u32 %v8088_v24, %v6377_v23  ;;  %v6353_v13 = vld [vmem:[%s11835_s1 + $0x590] sm:$0xf]  ;;  %v8118_v20 = vld [vmem:[%s11835_s1 + $0x6b4] sm:$0xf0] }
 0x11c   : > { %2442 = vmatpush.bf16.msra.mxu3 %v6338_v18  ;;  %1952 = vmatpush.bf16.msra.mxu2 %v6166_v27  ;;  %v6458_v59 = vor.u32 %v8108_v29, %v6457_v52  ;;  %v6386_v18 = vor.u32 %v8090_v0, %v6385_v63  ;;  %v8104_v27 = vld [vmem:[%s11835_s1 + $0x644] sm:$0xf0]  ;;  %v6289_v52 = vld [vmem:[%s11835_s1 + $0x510] sm:$0xf]  ;;  %v6434_v29 = vor.u32 %v8102_v46, %v6433_v42  ;;  %v6281_v63 = vld [vmem:[%s11835_s1 + $0x500] sm:$0xf] }
 0x11d   : > { %v6290_v57 = vor.u32 %v8066_v14, %v6289_v52  ;;  %v8064_v0 = vld [vmem:[%s11835_s1 + $0x504] sm:$0xf0]  ;;  %v6585_v23 = vld [vmem:[%s11835_s1 + $0x760] sm:$0xf]  ;;  %v8075_v14 = vld [vmem:[%s11835_s1 + $0x564] sm:$0xf] }
 0x11e   : > { %1929 = vmatpush.bf16.msra.mxu0 %v6014_v39  ;;  %1942 = vmatpush.bf16.msra.mxu1 %v6078_v40  ;;  %v6369_v39 = vld [vmem:[%s11835_s1 + $0x5b0] sm:$0xf]  ;;  %v8086_v40 = vld [vmem:[%s11835_s1 + $0x5b4] sm:$0xf0]  ;;  %v8140_v24 = vld [vmem:[%s11835_s1 + $0x764] sm:$0xf0] }
 0x11f   : > { %v6370_v6 = vor.u32 %v8086_v40, %v6369_v39  ;;  %v6489_v39 = vld [vmem:[%s11835_s1 + $0x6a0] sm:$0xf]  ;;  %v8116_v40 = vld [vmem:[%s11835_s1 + $0x6a4] sm:$0xf0]  ;;  %v6586_v42 = vor.u32 %v8140_v24, %v6585_v23  ;;  %v8071_v23 = vld [vmem:[%s11835_s1 + $0x544] sm:$0xf] }
 0x120   : > { %2443 = vmatpush.bf16.msra.mxu3 %v6330_v62  ;;  %1953 = vmatpush.bf16.msra.mxu2 %v6158_v49  ;;  %v6442_v62 = vor.u32 %v8104_v27, %v6441_v26  ;;  %v6513_v49 = vld [vmem:[%s11835_s1 + $0x6d0] sm:$0xf]  ;;  %v8080_v27 = vld [vmem:[%s11835_s1 + $0x584] sm:$0xf0]  ;;  %v6490_v52 = vor.u32 %v8116_v40, %v6489_v39  ;;  %v6315_v24 = vld [vmem:[%s11835_s1 + $0x548] sm:$0xf0] }
 0x121   : > { %1930 = vmatmul.bf16.vlgmr.msra.gmra.mxu0 %v9549_v10  ;;  %1943 = vmatmul.bf16.vlgmr.msra.gmra.mxu1 %v9588_v45  ;;  %v6529_v10 = vld [vmem:[%s11835_s1 + $0x6f0] sm:$0xf]  ;;  %v8070_v45 = vld [vmem:[%s11835_s1 + $0x534] sm:$0xf0]  ;;  %v6514_v61 = vor.u32 %v8122_v51, %v6513_v49  ;;  %v6553_v39 = vld [vmem:[%s11835_s1 + $0x720] sm:$0xf] }
 0x122   : > { %2455 = vmatpush.bf16.msrb.mxu0 %v6402_v41  ;;  %2468 = vmatpush.bf16.msrb.mxu1 %v6466_v50  ;;  %v6530_v25 = vor.u32 %v8126_v16, %v6529_v10  ;;  %v6306_v28 = vor.u32 %v8070_v45, %v6305_v19  ;;  %v6522_v41 = vor.u32 %v8124_v5, %v6521_v31  ;;  %v6417_v16 = vld [vmem:[%s11835_s1 + $0x610] sm:$0xf]  ;;  %v8096_v31 = vld [vmem:[%s11835_s1 + $0x604] sm:$0xf0] }
 0x123   : > { %v6298_v50 = vor.u32 %v8068_v38, %v6297_v36  ;;  %v6282_v19 = vor.u32 %v8064_v0, %v6281_v63  ;;  %v6497_v45 = vld [vmem:[%s11835_s1 + $0x6b0] sm:$0xf]  ;;  %v6339_v36 = vld [vmem:[%s11835_s1 + $0x578] sm:$0xf0]  ;;  %v8093_v38 = vld [vmem:[%s11835_s1 + $0x5f4] sm:$0xf]  ;;  %v10008_v63 = vpack.c.bf16 %v9603_v53, %v9603_v53 }
 0x124   : > { %2444 = vmatpush.bf16.msra.mxu3 %v6322_v55  ;;  %1954 = vmatpush.bf16.msra.mxu2 %v6150_v60  ;;  %v6425_v55 = vld [vmem:[%s11835_s1 + $0x620] sm:$0xf]  ;;  %v6498_v5 = vor.u32 %v8118_v20, %v6497_v45  ;;  %v6577_v51 = vld [vmem:[%s11835_s1 + $0x750] sm:$0xf]  ;;  %v6387_v53 = vld [vmem:[%s11835_s1 + $0x5d8] sm:$0xf0] }
 0x125   : > { %v6561_v45 = vld [vmem:[%s11835_s1 + $0x730] sm:$0xf]  ;;  %v8134_v20 = vld [vmem:[%s11835_s1 + $0x734] sm:$0xf0]  ;;  %v8132_v40 = vld [vmem:[%s11835_s1 + $0x724] sm:$0xf0] }
 0x126   : > { %2456 = vmatpush.bf16.msrb.mxu0 %v6394_v56  ;;  %2469 = vmatpush.bf16.msrb.mxu1 %v6458_v59  ;;  %v8100_v56 = vld [vmem:[%s11835_s1 + $0x624] sm:$0xf0] }
 0x127   : > { %v8120_v59 = vld [vmem:[%s11835_s1 + $0x6c4] sm:$0xf0]  ;;  %v6426_v7 = vor.u32 %v8100_v56, %v6425_v55  ;;  %v8114_v55 = vld [vmem:[%s11835_s1 + $0x694] sm:$0xf0] }
 0x128   : > { %2445 = vmatpush.bf16.msra.mxu3 %v6314_v15  ;;  %1955 = vmatpush.bf16.msra.mxu2 %v6142_v22  ;;  %v8082_v15 = vld [vmem:[%s11835_s1 + $0x594] sm:$0xf0]  ;;  %v6506_v10 = vor.u32 %v8120_v59, %v6505_v58  ;;  %v6569_v59 = vld [vmem:[%s11835_s1 + $0x740] sm:$0xf] }
 0x129   : > { %v6354_v22 = vor.u32 %v8082_v15, %v6353_v13  ;;  %v6473_v13 = vld [vmem:[%s11835_s1 + $0x680] sm:$0xf]  ;;  %v8112_v15 = vld [vmem:[%s11835_s1 + $0x684] sm:$0xf0] }
 0x12a   : > { %2457 = vmatpush.bf16.msrb.mxu0 %v6386_v18  ;;  %2470 = vmatpush.bf16.msrb.mxu1 %v6450_v21  ;;  %v8098_v18 = vld [vmem:[%s11835_s1 + $0x614] sm:$0xf0]  ;;  %v6594_v21 = vor.u32 %v8142_v11, %v6593_v4  ;;  %v8073_v4 = vld [vmem:[%s11835_s1 + $0x554] sm:$0xf] }
 0x12b   : > { %1956 = vmatmul.bf16.vlgmr.msra.gmra.mxu2 %v9592_v47  ;;  %v8084_v47 = vld [vmem:[%s11835_s1 + $0x5a4] sm:$0xf0]  ;;  %v6418_v26 = vor.u32 %v8098_v18, %v6417_v16  ;;  %v8089_v11 = vld [vmem:[%s11835_s1 + $0x5d4] sm:$0xf]  ;;  %v6467_v18 = vld [vmem:[%s11835_s1 + $0x678] sm:$0xf0] }
 0x12c   : > { %2481 = vmatpush.bf16.msrb.mxu2 %v6530_v25  ;;  %2446 = vmatpush.bf16.msra.mxu3 %v6306_v28  ;;  %v6362_v60 = vor.u32 %v8084_v47, %v6361_v54  ;;  %v6345_v25 = vld [vmem:[%s11835_s1 + $0x580] sm:$0xf]  ;;  %v8091_v54 = vld [vmem:[%s11835_s1 + $0x5e4] sm:$0xf]  ;;  %v6395_v47 = vld [vmem:[%s11835_s1 + $0x5e8] sm:$0xf0] }
 0x12d   : > { %v6409_v28 = vld [vmem:[%s11835_s1 + $0x600] sm:$0xf]  ;;  %v6346_v46 = vor.u32 %v8080_v27, %v6345_v25  ;;  %v6398_v0 = vor.u32 %v8091_v54, %v6395_v47  ;;  %v8109_v16 = vld [vmem:[%s11835_s1 + $0x674] sm:$0xf]  ;;  %v6379_v27 = vld [vmem:[%s11835_s1 + $0x5c8] sm:$0xf0] }
 0x12e   : > { %2458 = vmatpush.bf16.msrb.mxu0 %v6378_v34  ;;  %2471 = vmatpush.bf16.msrb.mxu1 %v6442_v62  ;;  %v8077_v34 = vld [vmem:[%s11835_s1 + $0x574] sm:$0xf]  ;;  %v6403_v62 = vld [vmem:[%s11835_s1 + $0x5f8] sm:$0xf0]  ;;  %v6470_v25 = vor.u32 %v8109_v16, %v6467_v18  ;;  %v6537_v16 = vld [vmem:[%s11835_s1 + $0x700] sm:$0xf] }
 0x12f   : > { %v6342_v49 = vor.u32 %v8077_v34, %v6339_v36  ;;  %v6459_v34 = vld [vmem:[%s11835_s1 + $0x668] sm:$0xf0]  ;;  %v8105_v54 = vld [vmem:[%s11835_s1 + $0x654] sm:$0xf]  ;;  %v8128_v18 = vld [vmem:[%s11835_s1 + $0x704] sm:$0xf0] }
 0x130   : > { %2482 = vmatpush.bf16.msrb.mxu2 %v6522_v41  ;;  %2447 = vmatpush.bf16.msra.mxu3 %v6298_v50  ;;  %v9969_v41 = vpack.c.bf16 %v9567_v37, %v9567_v37  ;;  %v6410_v50 = vor.u32 %v8096_v31, %v6409_v28  ;;  %v6406_v37 = vor.u32 %v8093_v38, %v6403_v62 }
 0x131   : > { %v6562_v31 = vor.u32 %v8134_v20, %v6561_v45  ;;  %v6318_v62 = vor.u32 %v8071_v23, %v6315_v24  ;;  %v6531_v20 = vld [vmem:[%s11835_s1 + $0x6f8] sm:$0xf0]  ;;  %v8081_v24 = vld [vmem:[%s11835_s1 + $0x594] sm:$0xf] }
 0x132   : > { %2459 = vmatpush.bf16.msrb.mxu0 %v6370_v6  ;;  %2472 = vmatpush.bf16.msrb.mxu1 %v6434_v29  ;;  %v8138_v6 = vld [vmem:[%s11835_s1 + $0x754] sm:$0xf0]  ;;  %v6331_v29 = vld [vmem:[%s11835_s1 + $0x568] sm:$0xf0] }
 0x133   : > { %v6578_v56 = vor.u32 %v8138_v6, %v6577_v51  ;;  %v6334_v58 = vor.u32 %v8075_v14, %v6331_v29  ;;  %v10074_v51 = vpack.c.bf16 %v9725_v12, %v9725_v12  ;;  %v6554_v29 = vor.u32 %v8132_v40, %v6553_v39  ;;  %v6451_v12 = vld [vmem:[%s11835_s1 + $0x658] sm:$0xf0]  ;;  %v6283_v39 = vld [vmem:[%s11835_s1 + $0x508] sm:$0xf0]  ;;  %v8079_v40 = vld [vmem:[%s11835_s1 + $0x584] sm:$0xf] }
 0x134   : > { %2483 = vmatpush.bf16.msrb.mxu2 %v6514_v61  ;;  %2448 = vmatpush.bf16.msra.mxu3 %v6290_v57  ;;  %v6481_v61 = vld [vmem:[%s11835_s1 + $0x690] sm:$0xf]  ;;  %v9998_v57 = vpack.c.bf16 %v9584_v43, %v9584_v43 }
 0x135   : > { %v6482_v43 = vor.u32 %v8114_v55, %v6481_v61  ;;  %v6545_v61 = vld [vmem:[%s11835_s1 + $0x710] sm:$0xf]  ;;  %v8130_v55 = vld [vmem:[%s11835_s1 + $0x714] sm:$0xf0] }
 0x136   : > { %2460 = vmatpush.bf16.msrb.mxu0 %v6362_v60  ;;  %2473 = vmatpush.bf16.msrb.mxu1 %v6426_v7  ;;  %v8136_v60 = vld [vmem:[%s11835_s1 + $0x744] sm:$0xf0]  ;;  %v6323_v7 = vld [vmem:[%s11835_s1 + $0x558] sm:$0xf0] }
 0x138   : > { %2484 = vmatpush.bf16.msrb.mxu2 %v6506_v10  ;;  %2449 = vmatpush.bf16.msra.mxu3 %v6282_v19  ;;  %v6570_v10 = vor.u32 %v8136_v60, %v6569_v59  ;;  %v6326_v19 = vor.u32 %v8073_v4, %v6323_v7  ;;  %v6299_v59 = vld [vmem:[%s11835_s1 + $0x528] sm:$0xf0]  ;;  %v6454_v60 = vor.u32 %v8105_v54, %v6451_v12 }
 0x139   : > { %v6546_v7 = vor.u32 %v8130_v55, %v6545_v61  ;;  %v10183_v54 = vpack.c.bf16 %v9775_v48, %v9775_v48  ;;  %v6515_v48 = vld [vmem:[%s11835_s1 + $0x6d8] sm:$0xf0] }
 0x13a   : > { %2461 = vmatpush.bf16.msrb.mxu0 %v6354_v22  ;;  %2474 = vmatpush.bf16.msrb.mxu1 %v6418_v26  ;;  %v6474_v22 = vor.u32 %v8112_v15, %v6473_v13  ;;  %v8087_v26 = vld [vmem:[%s11835_s1 + $0x5c4] sm:$0xf] }
 0x13b   : > { %2450 = vmatmul.bf16.vlgmr.msra.gmra.mxu3 %v9969_v41 }
 0x13c   : > { %2494 = vmatpush.bf16.msrb.mxu3 %v6594_v21  ;;  %2485 = vmatpush.bf16.msrb.mxu2 %v6498_v5  ;;  %v6390_v21 = vor.u32 %v8089_v11, %v6387_v53  ;;  %v8107_v5 = vld [vmem:[%s11835_s1 + $0x664] sm:$0xf]  ;;  %v6443_v53 = vld [vmem:[%s11835_s1 + $0x648] sm:$0xf0] }
 0x13d   : > { %v1310_v28 = vpop.f32.mrf.mxu3  ;;  %v6462_v6 = vor.u32 %v8107_v5, %v6459_v34  ;;  %v8103_v11 = vld [vmem:[%s11835_s1 + $0x644] sm:$0xf] }
 0x13e   : > { %2462 = vmatpush.bf16.msrb.mxu0 %v6346_v46  ;;  %2475 = vmatpush.bf16.msrb.mxu1 %v6410_v50  ;;  %v1323_v36 = vpop.f32.mrf.mxu0  ;;  %v1336_v38 = vpop.f32.mrf.mxu1  ;;  %v6382_v46 = vor.u32 %v8087_v26, %v6379_v27  ;;  %v8069_v50 = vld [vmem:[%s11835_s1 + $0x534] sm:$0xf]  ;;  %v6446_v23 = vor.u32 %v8103_v11, %v6443_v53  ;;  %v6538_v26 = vor.u32 %v8128_v18, %v6537_v16  ;;  %v8123_v34 = vld [vmem:[%s11835_s1 + $0x6e4] sm:$0xf]  ;;  %v6587_v53 = vld [vmem:[%s11835_s1 + $0x768] sm:$0xf0] }
 0x13f   : > { %v8101_v27 = vld [vmem:[%s11835_s1 + $0x634] sm:$0xf]  ;;  %v6419_v18 = vld [vmem:[%s11835_s1 + $0x618] sm:$0xf0] }
 0x140   : > { %2495 = vmatpush.bf16.msrb.mxu3 %v6586_v42  ;;  %2486 = vmatpush.bf16.msrb.mxu2 %v6490_v52  ;;  %v1324_v42 = vadd.f32 %v1323_v36, %v1310_v28  ;;  %v6371_v52 = vld [vmem:[%s11835_s1 + $0x5b8] sm:$0xf0]  ;;  %v6523_v36 = vld [vmem:[%s11835_s1 + $0x6e8] sm:$0xf0]  ;;  %v8097_v16 = vld [vmem:[%s11835_s1 + $0x614] sm:$0xf] }
 0x141   : > { %2463 = vmatmul.bf16.vlgmr.msrb.gmra.mxu0 %v9998_v57  ;;  %2476 = vmatmul.bf16.vlgmr.msrb.gmra.mxu1 %v10008_v63  ;;  %v6435_v28 = vld [vmem:[%s11835_s1 + $0x638] sm:$0xf0]  ;;  %v6526_v61 = vor.u32 %v8123_v34, %v6523_v36 }
 0x142   : > { %2507 = vmatpush.bf16.msra.mxu0 %v6342_v49  ;;  %2520 = vmatpush.bf16.msra.mxu1 %v6406_v37  ;;  %v6307_v49 = vld [vmem:[%s11835_s1 + $0x538] sm:$0xf0]  ;;  %v8085_v37 = vld [vmem:[%s11835_s1 + $0x5b4] sm:$0xf]  ;;  %v10082_v14 = vadd.f32 %v1336_v38, %v1324_v42  ;;  %v8063_v38 = vld [vmem:[%s11835_s1 + $0x504] sm:$0xf] }
 0x143   : > { %v6310_v47 = vor.u32 %v8069_v50, %v6307_v49  ;;  %v6347_v42 = vld [vmem:[%s11835_s1 + $0x588] sm:$0xf0]  ;;  %v8141_v50 = vld [vmem:[%s11835_s1 + $0x774] sm:$0xf]  ;;  %v6595_v49 = vld [vmem:[%s11835_s1 + $0x778] sm:$0xf0]  ;;  %v6286_v55 = vor.u32 %v8063_v38, %v6283_v39 }
 0x144   : > { %2496 = vmatpush.bf16.msrb.mxu3 %v6578_v56  ;;  %2487 = vmatpush.bf16.msrb.mxu2 %v6482_v43  ;;  %v6374_v56 = vor.u32 %v8085_v37, %v6371_v52  ;;  %v6363_v43 = vld [vmem:[%s11835_s1 + $0x5a8] sm:$0xf0]  ;;  %v8158_v37 = vld [vmem:[%s11836_s2 + $0x74] sm:$0xf0]  ;;  %v8099_v52 = vld [vmem:[%s11835_s1 + $0x624] sm:$0xf] }
 0x145   : > { %v1312_v4 = vpop.f32.mrf.mxu3  ;;  %v8174_v38 = vld [vmem:[%s11836_s2 + $0xf4] sm:$0xf0] }
 0x146   : > { %2508 = vmatpush.bf16.msra.mxu0 %v6334_v58  ;;  %2521 = vmatpush.bf16.msra.mxu1 %v6398_v0  ;;  %v8067_v58 = vld [vmem:[%s11835_s1 + $0x524] sm:$0xf]  ;;  %v1325_v13 = vpop.f32.mrf.mxu0  ;;  %v1338_v15 = vpop.f32.mrf.mxu1 }
 0x147   : > { %v8083_v0 = vld [vmem:[%s11835_s1 + $0x5a4] sm:$0xf]  ;;  %v6650_v13 = vld [vmem:[%s11836_s2 + $0x60] sm:$0xf] }
 0x148   : > { %2497 = vmatpush.bf16.msrb.mxu3 %v6570_v10  ;;  %2488 = vmatpush.bf16.msrb.mxu2 %v6474_v22  ;;  %v6302_v10 = vor.u32 %v8067_v58, %v6299_v59  ;;  %v6366_v45 = vor.u32 %v8083_v0, %v6363_v43  ;;  %v6291_v22 = vld [vmem:[%s11835_s1 + $0x518] sm:$0xf0]  ;;  %v6598_v0 = vor.u32 %v8141_v50, %v6595_v49  ;;  %v8121_v43 = vld [vmem:[%s11835_s1 + $0x6d4] sm:$0xf]  ;;  %v8135_v49 = vld [vmem:[%s11835_s1 + $0x744] sm:$0xf] }
 0x14a   : > { %2509 = vmatpush.bf16.msra.mxu0 %v6326_v19  ;;  %2522 = vmatpush.bf16.msra.mxu1 %v6390_v21  ;;  %v8125_v19 = vld [vmem:[%s11835_s1 + $0x6f4] sm:$0xf] }
 0x14b   : > { %2489 = vmatmul.bf16.vlgmr.msrb.gmra.mxu2 %v10074_v51  ;;  %v8065_v21 = vld [vmem:[%s11835_s1 + $0x514] sm:$0xf] }
 0x14c   : > { %2533 = vmatpush.bf16.msra.mxu2 %v6470_v25  ;;  %2498 = vmatpush.bf16.msrb.mxu3 %v6562_v31  ;;  %v6355_v25 = vld [vmem:[%s11835_s1 + $0x598] sm:$0xf0]  ;;  %v6534_v31 = vor.u32 %v8125_v19, %v6531_v20  ;;  %v6294_v5 = vor.u32 %v8065_v21, %v6291_v22  ;;  %v6518_v19 = vor.u32 %v8121_v43, %v6515_v48  ;;  %v8119_v20 = vld [vmem:[%s11835_s1 + $0x6c4] sm:$0xf]  ;;  %v6507_v21 = vld [vmem:[%s11835_s1 + $0x6c8] sm:$0xf0] }
 0x14d   : > { %v6510_v36 = vor.u32 %v8119_v20, %v6507_v21  ;;  %v6626_v48 = vld [vmem:[%s11836_s2 + $0x30] sm:$0xf]  ;;  %v8113_v20 = vld [vmem:[%s11835_s1 + $0x694] sm:$0xf]  ;;  %v6483_v21 = vld [vmem:[%s11835_s1 + $0x698] sm:$0xf0] }
 0x14e   : > { %2510 = vmatpush.bf16.msra.mxu0 %v6318_v62  ;;  %2523 = vmatpush.bf16.msra.mxu1 %v6382_v46  ;;  %v6358_v62 = vor.u32 %v8081_v24, %v6355_v25  ;;  %v6438_v46 = vor.u32 %v8101_v27, %v6435_v28  ;;  %v1349_v12 = vpop.f32.mrf.mxu2  ;;  %v1375_v58 = vpop.f32.mrf.mxu0  ;;  %v8137_v24 = vld [vmem:[%s11835_s1 + $0x754] sm:$0xf]  ;;  %v6579_v25 = vld [vmem:[%s11835_s1 + $0x758] sm:$0xf0]  ;;  %v8154_v27 = vld [vmem:[%s11836_s2 + $0x54] sm:$0xf0] }
 0x14f   : > { %v1388_v59 = vpop.f32.mrf.mxu1  ;;  %v8095_v28 = vld [vmem:[%s11835_s1 + $0x604] sm:$0xf] }
 0x150   : > { %2534 = vmatpush.bf16.msra.mxu2 %v6462_v6  ;;  %2499 = vmatpush.bf16.msrb.mxu3 %v6554_v29  ;;  %v6658_v6 = vld [vmem:[%s11836_s2 + $0x70] sm:$0xf]  ;;  %v6427_v29 = vld [vmem:[%s11835_s1 + $0x628] sm:$0xf0]  ;;  %v10192_v4 = vadd.f32 %v1388_v59, %v1375_v58 }
 0x151   : > { %v6430_v11 = vor.u32 %v8099_v52, %v6427_v29  ;;  %v6634_v52 = vld [vmem:[%s11836_s2 + $0x40] sm:$0xf]  ;;  %v8152_v29 = vld [vmem:[%s11836_s2 + $0x44] sm:$0xf0]  ;;  %v6491_v58 = vld [vmem:[%s11835_s1 + $0x6a8] sm:$0xf0] }
 0x152   : > { %2511 = vmatpush.bf16.msra.mxu0 %v6310_v47  ;;  %2524 = vmatpush.bf16.msra.mxu1 %v6374_v56  ;;  %v1362_v47 = vpop.f32.mrf.mxu3  ;;  %v1350_v56 = vadd.f32 %v1349_v12, %v10082_v14  ;;  %v8139_v14 = vld [vmem:[%s11835_s1 + $0x764] sm:$0xf]  ;;  %v6635_v59 = vor.u32 %v8152_v29, %v6634_v52  ;;  %v6690_v52 = vld [vmem:[%s11836_s2 + $0xb0] sm:$0xf]  ;;  %v8166_v29 = vld [vmem:[%s11836_s2 + $0xb4] sm:$0xf0] }
 0x154   : > { %2535 = vmatpush.bf16.msra.mxu2 %v6454_v60  ;;  %2500 = vmatpush.bf16.msrb.mxu3 %v6546_v7  ;;  %v6350_v60 = vor.u32 %v8079_v40, %v6347_v42  ;;  %v6659_v7 = vor.u32 %v8158_v37, %v6658_v6  ;;  %v10204_v15 = vadd.f32 %v1362_v47, %v1350_v56  ;;  %v6499_v42 = vld [vmem:[%s11835_s1 + $0x6b8] sm:$0xf0]  ;;  %v6571_v6 = vld [vmem:[%s11835_s1 + $0x748] sm:$0xf0]  ;;  %v6714_v47 = vld [vmem:[%s11836_s2 + $0xe0] sm:$0xf] }
 0x155   : > { %v6582_v40 = vor.u32 %v8137_v24, %v6579_v25  ;;  %v8115_v56 = vld [vmem:[%s11835_s1 + $0x6a4] sm:$0xf] }
 0x156   : > { %2512 = vmatpush.bf16.msra.mxu0 %v6302_v10  ;;  %2525 = vmatpush.bf16.msra.mxu1 %v6366_v45  ;;  %v8156_v10 = vld [vmem:[%s11836_s2 + $0x64] sm:$0xf0]  ;;  %v6590_v45 = vor.u32 %v8139_v14, %v6587_v53  ;;  %v6494_v53 = vor.u32 %v8115_v56, %v6491_v58  ;;  %v6778_v56 = vld [vmem:[%s11836_s2 + $0x160] sm:$0xf] }
 0x157   : > { %v6651_v22 = vor.u32 %v8156_v10, %v6650_v13  ;;  %v1390_v39 = vpop.f32.mrf.mxu1  ;;  %v6706_v13 = vld [vmem:[%s11836_s2 + $0xd0] sm:$0xf]  ;;  %v8170_v10 = vld [vmem:[%s11836_s2 + $0xd4] sm:$0xf0]  ;;  %v8188_v58 = vld [vmem:[%s11836_s2 + $0x164] sm:$0xf0] }
 0x158   : > { %2536 = vmatpush.bf16.msra.mxu2 %v6446_v23  ;;  %2501 = vmatpush.bf16.msrb.mxu3 %v6538_v26  ;;  %v6422_v23 = vor.u32 %v8097_v16, %v6419_v18  ;;  %v6642_v26 = vld [vmem:[%s11836_s2 + $0x50] sm:$0xf]  ;;  %v6707_v25 = vor.u32 %v8170_v10, %v6706_v13  ;;  %v8190_v39 = vld [vmem:[%s11836_s2 + $0x174] sm:$0xf0]  ;;  %v6682_v10 = vld [vmem:[%s11836_s2 + $0xa0] sm:$0xf] }
 0x159   : > { %v8222_v13 = vld [vmem:[%s11836_s2 + $0x274] sm:$0xf0] }
 0x15a   : > { %2513 = vmatpush.bf16.msra.mxu0 %v6294_v5  ;;  %2526 = vmatpush.bf16.msra.mxu1 %v6358_v62  ;;  %v1351_v5 = vpop.f32.mrf.mxu2  ;;  %v1364_v34 = vpop.f32.mrf.mxu3 }
 0x15b   : > { %2502 = vmatmul.bf16.vlgmr.msrb.gmra.mxu3 %v10183_v54  ;;  %v1377_v62 = vpop.f32.mrf.mxu0 }
 0x15c   : > { %2546 = vmatpush.bf16.msra.mxu3 %v6534_v31  ;;  %2537 = vmatpush.bf16.msra.mxu2 %v6438_v46  ;;  %v6411_v31 = vld [vmem:[%s11835_s1 + $0x608] sm:$0xf0]  ;;  %v6643_v46 = vor.u32 %v8154_v27, %v6642_v26  ;;  %v6618_v26 = vld [vmem:[%s11836_s2 + $0x20] sm:$0xf]  ;;  %v6486_v27 = vor.u32 %v8113_v20, %v6483_v21  ;;  %v6770_v21 = vld [vmem:[%s11836_s2 + $0x150] sm:$0xf] }
 0x15d   : > { %v6414_v50 = vor.u32 %v8095_v28, %v6411_v31  ;;  %v6698_v28 = vld [vmem:[%s11836_s2 + $0xc0] sm:$0xf]  ;;  %v8168_v31 = vld [vmem:[%s11836_s2 + $0xc4] sm:$0xf0] }
 0x15e   : > { %2514 = vmatpush.bf16.msra.mxu0 %v6286_v55  ;;  %2527 = vmatpush.bf16.msra.mxu1 %v6350_v60  ;;  %v6574_v55 = vor.u32 %v8135_v49, %v6571_v6  ;;  %v8133_v60 = vld [vmem:[%s11835_s1 + $0x734] sm:$0xf] }
 0x160   : > { %2547 = vmatpush.bf16.msra.mxu3 %v6526_v61  ;;  %2538 = vmatpush.bf16.msra.mxu2 %v6430_v11  ;;  %v8172_v61 = vld [vmem:[%s11836_s2 + $0xe4] sm:$0xf0] }
 0x161   : > { %2515 = vmatmul.bf16.vlgmr.msra.gmra.mxu0 %v9969_v41  ;;  %2528 = vmatmul.bf16.vlgmr.msra.gmra.mxu1 %v9998_v57  ;;  %v6722_v41 = vld [vmem:[%s11836_s2 + $0xf0] sm:$0xf]  ;;  %v8117_v57 = vld [vmem:[%s11835_s1 + $0x6b4] sm:$0xf]  ;;  %v6715_v43 = vor.u32 %v8172_v61, %v6714_v47 }
 0x162   : > { %2559 = vmatpush.bf16.msrb.mxu0 %v6598_v0  ;;  %3073 = vmatpush.bf16.msrb.mxu1 %v6659_v7  ;;  %v6723_v37 = vor.u32 %v8174_v38, %v6722_v41  ;;  %v6502_v12 = vor.u32 %v8117_v57, %v6499_v42  ;;  %v6563_v0 = vld [vmem:[%s11835_s1 + $0x738] sm:$0xf0]  ;;  %v8150_v7 = vld [vmem:[%s11836_s2 + $0x34] sm:$0xf0]  ;;  %v1401_v11 = vpop.f32.mrf.mxu2  ;;  %v1414_v14 = vpop.f32.mrf.mxu3  ;;  %v6475_v41 = vld [vmem:[%s11835_s1 + $0x688] sm:$0xf0]  ;;  %v6699_v42 = vor.u32 %v8168_v31, %v6698_v28 }
 0x163   : > { %v1402_v16 = vadd.f32 %v1401_v11, %v10192_v4  ;;  %v1427_v18 = vpop.f32.mrf.mxu0  ;;  %v8131_v4 = vld [vmem:[%s11835_s1 + $0x724] sm:$0xf]  ;;  %v6786_v38 = vld [vmem:[%s11836_s2 + $0x170] sm:$0xf]  ;;  %v6547_v57 = vld [vmem:[%s11835_s1 + $0x718] sm:$0xf0] }
 0x164   : > { %2548 = vmatpush.bf16.msra.mxu3 %v6518_v19  ;;  %2539 = vmatpush.bf16.msra.mxu2 %v6422_v23  ;;  %v1840_v19 = vpop.f32.mrf.mxu1  ;;  %v6627_v23 = vor.u32 %v8150_v7, %v6626_v48  ;;  %v6787_v61 = vor.u32 %v8190_v39, %v6786_v38  ;;  %v8144_v48 = vld [vmem:[%s11836_s2 + $0x4] sm:$0xf0]  ;;  %v6691_v7 = vor.u32 %v8166_v29, %v6690_v52  ;;  %v6850_v11 = vld [vmem:[%s11836_s2 + $0x1f0] sm:$0xf]  ;;  %v8182_v29 = vld [vmem:[%s11836_s2 + $0x134] sm:$0xf0] }
 0x165   : > { %v1415_v24 = vadd.f32 %v1414_v14, %v1402_v16  ;;  %v8206_v14 = vld [vmem:[%s11836_s2 + $0x1f4] sm:$0xf0]  ;;  %v8164_v16 = vld [vmem:[%s11836_s2 + $0xa4] sm:$0xf0]  ;;  %v6754_v52 = vld [vmem:[%s11836_s2 + $0x130] sm:$0xf] }
 0x166   : > { %2560 = vmatpush.bf16.msrb.mxu0 %v6590_v45  ;;  %3074 = vmatpush.bf16.msrb.mxu1 %v6651_v22  ;;  %v6566_v45 = vor.u32 %v8133_v60, %v6563_v0  ;;  %v10304_v22 = vadd.f32 %v1840_v19, %v10204_v15  ;;  %v8148_v15 = vld [vmem:[%s11836_s2 + $0x24] sm:$0xf0]  ;;  %v6539_v0 = vld [vmem:[%s11835_s1 + $0x708] sm:$0xf0]  ;;  %v6851_v20 = vor.u32 %v8206_v14, %v6850_v11  ;;  %v6746_v11 = vld [vmem:[%s11836_s2 + $0x120] sm:$0xf] }
 0x167   : > { %v10324_v5 = vadd.f32 %v1427_v18, %v1415_v24  ;;  %v6619_v62 = vor.u32 %v8148_v15, %v6618_v26  ;;  %v6779_v18 = vor.u32 %v8188_v58, %v6778_v56  ;;  %v6842_v24 = vld [vmem:[%s11836_s2 + $0x1e0] sm:$0xf]  ;;  %v8220_v15 = vld [vmem:[%s11836_s2 + $0x264] sm:$0xf0] }
 0x168   : > { %2549 = vmatpush.bf16.msra.mxu3 %v6510_v36  ;;  %2540 = vmatpush.bf16.msra.mxu2 %v6414_v50  ;;  %v8111_v36 = vld [vmem:[%s11835_s1 + $0x684] sm:$0xf]  ;;  %v8146_v50 = vld [vmem:[%s11836_s2 + $0x14] sm:$0xf0]  ;;  %v6906_v26 = vld [vmem:[%s11836_s2 + $0x260] sm:$0xf] }
 0x169   : > { %v8184_v38 = vld [vmem:[%s11836_s2 + $0x144] sm:$0xf0]  ;;  %v6890_v58 = vld [vmem:[%s11836_s2 + $0x240] sm:$0xf] }
 0x16a   : > { %2561 = vmatpush.bf16.msrb.mxu0 %v6582_v40  ;;  %3075 = vmatpush.bf16.msrb.mxu1 %v6643_v46  ;;  %v8129_v40 = vld [vmem:[%s11835_s1 + $0x714] sm:$0xf]  ;;  %v6610_v46 = vld [vmem:[%s11836_s2 + $0x10] sm:$0xf]  ;;  %v1403_v49 = vpop.f32.mrf.mxu2  ;;  %v1416_v6 = vpop.f32.mrf.mxu3  ;;  %v8180_v14 = vld [vmem:[%s11836_s2 + $0x124] sm:$0xf0] }
 0x16b   : > { %2541 = vmatmul.bf16.vlgmr.msra.gmra.mxu2 %v10008_v63  ;;  %v6555_v63 = vld [vmem:[%s11835_s1 + $0x728] sm:$0xf0]  ;;  %v6611_v60 = vor.u32 %v8146_v50, %v6610_v46  ;;  %v6666_v46 = vld [vmem:[%s11836_s2 + $0x80] sm:$0xf]  ;;  %v8160_v50 = vld [vmem:[%s11836_s2 + $0x84] sm:$0xf0] }
 0x16c   : > { %3086 = vmatpush.bf16.msrb.mxu2 %v6723_v37  ;;  %2550 = vmatpush.bf16.msra.mxu3 %v6502_v12  ;;  %v6558_v34 = vor.u32 %v8131_v4, %v6555_v63  ;;  %v6478_v37 = vor.u32 %v8111_v36, %v6475_v41  ;;  %v1429_v12 = vpop.f32.mrf.mxu0  ;;  %v1842_v47 = vpop.f32.mrf.mxu1  ;;  %v6683_v63 = vor.u32 %v8164_v16, %v6682_v10  ;;  %v6762_v41 = vld [vmem:[%s11836_s2 + $0x140] sm:$0xf]  ;;  %v6660_v6 = vld [vmem:[%s11836_s2 + $0x78] sm:$0xf0]  ;;  %v8198_v10 = vld [vmem:[%s11836_s2 + $0x1b4] sm:$0xf0] }
 0x16d   : > { %v6763_v49 = vor.u32 %v8184_v38, %v6762_v41  ;;  %v6667_v47 = vor.u32 %v8160_v50, %v6666_v46  ;;  %v8212_v41 = vld [vmem:[%s11836_s2 + $0x224] sm:$0xf0]  ;;  %v8173_v46 = vld [vmem:[%s11836_s2 + $0xf4] sm:$0xf] }
 0x16e   : > { %2562 = vmatpush.bf16.msrb.mxu0 %v6574_v55  ;;  %3076 = vmatpush.bf16.msrb.mxu1 %v6635_v59  ;;  %v6550_v55 = vor.u32 %v8129_v40, %v6547_v57  ;;  %v8127_v59 = vld [vmem:[%s11835_s1 + $0x704] sm:$0xf]  ;;  %v6834_v40 = vld [vmem:[%s11836_s2 + $0x1d0] sm:$0xf] }
 0x16f   : > { %v6542_v19 = vor.u32 %v8127_v59, %v6539_v0  ;;  %v6898_v57 = vld [vmem:[%s11836_s2 + $0x250] sm:$0xf]  ;;  %v8216_v59 = vld [vmem:[%s11836_s2 + $0x244] sm:$0xf0]  ;;  %v6755_v0 = vor.u32 %v8182_v29, %v6754_v52  ;;  %v8210_v29 = vld [vmem:[%s11836_s2 + $0x214] sm:$0xf0] }
 0x170   : > { %3087 = vmatpush.bf16.msrb.mxu2 %v6715_v43  ;;  %2551 = vmatpush.bf16.msra.mxu3 %v6494_v53  ;;  %v6602_v43 = vld [vmem:[%s11836_s2] sm:$0xf]  ;;  %v6914_v53 = vld [vmem:[%s11836_s2 + $0x270] sm:$0xf] }
 0x171   : > { %v6915_v4 = vor.u32 %v8222_v13, %v6914_v53  ;;  %v6891_v53 = vor.u32 %v8216_v59, %v6890_v58  ;;  %v6818_v13 = vld [vmem:[%s11836_s2 + $0x1b0] sm:$0xf] }
 0x172   : > { %2563 = vmatpush.bf16.msrb.mxu0 %v6566_v45  ;;  %3077 = vmatpush.bf16.msrb.mxu1 %v6627_v23  ;;  %v6603_v45 = vor.u32 %v8144_v48, %v6602_v43  ;;  %v8186_v23 = vld [vmem:[%s11836_s2 + $0x154] sm:$0xf0]  ;;  %v1853_v28 = vpop.f32.mrf.mxu2  ;;  %v8155_v43 = vld [vmem:[%s11836_s2 + $0x64] sm:$0xf]  ;;  %v6652_v48 = vld [vmem:[%s11836_s2 + $0x68] sm:$0xf0] }
 0x173   : > { %v6771_v31 = vor.u32 %v8186_v23, %v6770_v21  ;;  %v6655_v16 = vor.u32 %v8155_v43, %v6652_v48  ;;  %v6747_v21 = vor.u32 %v8180_v14, %v6746_v11  ;;  %v8153_v23 = vld [vmem:[%s11836_s2 + $0x54] sm:$0xf]  ;;  %v6866_v52 = vld [vmem:[%s11836_s2 + $0x210] sm:$0xf]  ;;  %v6716_v43 = vld [vmem:[%s11836_s2 + $0xe8] sm:$0xf0] }
 0x174   : > { %3088 = vmatpush.bf16.msrb.mxu2 %v6707_v25  ;;  %2552 = vmatpush.bf16.msra.mxu3 %v6486_v27  ;;  %v8204_v25 = vld [vmem:[%s11836_s2 + $0x1e4] sm:$0xf0]  ;;  %v8162_v27 = vld [vmem:[%s11836_s2 + $0x94] sm:$0xf0]  ;;  %v6794_v48 = vld [vmem:[%s11836_s2 + $0x180] sm:$0xf] }
 0x175   : > { %v6843_v36 = vor.u32 %v8204_v25, %v6842_v24  ;;  %v6819_v25 = vor.u32 %v8198_v10, %v6818_v13  ;;  %v8192_v11 = vld [vmem:[%s11836_s2 + $0x184] sm:$0xf0]  ;;  %v6858_v14 = vld [vmem:[%s11836_s2 + $0x200] sm:$0xf]  ;;  %v8189_v10 = vld [vmem:[%s11836_s2 + $0x174] sm:$0xf] }
 0x176   : > { %2564 = vmatpush.bf16.msrb.mxu0 %v6558_v34  ;;  %3078 = vmatpush.bf16.msrb.mxu1 %v6619_v62  ;;  %v1854_v34 = vadd.f32 %v1853_v28, %v10304_v22  ;;  %v6907_v62 = vor.u32 %v8220_v15, %v6906_v26  ;;  %v8202_v22 = vld [vmem:[%s11836_s2 + $0x1d4] sm:$0xf0]  ;;  %v6738_v26 = vld [vmem:[%s11836_s2 + $0x110] sm:$0xf]  ;;  %v8196_v28 = vld [vmem:[%s11836_s2 + $0x1a4] sm:$0xf0] }
 0x177   : > { %v8178_v15 = vld [vmem:[%s11836_s2 + $0x114] sm:$0xf0] }
 0x178   : > { %3089 = vmatpush.bf16.msrb.mxu2 %v6699_v42  ;;  %2553 = vmatpush.bf16.msra.mxu3 %v6478_v37  ;;  %v8218_v42 = vld [vmem:[%s11836_s2 + $0x254] sm:$0xf0]  ;;  %v6835_v37 = vor.u32 %v8202_v22, %v6834_v40  ;;  %v6739_v38 = vor.u32 %v8178_v15, %v6738_v26 }
 0x179   : > { %v6899_v12 = vor.u32 %v8218_v42, %v6898_v57  ;;  %v6730_v57 = vld [vmem:[%s11836_s2 + $0x100] sm:$0xf]  ;;  %v8176_v42 = vld [vmem:[%s11836_s2 + $0x104] sm:$0xf0] }
 0x17a   : > { %2565 = vmatpush.bf16.msrb.mxu0 %v6550_v55  ;;  %3079 = vmatpush.bf16.msrb.mxu1 %v6611_v60  ;;  %v8200_v55 = vld [vmem:[%s11836_s2 + $0x1c4] sm:$0xf0]  ;;  %v1855_v60 = vpop.f32.mrf.mxu2 }
 0x17b   : > { %2554 = vmatmul.bf16.vlgmr.msra.gmra.mxu3 %v10074_v51  ;;  %v6674_v51 = vld [vmem:[%s11836_s2 + $0x90] sm:$0xf] }
 0x17c   : > { %3099 = vmatpush.bf16.msrb.mxu3 %v6787_v61  ;;  %3090 = vmatpush.bf16.msrb.mxu2 %v6691_v7  ;;  %v6675_v39 = vor.u32 %v8162_v27, %v6674_v51  ;;  %v6826_v61 = vld [vmem:[%s11836_s2 + $0x1c0] sm:$0xf] }
 0x17d   : > { %v6827_v7 = vor.u32 %v8200_v55, %v6826_v61  ;;  %v6810_v27 = vld [vmem:[%s11836_s2 + $0x1a0] sm:$0xf]  ;;  %v6731_v61 = vor.u32 %v8176_v42, %v6730_v57  ;;  %v8149_v55 = vld [vmem:[%s11836_s2 + $0x34] sm:$0xf]  ;;  %v6700_v57 = vld [vmem:[%s11836_s2 + $0xc8] sm:$0xf0] }
 0x17e   : > { %2566 = vmatpush.bf16.msrb.mxu0 %v6542_v19  ;;  %3080 = vmatpush.bf16.msrb.mxu1 %v6603_v45  ;;  %v8214_v19 = vld [vmem:[%s11836_s2 + $0x234] sm:$0xf0]  ;;  %v1866_v45 = vpop.f32.mrf.mxu3  ;;  %v1892_v24 = vpop.f32.mrf.mxu1  ;;  %v6811_v22 = vor.u32 %v8196_v28, %v6810_v27  ;;  %v6780_v27 = vld [vmem:[%s11836_s2 + $0x168] sm:$0xf0]  ;;  %v8203_v28 = vld [vmem:[%s11836_s2 + $0x1e4] sm:$0xf] }
 0x180   : > { %3100 = vmatpush.bf16.msrb.mxu3 %v6779_v18  ;;  %3091 = vmatpush.bf16.msrb.mxu2 %v6683_v63  ;;  %v6882_v18 = vld [vmem:[%s11836_s2 + $0x230] sm:$0xf]  ;;  %v1867_v63 = vadd.f32 %v1866_v45, %v1854_v34  ;;  %v8147_v45 = vld [vmem:[%s11836_s2 + $0x24] sm:$0xf] }
 0x181   : > { %2567 = vmatmul.bf16.vlgmr.msrb.gmra.mxu0 %v10183_v54  ;;  %3081 = vmatmul.bf16.vlgmr.msrb.gmra.mxu1 %v9133_v17  ;;  %v8157_v54 = vld [vmem:[%s11836_s2 + $0x74] sm:$0xf]  ;;  %v6883_v51 = vor.u32 %v8214_v19, %v6882_v18  ;;  %v6852_v19 = vld [vmem:[%s11836_s2 + $0x1f8] sm:$0xf0] }
 0x182   : > { %3112 = vmatpush.bf16.msra.mxu0 %v6851_v20  ;;  %3125 = vmatpush.bf16.msra.mxu1 %v6915_v4  ;;  %v6663_v56 = vor.u32 %v8157_v54, %v6660_v6  ;;  %v1879_v20 = vpop.f32.mrf.mxu0  ;;  %v6644_v4 = vld [vmem:[%s11836_s2 + $0x58] sm:$0xf0]  ;;  %v6802_v54 = vld [vmem:[%s11836_s2 + $0x190] sm:$0xf]  ;;  %v8194_v6 = vld [vmem:[%s11836_s2 + $0x194] sm:$0xf0] }
 0x183   : > { %v6647_v34 = vor.u32 %v8153_v23, %v6644_v4  ;;  %v6803_v60 = vor.u32 %v8194_v6, %v6802_v54  ;;  %v8205_v18 = vld [vmem:[%s11836_s2 + $0x1f4] sm:$0xf]  ;;  %v6795_v23 = vor.u32 %v8192_v11, %v6794_v48  ;;  %v6836_v54 = vld [vmem:[%s11836_s2 + $0x1d8] sm:$0xf0]  ;;  %v8143_v6 = vld [vmem:[%s11836_s2 + $0x4] sm:$0xf] }
 0x184   : > { %3101 = vmatpush.bf16.msrb.mxu3 %v6771_v31  ;;  %3092 = vmatpush.bf16.msrb.mxu2 %v6675_v39  ;;  %v1880_v31 = vadd.f32 %v1879_v20, %v1867_v63  ;;  %v6636_v39 = vld [vmem:[%s11836_s2 + $0x48] sm:$0xf0]  ;;  %v6855_v26 = vor.u32 %v8205_v18, %v6852_v19  ;;  %v8199_v48 = vld [vmem:[%s11836_s2 + $0x1c4] sm:$0xf]  ;;  %v8181_v19 = vld [vmem:[%s11836_s2 + $0x134] sm:$0xf] }
 0x185   : > { %v6620_v20 = vld [vmem:[%s11836_s2 + $0x28] sm:$0xf0] }
 0x186   : > { %3113 = vmatpush.bf16.msra.mxu0 %v6843_v36  ;;  %3126 = vmatpush.bf16.msra.mxu1 %v6907_v62  ;;  %v6874_v36 = vld [vmem:[%s11836_s2 + $0x220] sm:$0xf]  ;;  %v8151_v62 = vld [vmem:[%s11836_s2 + $0x44] sm:$0xf]  ;;  %v10523_v40 = vadd.f32 %v1892_v24, %v1880_v31  ;;  %v1894_v58 = vpop.f32.mrf.mxu1  ;;  %v8169_v24 = vld [vmem:[%s11836_s2 + $0xd4] sm:$0xf]  ;;  %v6623_v15 = vor.u32 %v8147_v45, %v6620_v20 }
 0x187   : > { %v6875_v50 = vor.u32 %v8212_v41, %v6874_v36  ;;  %v8145_v36 = vld [vmem:[%s11836_s2 + $0x14] sm:$0xf]  ;;  %v6612_v41 = vld [vmem:[%s11836_s2 + $0x18] sm:$0xf0] }
 0x188   : > { %3102 = vmatpush.bf16.msrb.mxu3 %v6763_v49  ;;  %3093 = vmatpush.bf16.msrb.mxu2 %v6667_v47  ;;  %v6724_v49 = vld [vmem:[%s11836_s2 + $0xf8] sm:$0xf0] }
 0x189   : > { %v6727_v59 = vor.u32 %v8173_v46, %v6724_v49  ;;  %v6615_v46 = vor.u32 %v8145_v36, %v6612_v41  ;;  %v8201_v49 = vld [vmem:[%s11836_s2 + $0x1d4] sm:$0xf]  ;;  %v6756_v45 = vld [vmem:[%s11836_s2 + $0x138] sm:$0xf0]  ;;  %v8179_v36 = vld [vmem:[%s11836_s2 + $0x124] sm:$0xf] }
 0x18a   : > { %3114 = vmatpush.bf16.msra.mxu0 %v6835_v37  ;;  %3127 = vmatpush.bf16.msra.mxu1 %v6899_v12  ;;  %v6639_v37 = vor.u32 %v8151_v62, %v6636_v39  ;;  %v1868_v12 = vpop.f32.mrf.mxu3  ;;  %v1881_v47 = vpop.f32.mrf.mxu0 }
 0x18b   : > { %3094 = vmatmul.bf16.vlgmr.msrb.gmra.mxu2 %v9163_v32  ;;  %v6916_v12 = vld [vmem:[%s11836_s2 + $0x278] sm:$0xf0] }
 0x18c   : > { %3138 = vmatpush.bf16.msra.mxu2 %v6663_v56  ;;  %3103 = vmatpush.bf16.msrb.mxu3 %v6755_v0  ;;  %v6628_v56 = vld [vmem:[%s11836_s2 + $0x38] sm:$0xf0]  ;;  %v8171_v0 = vld [vmem:[%s11836_s2 + $0xe4] sm:$0xf] }
 0x18d   : > { %v6631_v13 = vor.u32 %v8149_v55, %v6628_v56  ;;  %v6692_v55 = vld [vmem:[%s11836_s2 + $0xb8] sm:$0xf0]  ;;  %v6839_v56 = vor.u32 %v8201_v49, %v6836_v54 }
 0x18e   : > { %3115 = vmatpush.bf16.msra.mxu0 %v6827_v7  ;;  %3128 = vmatpush.bf16.msra.mxu1 %v6891_v53  ;;  %v6867_v7 = vor.u32 %v8210_v29, %v6866_v52  ;;  %v8208_v53 = vld [vmem:[%s11836_s2 + $0x204] sm:$0xf0]  ;;  %v1905_v31 = vpop.f32.mrf.mxu2  ;;  %v8221_v29 = vld [vmem:[%s11836_s2 + $0x274] sm:$0xf] }
 0x18f   : > { %v6859_v4 = vor.u32 %v8208_v53, %v6858_v14  ;;  %v8219_v14 = vld [vmem:[%s11836_s2 + $0x264] sm:$0xf]  ;;  %v6908_v53 = vld [vmem:[%s11836_s2 + $0x268] sm:$0xf0] }
 0x190   : > { %3139 = vmatpush.bf16.msra.mxu2 %v6655_v16  ;;  %3104 = vmatpush.bf16.msrb.mxu3 %v6747_v21  ;;  %v6788_v16 = vld [vmem:[%s11836_s2 + $0x178] sm:$0xf0]  ;;  %v6719_v21 = vor.u32 %v8171_v0, %v6716_v43  ;;  %v6919_v43 = vor.u32 %v8221_v29, %v6916_v12  ;;  %v6911_v20 = vor.u32 %v8219_v14, %v6908_v53  ;;  %v8193_v29 = vld [vmem:[%s11836_s2 + $0x194] sm:$0xf]  ;;  %v6796_v14 = vld [vmem:[%s11836_s2 + $0x188] sm:$0xf0] }
 0x191   : > { %v6791_v63 = vor.u32 %v8189_v10, %v6788_v16  ;;  %v8163_v10 = vld [vmem:[%s11836_s2 + $0xa4] sm:$0xf]  ;;  %v6684_v16 = vld [vmem:[%s11836_s2 + $0xa8] sm:$0xf0]  ;;  %v6804_v12 = vld [vmem:[%s11836_s2 + $0x198] sm:$0xf0] }
 0x192   : > { %3116 = vmatpush.bf16.msra.mxu0 %v6819_v25  ;;  %3129 = vmatpush.bf16.msra.mxu1 %v6883_v51  ;;  %v6708_v25 = vld [vmem:[%s11836_s2 + $0xd8] sm:$0xf0]  ;;  %v8187_v51 = vld [vmem:[%s11836_s2 + $0x164] sm:$0xf] }
 0x193   : > { %v6711_v62 = vor.u32 %v8169_v24, %v6708_v25  ;;  %v6783_v39 = vor.u32 %v8187_v51, %v6780_v27  ;;  %v8217_v24 = vld [vmem:[%s11836_s2 + $0x254] sm:$0xf]  ;;  %v6900_v25 = vld [vmem:[%s11836_s2 + $0x258] sm:$0xf0]  ;;  %v6759_v51 = vor.u32 %v8181_v19, %v6756_v45  ;;  %v8211_v53 = vld [vmem:[%s11836_s2 + $0x224] sm:$0xf] }
 0x194   : > { %3140 = vmatpush.bf16.msra.mxu2 %v6647_v34  ;;  %3105 = vmatpush.bf16.msrb.mxu3 %v6739_v38  ;;  %v6844_v34 = vld [vmem:[%s11836_s2 + $0x1e8] sm:$0xf0]  ;;  %v10617_v38 = vadd.f32 %v1905_v31, %v10324_v5  ;;  %v8185_v5 = vld [vmem:[%s11836_s2 + $0x154] sm:$0xf]  ;;  %v6903_v41 = vor.u32 %v8217_v24, %v6900_v25 }
 0x195   : > { %v6847_v42 = vor.u32 %v8203_v28, %v6844_v34  ;;  %v8161_v27 = vld [vmem:[%s11836_s2 + $0x94] sm:$0xf]  ;;  %v6676_v28 = vld [vmem:[%s11836_s2 + $0x98] sm:$0xf0] }
 0x196   : > { %3117 = vmatpush.bf16.msra.mxu0 %v6811_v22  ;;  %3130 = vmatpush.bf16.msra.mxu1 %v6875_v50  ;;  %v8167_v22 = vld [vmem:[%s11836_s2 + $0xc4] sm:$0xf]  ;;  %v6772_v50 = vld [vmem:[%s11836_s2 + $0x158] sm:$0xf0]  ;;  %v1907_v0 = vpop.f32.mrf.mxu2  ;;  %v8209_v45 = vld [vmem:[%s11836_s2 + $0x214] sm:$0xf] }
 0x197   : > { %v6703_v52 = vor.u32 %v8167_v22, %v6700_v57  ;;  %v6775_v47 = vor.u32 %v8185_v5, %v6772_v50  ;;  %v6679_v22 = vor.u32 %v8161_v27, %v6676_v28  ;;  %v8215_v57 = vld [vmem:[%s11836_s2 + $0x244] sm:$0xf]  ;;  %v6668_v50 = vld [vmem:[%s11836_s2 + $0x88] sm:$0xf0]  ;;  %v6807_v0 = vor.u32 %v8193_v29, %v6804_v12  ;;  %v7018_v29 = vld [vmem:[%s11837_s3 + $0x178] sm:$0xf0] }
 0x198   : > { %3141 = vmatpush.bf16.msra.mxu2 %v6639_v37  ;;  %3106 = vmatpush.bf16.msrb.mxu3 %v6731_v61  ;;  %v6604_v37 = vld [vmem:[%s11836_s2 + $0x8] sm:$0xf0]  ;;  %v8165_v61 = vld [vmem:[%s11836_s2 + $0xb4] sm:$0xf]  ;;  %v8159_v5 = vld [vmem:[%s11836_s2 + $0x84] sm:$0xf] }
 0x199   : > { %v6607_v58 = vor.u32 %v8143_v6, %v6604_v37  ;;  %v6695_v11 = vor.u32 %v8165_v61, %v6692_v55  ;;  %v8177_v6 = vld [vmem:[%s11836_s2 + $0x114] sm:$0xf]  ;;  %v6740_v37 = vld [vmem:[%s11836_s2 + $0x118] sm:$0xf0]  ;;  %v6671_v61 = vor.u32 %v8159_v5, %v6668_v50  ;;  %v3265_v5 = vadd.s32 1, %v8655_v1 }
 0x19a   : > { %3118 = vmatpush.bf16.msra.mxu0 %v6803_v60  ;;  %3131 = vmatpush.bf16.msra.mxu1 %v6867_v7  ;;  %v6764_v60 = vld [vmem:[%s11836_s2 + $0x148] sm:$0xf0]  ;;  %v8213_v55 = vld [vmem:[%s11836_s2 + $0x234] sm:$0xf] }
 0x19b   : > { %3107 = vmatmul.bf16.vlgmr.msrb.gmra.mxu3 %v9165_v33  ;;  %v6828_v7 = vld [vmem:[%s11836_s2 + $0x1c8] sm:$0xf0]  ;;  %vm3266_vm6 = vcmp.eq.s32.totalorder %v8657_v2, %v3265_v5 }
 0x19c   : > { %3151 = vmatpush.bf16.msra.mxu3 %v6727_v59  ;;  %3142 = vmatpush.bf16.msra.mxu2 %v6631_v13  ;;  %v8183_v59 = vld [vmem:[%s11836_s2 + $0x144] sm:$0xf]  ;;  %v6831_v18 = vor.u32 %v8199_v48, %v6828_v7  ;;  %v6732_v48 = vld [vmem:[%s11836_s2 + $0x108] sm:$0xf0] }
 0x19d   : > { %v6767_v13 = vor.u32 %v8183_v59, %v6764_v60  ;;  %v6743_v60 = vor.u32 %v8177_v6, %v6740_v37  ;;  %v7016_v6 = vld [vmem:[%s11837_s3 + $0x170] sm:$0xf] }
 0x19e   : > { %3119 = vmatpush.bf16.msra.mxu0 %v6795_v23  ;;  %3132 = vmatpush.bf16.msra.mxu1 %v6859_v4  ;;  %v6820_v23 = vld [vmem:[%s11836_s2 + $0x1b8] sm:$0xf0]  ;;  %v1931_v4 = vpop.f32.mrf.mxu0 }
 0x1a0   : > { %3152 = vmatpush.bf16.msra.mxu3 %v6719_v21  ;;  %3143 = vmatpush.bf16.msra.mxu2 %v6623_v15  ;;  %v8197_v21 = vld [vmem:[%s11836_s2 + $0x1b4] sm:$0xf]  ;;  %v1944_v15 = vpop.f32.mrf.mxu1 }
 0x1a1   : > { %3120 = vmatmul.bf16.vlgmr.msra.gmra.mxu0 %v9220_v8  ;;  %3133 = vmatmul.bf16.vlgmr.msra.gmra.mxu1 %v9222_v9  ;;  %v6823_v34 = vor.u32 %v8197_v21, %v6820_v23 }
 0x1a2   : > { %3164 = vmatpush.bf16.msrb.mxu0 %v6791_v63  ;;  %3177 = vmatpush.bf16.msrb.mxu1 %v6855_v26  ;;  %v6687_v63 = vor.u32 %v8163_v10, %v6684_v16  ;;  %v1918_v26 = vpop.f32.mrf.mxu3 }
 0x1a3   : > { %v1919_v31 = vadd.f32 %v1918_v26, %v10617_v38  ;;  %v6812_v38 = vld [vmem:[%s11836_s2 + $0x1a8] sm:$0xf0] }
 0x1a4   : > { %3153 = vmatpush.bf16.msra.mxu3 %v6711_v62  ;;  %3144 = vmatpush.bf16.msra.mxu2 %v6615_v46  ;;  %v8195_v62 = vld [vmem:[%s11836_s2 + $0x1a4] sm:$0xf] }
 0x1a5   : > { %v6815_v54 = vor.u32 %v8195_v62, %v6812_v38 }
 0x1a6   : > { %3165 = vmatpush.bf16.msrb.mxu0 %v6783_v39  ;;  %3178 = vmatpush.bf16.msrb.mxu1 %v6847_v42  ;;  %v1932_v39 = vadd.f32 %v1931_v4, %v1919_v31  ;;  %v6892_v42 = vld [vmem:[%s11836_s2 + $0x248] sm:$0xf0] }
 0x1a7   : > { %v6860_v4 = vld [vmem:[%s11836_s2 + $0x208] sm:$0xf0] }
 0x1a8   : > { %3154 = vmatpush.bf16.msra.mxu3 %v6703_v52  ;;  %3145 = vmatpush.bf16.msra.mxu2 %v6607_v58  ;;  %v1945_v49 = vadd.f32 %v1944_v15, %v1932_v39  ;;  %v6895_v52 = vor.u32 %v8215_v57, %v6892_v42  ;;  %v1946_v59 = vpop.f32.mrf.mxu1 }
 0x1a9   : > { %v7008_v59 = vld [vmem:[%s11837_s3 + $0x160] sm:$0xf] }
 0x1aa   : > { %3166 = vmatpush.bf16.msrb.mxu0 %v6775_v47  ;;  %3179 = vmatpush.bf16.msrb.mxu1 %v6839_v56  ;;  %v1933_v47 = vpop.f32.mrf.mxu0  ;;  %v6884_v56 = vld [vmem:[%s11836_s2 + $0x238] sm:$0xf0]  ;;  %v1920_v58 = vpop.f32.mrf.mxu3 }
 0x1ab   : > { %3146 = vmatmul.bf16.vlgmr.msra.gmra.mxu2 %v9133_v17  ;;  %v6748_v17 = vld [vmem:[%s11836_s2 + $0x128] sm:$0xf0]  ;;  %v6887_v7 = vor.u32 %v8213_v55, %v6884_v56 }
 0x1ac   : > { %3190 = vmatpush.bf16.msrb.mxu2 %v6919_v43  ;;  %3155 = vmatpush.bf16.msra.mxu3 %v6695_v11  ;;  %v6751_v46 = vor.u32 %v8179_v36, %v6748_v17  ;;  %v8175_v43 = vld [vmem:[%s11836_s2 + $0x104] sm:$0xf] }
 0x1ad   : > { %v8191_v11 = vld [vmem:[%s11836_s2 + $0x184] sm:$0xf]  ;;  %v6735_v10 = vor.u32 %v8175_v43, %v6732_v48  ;;  %v7010_v43 = vld [vmem:[%s11837_s3 + $0x168] sm:$0xf0] }
 0x1ae   : > { %3167 = vmatpush.bf16.msrb.mxu0 %v6767_v13  ;;  %3180 = vmatpush.bf16.msrb.mxu1 %v6831_v18  ;;  %v6876_v13 = vld [vmem:[%s11836_s2 + $0x228] sm:$0xf0]  ;;  %v6799_v16 = vor.u32 %v8191_v11, %v6796_v14  ;;  %v1957_v19 = vpop.f32.mrf.mxu2 }
 0x1af   : > { %v6879_v18 = vor.u32 %v8211_v53, %v6876_v13  ;;  %v10774_v21 = vadd.f32 %v1957_v19, %v1945_v49  ;;  %v7002_v19 = vld [vmem:[%s11837_s3 + $0x158] sm:$0xf0] }
 0x1b0   : > { %3191 = vmatpush.bf16.msrb.mxu2 %v6911_v20  ;;  %3156 = vmatpush.bf16.msra.mxu3 %v6687_v63  ;;  %v6868_v20 = vld [vmem:[%s11836_s2 + $0x218] sm:$0xf0] }
 0x1b1   : > { %v6871_v23 = vor.u32 %v8209_v45, %v6868_v20 }
 0x1b2   : > { %3168 = vmatpush.bf16.msrb.mxu0 %v6759_v51  ;;  %3181 = vmatpush.bf16.msrb.mxu1 %v6823_v34 }
 0x1b4   : > { %3192 = vmatpush.bf16.msrb.mxu2 %v6903_v41  ;;  %3157 = vmatpush.bf16.msra.mxu3 %v6679_v22 }
 0x1b6   : > { %3169 = vmatpush.bf16.msrb.mxu0 %v6751_v46  ;;  %3182 = vmatpush.bf16.msrb.mxu1 %v6815_v54  ;;  %v1959_v24 = vpop.f32.mrf.mxu2  ;;  %v3223_v46 = vadd.s32 4294967295, %v8655_v1  ;;  %v8269_v1 = vld [vmem:[%s11837_s3 + $0x174] sm:$0xf] }
 0x1b7   : > { %v7021_v58 = vor.u32 %v8269_v1, %v7018_v29 }
 0x1b8   : > { %3193 = vmatpush.bf16.msrb.mxu2 %v6895_v52  ;;  %3158 = vmatpush.bf16.msra.mxu3 %v6671_v61  ;;  %vm3224_vm5 = vcmp.eq.s32.totalorder %v8657_v2, %v3223_v46  ;;  %v3267_v61 = vsel %vm3266_vm6, 1.0, %v8534_v30 }
 0x1b9   : > { %v3225_v47 = vsel %vm3224_vm5, 1.0, %v8534_v30  ;;  %v10836_v11 = vpack.c.bf16 %v3267_v61, %v3267_v61 }
 0x1ba   : > { %3170 = vmatpush.bf16.msrb.mxu0 %v6743_v60  ;;  %3183 = vmatpush.bf16.msrb.mxu1 %v6807_v0  ;;  %v8268_v60 = vld [vmem:[%s11837_s3 + $0x164] sm:$0xf0]  ;;  %v8267_v0 = vld [vmem:[%s11837_s3 + $0x164] sm:$0xf] }
 0x1bb   : > { %3159 = vmatmul.bf16.vlgmr.msra.gmra.mxu3 %v9163_v32  ;;  %v8207_v32 = vld [vmem:[%s11836_s2 + $0x204] sm:$0xf]  ;;  %v7009_v53 = vor.u32 %v8268_v60, %v7008_v59  ;;  %v7013_v13 = vor.u32 %v8267_v0, %v7010_v43 }
 0x1bc   : > { %3194 = vmatpush.bf16.msrb.mxu2 %v6887_v7  ;;  %v6863_v63 = vor.u32 %v8207_v32, %v6860_v4  ;;  %v10834_v7 = vpack.c.bf16 %v3225_v47, %v3225_v47  ;;  %v8264_v32 = vld [vmem:[%s11837_s3 + $0x144] sm:$0xf0]  ;;  %v8263_v4 = vld [vmem:[%s11837_s3 + $0x144] sm:$0xf] }
 0x1be   : > { %3171 = vmatpush.bf16.msrb.mxu0 %v6735_v10  ;;  %3184 = vmatpush.bf16.msrb.mxu1 %v6799_v16  ;;  %v2464_v25 = vpop.f32.mrf.mxu0  ;;  %v2451_v26 = vpop.f32.mrf.mxu3  ;;  %v7000_v10 = vld [vmem:[%s11837_s3 + $0x150] sm:$0xf]  ;;  %v8266_v16 = vld [vmem:[%s11837_s3 + $0x154] sm:$0xf0] }
 0x1bf   : > { %v2477_v15 = vpop.f32.mrf.mxu1  ;;  %v2465_v31 = vadd.f32 %v2464_v25, %v2451_v26  ;;  %v7001_v45 = vor.u32 %v8266_v16, %v7000_v10  ;;  %v7082_v10 = vld [vmem:[%s11837_s3 + $0x1f8] sm:$0xf0] }
 0x1c0   : > { %3195 = vmatpush.bf16.msrb.mxu2 %v6879_v18  ;;  %v8265_v18 = vld [vmem:[%s11837_s3 + $0x154] sm:$0xf] }
 0x1c1   : > { %3172 = vmatmul.bf16.vlgmr.msrb.gmra.mxu0 %v9165_v33  ;;  %3185 = vmatmul.bf16.vlgmr.msrb.gmra.mxu1 %v9220_v8  ;;  %v2478_v36 = vadd.f32 %v2477_v15, %v2465_v31  ;;  %v10788_v8 = vld [vmem:[%s11838_s4] ss:$8 sm:$0x3]  ;;  %v7005_v20 = vor.u32 %v8265_v18, %v7002_v19  ;;  %v6984_v15 = vld [vmem:[%s11837_s3 + $0x130] sm:$0xf] }
 0x1c2   : > { %v2576_v22 = vperm.slane %v10788_v8, 0  ;;  %v2577_v46 = vperm.slane %v10788_v8, 1  ;;  %v6970_v8 = vld [vmem:[%s11837_s3 + $0x118] sm:$0xf0] }
 0x1c4   : > { %3196 = vmatpush.bf16.msrb.mxu2 %v6871_v23  ;;  %v6992_v23 = vld [vmem:[%s11837_s3 + $0x140] sm:$0xf] }
 0x1c5   : > { %v6993_v25 = vor.u32 %v8264_v32, %v6992_v23 }
 0x1c6   : > { %v2466_v33 = vpop.f32.mrf.mxu0  ;;  %v2453_v51 = vpop.f32.mrf.mxu3 }
 0x1c7   : > { %v2479_v27 = vpop.f32.mrf.mxu1  ;;  %v8262_v33 = vld [vmem:[%s11837_s3 + $0x134] sm:$0xf0]  ;;  %v8261_v51 = vld [vmem:[%s11837_s3 + $0x134] sm:$0xf] }
 0x1c8   : > { %3197 = vmatpush.bf16.msrb.mxu2 %v6863_v63  ;;  %v6994_v63 = vld [vmem:[%s11837_s3 + $0x148] sm:$0xf0]  ;;  %v6986_v27 = vld [vmem:[%s11837_s3 + $0x138] sm:$0xf0]  ;;  %v6985_v31 = vor.u32 %v8262_v33, %v6984_v15  ;;  %v7064_v15 = vld [vmem:[%s11837_s3 + $0x1d0] sm:$0xf] }
 0x1c9   : > { %v6997_v26 = vor.u32 %v8263_v4, %v6994_v63  ;;  %v8283_v4 = vld [vmem:[%s11837_s3 + $0x1e4] sm:$0xf]  ;;  %v7074_v63 = vld [vmem:[%s11837_s3 + $0x1e8] sm:$0xf0]  ;;  %v8282_v33 = vld [vmem:[%s11837_s3 + $0x1d4] sm:$0xf0] }
 0x1cb   : > { %3198 = vmatmul.bf16.vlgmr.msrb.gmra.mxu2 %v9222_v9  ;;  %v10795_v9 = vld [vmem:[%s11838_s4 + $0x1] ss:$8 sm:$0x3] }
 0x1cc   : > { %v2585_v42 = vperm.slane %v10795_v9, 0 }
 0x1ce   : > { %v2490_v28 = vpop.f32.mrf.mxu2 }
 0x1cf   : > { %v2491_v17 = vadd.f32 %v2490_v28, %v2478_v36  ;;  %v6976_v36 = vld [vmem:[%s11837_s3 + $0x120] sm:$0xf] }
 0x1d6   : > { %v2492_v34 = vpop.f32.mrf.mxu2 }
 0x1d7   : > { %v6989_v34 = vor.u32 %v8261_v51, %v6986_v27  ;;  %v7066_v51 = vld [vmem:[%s11837_s3 + $0x1d8] sm:$0xf0]  ;;  %v7065_v27 = vor.u32 %v8282_v33, %v7064_v15 }
 0x1de   : > { %v10790_v41 = vpop.f32.mrf.mxu0  ;;  %v2503_v62 = vpop.f32.mrf.mxu3 }
 0x1df   : > { %v2529_v38 = vpop.f32.mrf.mxu1  ;;  %v2504_v39 = vadd.f32 %v2503_v62, %v2491_v17 }
 0x1e0   : > { %v2530_v28 = vadd.f32 %v2529_v38, %v10790_v41  ;;  %v6978_v41 = vld [vmem:[%s11837_s3 + $0x128] sm:$0xf0] }
 0x1e1   : > { %v2572_v57 = vadd.f32 %v2504_v39, %v10523_v40  ;;  %v8270_v40 = vld [vmem:[%s11837_s3 + $0x174] sm:$0xf0]  ;;  %v8260_v39 = vld [vmem:[%s11837_s3 + $0x124] sm:$0xf0] }
 0x1e2   : > { %v7017_v56 = vor.u32 %v8270_v40, %v7016_v6  ;;  %v6977_v5 = vor.u32 %v8260_v39, %v6976_v36  ;;  %v8258_v6 = vld [vmem:[%s11837_s3 + $0x114] sm:$0xf0]  ;;  %v2586_v40 = vperm.slane %v10795_v9, 1  ;;  %v6962_v9 = vld [vmem:[%s11837_s3 + $0x108] sm:$0xf0] }
 0x1e3   : > { %v2580_v50 = vmul.f32 %v2576_v22, %v2572_v57  ;;  %v8259_v22 = vld [vmem:[%s11837_s3 + $0x124] sm:$0xf] }
 0x1e5   : > { %v2589_v49 = vadd.f32 %v2585_v42, %v2580_v50  ;;  %v6981_v50 = vor.u32 %v8259_v22, %v6978_v41  ;;  %v7048_v41 = vld [vmem:[%s11837_s3 + $0x1b0] sm:$0xf] }
 0x1e6   : > { %v2518_v54 = vpop.f32.mrf.mxu0  ;;  %v2505_v37 = vpop.f32.mrf.mxu3 }
 0x1e7   : > { %v2531_v52 = vpop.f32.mrf.mxu1  ;;  %v2591_v12 = vmax.f32 %v2589_v49, 0.0  ;;  %v6968_v49 = vld [vmem:[%s11837_s3 + $0x110] sm:$0xf]  ;;  %v8257_v37 = vld [vmem:[%s11837_s3 + $0x114] sm:$0xf] }
 0x1e8   : > { %v6969_v1 = vor.u32 %v8258_v6, %v6968_v49  ;;  %v6973_v29 = vor.u32 %v8257_v37, %v6970_v8  ;;  %v7040_v37 = vld [vmem:[%s11837_s3 + $0x1a0] sm:$0xf]  ;;  %v8276_v8 = vld [vmem:[%s11837_s3 + $0x1a4] sm:$0xf0] }
 0x1e9   : > { %v10818_v55 = vpack.c.bf16 %v2591_v12, %v2591_v12  ;;  %v6960_v12 = vld [vmem:[%s11837_s3 + $0x100] sm:$0xf] }
 0x1eb   : > { %v3232_v48 = vsel %vm500_vm0, %v10818_v55, 0 }
 0x1ec   : > { %3244 = vmatpush.bf16.msrb.mxu3 %v3232_v48  ;;  %3279 = vmatpush.bf16.msra.mxu1 %v3232_v48  ;;  %v7080_v48 = vld [vmem:[%s11837_s3 + $0x1f0] sm:$0xf] }
 0x1ee   : > { %v2542_v14 = vpop.f32.mrf.mxu2 }
 0x1ef   : > { %6922 = vmatmul.msk.bf16.vlgmr.msrb.gmra.mxu3 %vm3227_vm7, %v10834_v7  ;;  %6924 = vmatmul.msk.bf16.vlgmr.msra.gmra.mxu1 %vm3227_vm7, %v10836_v11  ;;  %v2543_v17 = vadd.f32 %v2542_v14, %v2530_v28  ;;  %v8286_v14 = vld [vmem:[%s11837_s3 + $0x1f4] sm:$0xf0] }
 0x1f0   : > { %3525 = vmatpush.bf16.msra.mxu3 %v7017_v56  ;;  %3551 = vmatpush.bf16.msrb.mxu1 %v7021_v58  ;;  %v8256_v56 = vld [vmem:[%s11837_s3 + $0x104] sm:$0xf0]  ;;  %v7081_v18 = vor.u32 %v8286_v14, %v7080_v48  ;;  %v7024_v48 = vld [vmem:[%s11837_s3 + $0x180] sm:$0xf] }
 0x1f1   : > { %v6961_v0 = vor.u32 %v8256_v56, %v6960_v12  ;;  %v8274_v56 = vld [vmem:[%s11837_s3 + $0x194] sm:$0xf0]  ;;  %v8272_v14 = vld [vmem:[%s11837_s3 + $0x184] sm:$0xf0] }
 0x1f4   : > { %3526 = vmatpush.bf16.msra.mxu3 %v7009_v53  ;;  %3552 = vmatpush.bf16.msrb.mxu1 %v7013_v13  ;;  %v8285_v13 = vld [vmem:[%s11837_s3 + $0x1f4] sm:$0xf] }
 0x1f5   : > { %v7085_v19 = vor.u32 %v8285_v13, %v7082_v10  ;;  %v7026_v13 = vld [vmem:[%s11837_s3 + $0x188] sm:$0xf0]  ;;  %v7025_v10 = vor.u32 %v8272_v14, %v7024_v48  ;;  %v7114_v14 = vld [vmem:[%s11837_s3 + $0x38] sm:$0xf0] }
 0x1f6   : > { %v2544_v24 = vpop.f32.mrf.mxu2 }
 0x1f8   : > { %3527 = vmatpush.bf16.msra.mxu3 %v7001_v45  ;;  %3553 = vmatpush.bf16.msrb.mxu1 %v7005_v20  ;;  %v7072_v45 = vld [vmem:[%s11837_s3 + $0x1e0] sm:$0xf]  ;;  %v8284_v20 = vld [vmem:[%s11837_s3 + $0x1e4] sm:$0xf0] }
 0x1fc   : > { %3528 = vmatpush.bf16.msra.mxu3 %v6993_v25  ;;  %3554 = vmatpush.bf16.msrb.mxu1 %v6997_v26  ;;  %v7073_v25 = vor.u32 %v8284_v20, %v7072_v45  ;;  %v7077_v26 = vor.u32 %v8283_v4, %v7074_v63  ;;  %v7144_v45 = vld [vmem:[%s11837_s3 + $0x70] sm:$0xf]  ;;  %v8238_v20 = vld [vmem:[%s11837_s3 + $0x74] sm:$0xf0]  ;;  %v7146_v4 = vld [vmem:[%s11837_s3 + $0x78] sm:$0xf0] }
 0x1fd   : > { %v8236_v63 = vld [vmem:[%s11837_s3 + $0x64] sm:$0xf0] }
 0x1fe   : > { %v2568_v62 = vpop.f32.mrf.mxu0  ;;  %v2555_v38 = vpop.f32.mrf.mxu3 }
 0x1ff   : > { %v3082_v57 = vpop.f32.mrf.mxu1  ;;  %v2556_v42 = vadd.f32 %v2555_v38, %v2543_v17  ;;  %v8279_v17 = vld [vmem:[%s11837_s3 + $0x1c4] sm:$0xf]  ;;  %v8278_v38 = vld [vmem:[%s11837_s3 + $0x1b4] sm:$0xf0] }
 0x200   : > { %3529 = vmatpush.bf16.msra.mxu3 %v6985_v31  ;;  %3555 = vmatpush.bf16.msrb.mxu1 %v6989_v34  ;;  %v7056_v31 = vld [vmem:[%s11837_s3 + $0x1c0] sm:$0xf]  ;;  %v8280_v34 = vld [vmem:[%s11837_s3 + $0x1c4] sm:$0xf0]  ;;  %v7049_v49 = vor.u32 %v8278_v38, %v7048_v41 }
 0x201   : > { %v2569_v54 = vadd.f32 %v2568_v62, %v2556_v42  ;;  %v7058_v62 = vld [vmem:[%s11837_s3 + $0x1c8] sm:$0xf0]  ;;  %v7057_v39 = vor.u32 %v8280_v34, %v7056_v31  ;;  %v7050_v42 = vld [vmem:[%s11837_s3 + $0x1b8] sm:$0xf0]  ;;  %v8233_v31 = vld [vmem:[%s11837_s3 + $0x54] sm:$0xf] }
 0x202   : > { %v7061_v22 = vor.u32 %v8279_v17, %v7058_v62  ;;  %v7130_v34 = vld [vmem:[%s11837_s3 + $0x58] sm:$0xf0]  ;;  %v8253_v62 = vld [vmem:[%s11837_s3 + $0xf4] sm:$0xf]  ;;  %v7200_v38 = vld [vmem:[%s11837_s3 + $0xe0] sm:$0xf] }
 0x203   : > { %v2573_v52 = vadd.f32 %v2569_v54, %v10774_v21  ;;  %v8255_v21 = vld [vmem:[%s11837_s3 + $0x104] sm:$0xf] }
 0x204   : > { %3530 = vmatpush.bf16.msra.mxu3 %v6977_v5  ;;  %3556 = vmatpush.bf16.msrb.mxu1 %v6981_v50  ;;  %v6965_v43 = vor.u32 %v8255_v21, %v6962_v9  ;;  %v8273_v21 = vld [vmem:[%s11837_s3 + $0x194] sm:$0xf]  ;;  %v7034_v9 = vld [vmem:[%s11837_s3 + $0x198] sm:$0xf0] }
 0x205   : > { %v2581_v47 = vmul.f32 %v2577_v46, %v2573_v52  ;;  %v8275_v52 = vld [vmem:[%s11837_s3 + $0x1a4] sm:$0xf] }
 0x206   : > { %v2570_v61 = vpop.f32.mrf.mxu0  ;;  %v2557_v58 = vpop.f32.mrf.mxu3 }
 0x207   : > { %v3084_v59 = vpop.f32.mrf.mxu1  ;;  %v2590_v60 = vadd.f32 %v2586_v40, %v2581_v47  ;;  %v7042_v40 = vld [vmem:[%s11837_s3 + $0x1a8] sm:$0xf0]  ;;  %v7032_v61 = vld [vmem:[%s11837_s3 + $0x190] sm:$0xf] }
 0x208   : > { %3531 = vmatpush.bf16.msra.mxu3 %v6969_v1  ;;  %3557 = vmatpush.bf16.msrb.mxu1 %v6973_v29  ;;  %v7041_v29 = vor.u32 %v8276_v8, %v7040_v37  ;;  %v7045_v47 = vor.u32 %v8275_v52, %v7042_v40  ;;  %v8231_v8 = vld [vmem:[%s11837_s3 + $0x44] sm:$0xf]  ;;  %v7122_v52 = vld [vmem:[%s11837_s3 + $0x48] sm:$0xf0] }
 0x209   : > { %v2592_v53 = vmax.f32 %v2590_v60, 0.0  ;;  %v7202_v40 = vld [vmem:[%s11837_s3 + $0xe8] sm:$0xf0] }
 0x20b   : > { %v10930_v16 = vpack.c.bf16 %v2592_v53, %v2592_v53  ;;  %v8271_v53 = vld [vmem:[%s11837_s3 + $0x184] sm:$0xf] }
 0x20c   : > { %3532 = vmatpush.bf16.msra.mxu3 %v6961_v0  ;;  %3558 = vmatpush.bf16.msrb.mxu1 %v6965_v43  ;;  %v7033_v0 = vor.u32 %v8274_v56, %v7032_v61  ;;  %v7037_v43 = vor.u32 %v8273_v21, %v7034_v9  ;;  %v8250_v61 = vld [vmem:[%s11837_s3 + $0xd4] sm:$0xf0]  ;;  %v8249_v21 = vld [vmem:[%s11837_s3 + $0xd4] sm:$0xf]  ;;  %v7194_v9 = vld [vmem:[%s11837_s3 + $0xd8] sm:$0xf0] }
 0x20d   : > { %v3235_v32 = vsel %vm500_vm0, %v10930_v16, 0 }
 0x20e   : > { %v3095_v23 = vpop.f32.mrf.mxu2  ;;  %3257 = vmatpush.bf16.msra.mxu0 %v3235_v32  ;;  %3292 = vmatpush.bf16.msra.mxu2 %v3235_v32  ;;  %v7145_v32 = vor.u32 %v8238_v20, %v7144_v45  ;;  %v7186_v45 = vld [vmem:[%s11837_s3 + $0xc8] sm:$0xf0] }
 0x20f   : > { %v3096_v24 = vadd.f32 %v3095_v23, %v3082_v57  ;;  %3533 = vmatmul.bf16.vlgmr.msra.gmra.mxu3 %v10818_v55  ;;  %3559 = vmatmul.bf16.vlgmr.msrb.gmra.mxu1 %v10818_v55  ;;  %v8281_v55 = vld [vmem:[%s11837_s3 + $0x1d4] sm:$0xf] }
 0x210   : > { %v7069_v28 = vor.u32 %v8281_v55, %v7066_v51  ;;  %v8277_v57 = vld [vmem:[%s11837_s3 + $0x1b4] sm:$0xf]  ;;  %3737 = vmatpush.bf16.msrb.mxu3 %v7145_v32  ;;  %v7128_v51 = vld [vmem:[%s11837_s3 + $0x50] sm:$0xf] }
 0x211   : > { %6923 = vmatmul.msk.bf16.vlgmr.msra.gmra.mxu0 %vm3227_vm7, %v10834_v7  ;;  %6925 = vmatmul.msk.bf16.vlgmr.msra.gmra.mxu2 %vm3227_vm7, %v10836_v11  ;;  %v7053_v6 = vor.u32 %v8277_v57, %v7050_v42  ;;  %v8237_v23 = vld [vmem:[%s11837_s3 + $0x74] sm:$0xf]  ;;  %v8252_v57 = vld [vmem:[%s11837_s3 + $0xe4] sm:$0xf0] }
 0x212   : > { %3538 = vmatpush.bf16.msrb.mxu0 %v7081_v18  ;;  %3564 = vmatpush.bf16.msrb.mxu2 %v7085_v19  ;;  %v7029_v18 = vor.u32 %v8271_v53, %v7026_v13  ;;  %v7197_v53 = vor.u32 %v8249_v21, %v7194_v9  ;;  %v7184_v13 = vld [vmem:[%s11837_s3 + $0xc0] sm:$0xf] }
 0x216   : > { %3539 = vmatpush.bf16.msrb.mxu0 %v7073_v25  ;;  %3565 = vmatpush.bf16.msrb.mxu2 %v7077_v26  ;;  %v3097_v36 = vpop.f32.mrf.mxu2  ;;  %v8235_v25 = vld [vmem:[%s11837_s3 + $0x64] sm:$0xf]  ;;  %v7138_v26 = vld [vmem:[%s11837_s3 + $0x68] sm:$0xf0] }
 0x217   : > { %v7141_v55 = vor.u32 %v8235_v25, %v7138_v26  ;;  %v8254_v36 = vld [vmem:[%s11837_s3 + $0xf4] sm:$0xf0]  ;;  %v8227_v26 = vld [vmem:[%s11837_s3 + $0x24] sm:$0xf] }
 0x21a   : > { %3540 = vmatpush.bf16.msrb.mxu0 %v7065_v27  ;;  %3566 = vmatpush.bf16.msrb.mxu2 %v7069_v28  ;;  %v8234_v27 = vld [vmem:[%s11837_s3 + $0x54] sm:$0xf0]  ;;  %v7208_v28 = vld [vmem:[%s11837_s3 + $0xf0] sm:$0xf] }
 0x21b   : > { %v7209_v17 = vor.u32 %v8254_v36, %v7208_v28  ;;  %v8226_v28 = vld [vmem:[%s11837_s3 + $0x14] sm:$0xf0] }
 0x21e   : > { %v3121_v46 = vpop.f32.mrf.mxu0  ;;  %v3108_v5 = vpop.f32.mrf.mxu3  ;;  %3541 = vmatpush.bf16.msrb.mxu0 %v7057_v39  ;;  %3567 = vmatpush.bf16.msrb.mxu2 %v7061_v22  ;;  %v7210_v39 = vld [vmem:[%s11837_s3 + $0xf8] sm:$0xf0]  ;;  %v7129_v22 = vor.u32 %v8234_v27, %v7128_v51  ;;  %v7096_v27 = vld [vmem:[%s11837_s3 + $0x10] sm:$0xf] }
 0x21f   : > { %v3134_v50 = vpop.f32.mrf.mxu1  ;;  %v3109_v54 = vadd.f32 %v3108_v5, %v3096_v24  ;;  %v7149_v24 = vor.u32 %v8237_v23, %v7146_v4  ;;  %v7213_v41 = vor.u32 %v8253_v62, %v7210_v39  ;;  %v7120_v5 = vld [vmem:[%s11837_s3 + $0x40] sm:$0xf]  ;;  %v7097_v36 = vor.u32 %v8226_v28, %v7096_v27 }
 0x220   : > { %v7104_v4 = vld [vmem:[%s11837_s3 + $0x20] sm:$0xf] }
 0x221   : > { %v3122_v1 = vadd.f32 %v3121_v46, %v3109_v54  ;;  %3763 = vmatpush.bf16.msra.mxu1 %v7149_v24  ;;  %v7133_v46 = vor.u32 %v8233_v31, %v7130_v34  ;;  %v8251_v54 = vld [vmem:[%s11837_s3 + $0xe4] sm:$0xf]  ;;  %v8225_v31 = vld [vmem:[%s11837_s3 + $0x14] sm:$0xf]  ;;  %v7098_v34 = vld [vmem:[%s11837_s3 + $0x18] sm:$0xf0] }
 0x222   : > { %3542 = vmatpush.bf16.msrb.mxu0 %v7049_v49  ;;  %3568 = vmatpush.bf16.msrb.mxu2 %v7053_v6  ;;  %v7201_v49 = vor.u32 %v8252_v57, %v7200_v38  ;;  %v7101_v62 = vor.u32 %v8225_v31, %v7098_v34  ;;  %v8224_v38 = vld [vmem:[%s11837_s3 + $0x4] sm:$0xf0]  ;;  %v7176_v57 = vld [vmem:[%s11837_s3 + $0xb0] sm:$0xf]  ;;  %v7360_v34 = vld [vmem:[%s11837_s3 + $0x2e0] sm:$0xf] }
 0x223   : > { %v11000_v12 = vadd.f32 %v3134_v50, %v3122_v1  ;;  %v8232_v50 = vld [vmem:[%s11837_s3 + $0x44] sm:$0xf0] }
 0x224   : > { %v7121_v56 = vor.u32 %v8232_v50, %v7120_v5  ;;  %v8223_v5 = vld [vmem:[%s11837_s3 + $0x4] sm:$0xf]  ;;  %v7090_v50 = vld [vmem:[%s11837_s3 + $0x8] sm:$0xf0] }
 0x225   : > { %3764 = vmatpush.bf16.msra.mxu1 %v7141_v55 }
 0x226   : > { %v3123_v58 = vpop.f32.mrf.mxu0  ;;  %v3110_v59 = vpop.f32.mrf.mxu3  ;;  %3543 = vmatpush.bf16.msrb.mxu0 %v7041_v29  ;;  %3569 = vmatpush.bf16.msrb.mxu2 %v7045_v47  ;;  %v7205_v29 = vor.u32 %v8251_v54, %v7202_v40  ;;  %v7192_v47 = vld [vmem:[%s11837_s3 + $0xd0] sm:$0xf]  ;;  %v7093_v54 = vor.u32 %v8223_v5, %v7090_v50  ;;  %v8244_v40 = vld [vmem:[%s11837_s3 + $0xa4] sm:$0xf0] }
 0x227   : > { %v3136_v60 = vpop.f32.mrf.mxu1  ;;  %v7125_v59 = vor.u32 %v8231_v8, %v7122_v52  ;;  %v7193_v48 = vor.u32 %v8250_v61, %v7192_v47  ;;  %v7168_v52 = vld [vmem:[%s11837_s3 + $0xa0] sm:$0xf]  ;;  %v7170_v47 = vld [vmem:[%s11837_s3 + $0xa8] sm:$0xf0]  ;;  %v7304_v61 = vld [vmem:[%s11837_s3 + $0x270] sm:$0xf] }
 0x228   : > { %v7112_v60 = vld [vmem:[%s11837_s3 + $0x30] sm:$0xf] }
 0x229   : > { %3765 = vmatpush.bf16.msra.mxu1 %v7133_v46  ;;  %v8246_v46 = vld [vmem:[%s11837_s3 + $0xb4] sm:$0xf0] }
 0x22a   : > { %3544 = vmatpush.bf16.msrb.mxu0 %v7033_v0  ;;  %3570 = vmatpush.bf16.msrb.mxu2 %v7037_v43  ;;  %v8230_v0 = vld [vmem:[%s11837_s3 + $0x34] sm:$0xf0]  ;;  %v8229_v43 = vld [vmem:[%s11837_s3 + $0x34] sm:$0xf] }
 0x22b   : > { %v7113_v20 = vor.u32 %v8230_v0, %v7112_v60  ;;  %v7117_v32 = vor.u32 %v8229_v43, %v7114_v14  ;;  %v8241_v60 = vld [vmem:[%s11837_s3 + $0x94] sm:$0xf]  ;;  %v7162_v0 = vld [vmem:[%s11837_s3 + $0x98] sm:$0xf0]  ;;  %v7296_v43 = vld [vmem:[%s11837_s3 + $0x260] sm:$0xf] }
 0x22d   : > { %3766 = vmatpush.bf16.msra.mxu1 %v7125_v59  ;;  %v8242_v59 = vld [vmem:[%s11837_s3 + $0x94] sm:$0xf0] }
 0x22e   : > { %v3147_v19 = vpop.f32.mrf.mxu2  ;;  %3545 = vmatpush.bf16.msrb.mxu0 %v7025_v10  ;;  %3571 = vmatpush.bf16.msrb.mxu2 %v7029_v18  ;;  %v8248_v10 = vld [vmem:[%s11837_s3 + $0xc4] sm:$0xf0] }
 0x231   : > { %3546 = vmatmul.bf16.vlgmr.msrb.gmra.mxu0 %v10930_v16  ;;  %3572 = vmatmul.bf16.vlgmr.msrb.gmra.mxu2 %v10930_v16  ;;  %v7136_v16 = vld [vmem:[%s11837_s3 + $0x60] sm:$0xf] }
 0x232   : > { %v7137_v33 = vor.u32 %v8236_v63, %v7136_v16  ;;  %3750 = vmatpush.bf16.msra.mxu0 %v7209_v17  ;;  %3776 = vmatpush.bf16.msra.mxu2 %v7213_v41  ;;  %v8228_v16 = vld [vmem:[%s11837_s3 + $0x24] sm:$0xf0]  ;;  %v7185_v63 = vor.u32 %v8248_v10, %v7184_v13  ;;  %v7088_v41 = vld [vmem:[%s11837_s3] sm:$0xf]  ;;  %v8301_v13 = vld [vmem:[%s11837_s3 + $0x274] sm:$0xf] }
 0x233   : > { %v7105_v55 = vor.u32 %v8228_v16, %v7104_v4  ;;  %3767 = vmatpush.bf16.msra.mxu1 %v7117_v32  ;;  %v7306_v10 = vld [vmem:[%s11837_s3 + $0x278] sm:$0xf0]  ;;  %v7154_v32 = vld [vmem:[%s11837_s3 + $0x88] sm:$0xf0]  ;;  %v7368_v4 = vld [vmem:[%s11837_s3 + $0x2f0] sm:$0xf] }
 0x234   : > { %3738 = vmatpush.bf16.msrb.mxu3 %v7137_v33  ;;  %v8318_v16 = vld [vmem:[%s11837_s3 + $0x2f4] sm:$0xf0] }
 0x235   : > { %v7369_v28 = vor.u32 %v8318_v16, %v7368_v4  ;;  %v7338_v4 = vld [vmem:[%s11837_s3 + $0x2b8] sm:$0xf0] }
 0x236   : > { %v3149_v15 = vpop.f32.mrf.mxu2  ;;  %3751 = vmatpush.bf16.msra.mxu0 %v7201_v49  ;;  %3777 = vmatpush.bf16.msra.mxu2 %v7205_v29  ;;  %v7177_v49 = vor.u32 %v8246_v46, %v7176_v57  ;;  %v7169_v29 = vor.u32 %v8244_v40, %v7168_v52  ;;  %v7362_v57 = vld [vmem:[%s11837_s3 + $0x2e8] sm:$0xf0] }
 0x237   : > { %v7106_v15 = vld [vmem:[%s11837_s3 + $0x28] sm:$0xf0] }
 0x238   : > { %3739 = vmatpush.bf16.msrb.mxu3 %v7129_v22  ;;  %v7109_v51 = vor.u32 %v8227_v26, %v7106_v15  ;;  %v8298_v26 = vld [vmem:[%s11837_s3 + $0x254] sm:$0xf0] }
 0x23a   : > { %3752 = vmatpush.bf16.msra.mxu0 %v7193_v48  ;;  %3778 = vmatpush.bf16.msra.mxu2 %v7197_v53  ;;  %v8300_v48 = vld [vmem:[%s11837_s3 + $0x264] sm:$0xf0] }
 0x23b   : > { %3768 = vmatpush.bf16.msra.mxu1 %v7109_v51  ;;  %v7297_v53 = vor.u32 %v8300_v48, %v7296_v43  ;;  %v7298_v51 = vld [vmem:[%s11837_s3 + $0x268] sm:$0xf0]  ;;  %v7264_v48 = vld [vmem:[%s11837_s3 + $0x220] sm:$0xf] }
 0x23c   : > { %3740 = vmatpush.bf16.msrb.mxu3 %v7121_v56  ;;  %v8302_v56 = vld [vmem:[%s11837_s3 + $0x274] sm:$0xf0] }
 0x23d   : > { %v7305_v9 = vor.u32 %v8302_v56, %v7304_v61  ;;  %v7282_v56 = vld [vmem:[%s11837_s3 + $0x248] sm:$0xf0] }
 0x23e   : > { %v3173_v42 = vpop.f32.mrf.mxu0  ;;  %v3160_v6 = vpop.f32.mrf.mxu3  ;;  %3753 = vmatpush.bf16.msra.mxu0 %v7185_v63  ;;  %v8317_v63 = vld [vmem:[%s11837_s3 + $0x2f4] sm:$0xf] }
 0x23f   : > { %v3186_v37 = vpop.f32.mrf.mxu1  ;;  %v3161_v1 = vadd.f32 %v3160_v6, %v3147_v19  ;;  %v8247_v19 = vld [vmem:[%s11837_s3 + $0xc4] sm:$0xf]  ;;  %3769 = vmatpush.bf16.msra.mxu1 %v7101_v62  ;;  %v8245_v6 = vld [vmem:[%s11837_s3 + $0xb4] sm:$0xf]  ;;  %v7280_v62 = vld [vmem:[%s11837_s3 + $0x240] sm:$0xf] }
 0x240   : > { %v7189_v33 = vor.u32 %v8247_v19, %v7186_v45  ;;  %3741 = vmatpush.bf16.msrb.mxu3 %v7113_v20  ;;  %v7165_v19 = vor.u32 %v8241_v60, %v7162_v0  ;;  %v7309_v45 = vor.u32 %v8301_v13, %v7306_v10  ;;  %v8240_v20 = vld [vmem:[%s11837_s3 + $0x84] sm:$0xf0]  ;;  %v7346_v0 = vld [vmem:[%s11837_s3 + $0x2c8] sm:$0xf0] }
 0x241   : > { %v3174_v58 = vadd.f32 %v3173_v42, %v3161_v1  ;;  %v7089_v42 = vor.u32 %v8224_v38, %v7088_v41  ;;  %v8243_v1 = vld [vmem:[%s11837_s3 + $0xa4] sm:$0xf]  ;;  %v8297_v41 = vld [vmem:[%s11837_s3 + $0x254] sm:$0xf] }
 0x242   : > { %3779 = vmatpush.bf16.msra.mxu2 %v7189_v33  ;;  %3754 = vmatpush.bf16.msra.mxu0 %v7177_v49  ;;  %v7173_v21 = vor.u32 %v8243_v1, %v7170_v47  ;;  %v8315_v38 = vld [vmem:[%s11837_s3 + $0x2e4] sm:$0xf]  ;;  %v7272_v1 = vld [vmem:[%s11837_s3 + $0x230] sm:$0xf] }
 0x243   : > { %v3187_v18 = vadd.f32 %v3186_v37, %v3174_v58  ;;  %v7178_v37 = vld [vmem:[%s11837_s3 + $0xb8] sm:$0xf0]  ;;  %3770 = vmatpush.bf16.msra.mxu1 %v7093_v54  ;;  %v7160_v58 = vld [vmem:[%s11837_s3 + $0x90] sm:$0xf]  ;;  %v7365_v49 = vor.u32 %v8315_v38, %v7362_v57  ;;  %v8295_v47 = vld [vmem:[%s11837_s3 + $0x244] sm:$0xf] }
 0x244   : > { %3742 = vmatpush.bf16.msrb.mxu3 %v7105_v55  ;;  %v7181_v8 = vor.u32 %v8245_v6, %v7178_v37  ;;  %v7161_v14 = vor.u32 %v8242_v59, %v7160_v58  ;;  %v8299_v55 = vld [vmem:[%s11837_s3 + $0x264] sm:$0xf]  ;;  %v7352_v54 = vld [vmem:[%s11837_s3 + $0x2d0] sm:$0xf]  ;;  %v8314_v6 = vld [vmem:[%s11837_s3 + $0x2d4] sm:$0xf0] }
 0x245   : > { %v7301_v31 = vor.u32 %v8299_v55, %v7298_v51  ;;  %v8313_v37 = vld [vmem:[%s11837_s3 + $0x2d4] sm:$0xf]  ;;  %v7353_v52 = vor.u32 %v8314_v6, %v7352_v54  ;;  %v8312_v58 = vld [vmem:[%s11837_s3 + $0x2c4] sm:$0xf0]  ;;  %v8311_v59 = vld [vmem:[%s11837_s3 + $0x2c4] sm:$0xf] }
 0x246   : > { %v3175_v23 = vpop.f32.mrf.mxu0  ;;  %v3162_v24 = vpop.f32.mrf.mxu3  ;;  %3780 = vmatpush.bf16.msra.mxu2 %v7181_v8  ;;  %3755 = vmatpush.bf16.msra.mxu0 %v7169_v29  ;;  %v7354_v8 = vld [vmem:[%s11837_s3 + $0x2d8] sm:$0xf0]  ;;  %v8294_v29 = vld [vmem:[%s11837_s3 + $0x234] sm:$0xf0]  ;;  %v7349_v43 = vor.u32 %v8311_v59, %v7346_v0  ;;  %v7328_v55 = vld [vmem:[%s11837_s3 + $0x2a0] sm:$0xf] }
 0x247   : > { %v3188_v25 = vpop.f32.mrf.mxu1  ;;  %v8239_v23 = vld [vmem:[%s11837_s3 + $0x84] sm:$0xf]  ;;  %4008 = vmatpush.bf16.msrb.mxu1 %v7309_v45  ;;  %v7370_v24 = vld [vmem:[%s11837_s3 + $0x2f8] sm:$0xf0]  ;;  %v7357_v40 = vor.u32 %v8313_v37, %v7354_v8  ;;  %v7273_v61 = vor.u32 %v8294_v29, %v7272_v1  ;;  %v7336_v45 = vld [vmem:[%s11837_s3 + $0x2b0] sm:$0xf] }
 0x248   : > { %3743 = vmatpush.bf16.msrb.mxu3 %v7097_v36  ;;  %v7288_v25 = vld [vmem:[%s11837_s3 + $0x250] sm:$0xf]  ;;  %v7157_v27 = vor.u32 %v8239_v23, %v7154_v32  ;;  %v8316_v36 = vld [vmem:[%s11837_s3 + $0x2e4] sm:$0xf0]  ;;  %v8309_v23 = vld [vmem:[%s11837_s3 + $0x2b4] sm:$0xf] }
 0x249   : > { %v7289_v33 = vor.u32 %v8298_v26, %v7288_v25  ;;  %v7361_v50 = vor.u32 %v8316_v36, %v7360_v34  ;;  %v7341_v16 = vor.u32 %v8309_v23, %v7338_v4  ;;  %v8291_v25 = vld [vmem:[%s11837_s3 + $0x224] sm:$0xf]  ;;  %v8308_v51 = vld [vmem:[%s11837_s3 + $0x2a4] sm:$0xf0]  ;;  %v7330_v34 = vld [vmem:[%s11837_s3 + $0x2a8] sm:$0xf0] }
 0x24a   : > { %3781 = vmatpush.bf16.msra.mxu2 %v7173_v21  ;;  %3756 = vmatpush.bf16.msra.mxu0 %v7161_v14  ;;  %v7285_v21 = vor.u32 %v8295_v47, %v7282_v56  ;;  %v8292_v14 = vld [vmem:[%s11837_s3 + $0x224] sm:$0xf0]  ;;  %v7322_v6 = vld [vmem:[%s11837_s3 + $0x298] sm:$0xf0]  ;;  %v8287_v8 = vld [vmem:[%s11837_s3 + $0x204] sm:$0xf] }
 0x24b   : > { %4009 = vmatpush.bf16.msrb.mxu1 %v7301_v31  ;;  %v7265_v10 = vor.u32 %v8292_v14, %v7264_v48  ;;  %v7329_v31 = vor.u32 %v8308_v51, %v7328_v55  ;;  %v7312_v1 = vld [vmem:[%s11837_s3 + $0x280] sm:$0xf]  ;;  %v8304_v29 = vld [vmem:[%s11837_s3 + $0x284] sm:$0xf0]  ;;  %v8303_v47 = vld [vmem:[%s11837_s3 + $0x284] sm:$0xf] }
 0x24c   : > { %3744 = vmatpush.bf16.msrb.mxu3 %v7089_v42  ;;  %v7290_v42 = vld [vmem:[%s11837_s3 + $0x258] sm:$0xf0]  ;;  %v7313_v56 = vor.u32 %v8304_v29, %v7312_v1 }
 0x24d   : > { %v7293_v5 = vor.u32 %v8297_v41, %v7290_v42  ;;  %v8289_v41 = vld [vmem:[%s11837_s3 + $0x214] sm:$0xf]  ;;  %v7258_v42 = vld [vmem:[%s11837_s3 + $0x218] sm:$0xf0] }
 0x24e   : > { %v3199_v17 = vpop.f32.mrf.mxu2  ;;  %3782 = vmatpush.bf16.msra.mxu2 %v7165_v19 }
 0x24f   : > { %v11160_v39 = vadd.f32 %v3199_v17, %v3187_v18  ;;  %v7152_v18 = vld [vmem:[%s11837_s3 + $0x80] sm:$0xf]  ;;  %v7373_v17 = vor.u32 %v8317_v63, %v7370_v24  ;;  %4010 = vmatpush.bf16.msrb.mxu1 %v7293_v5  ;;  %v7256_v63 = vld [vmem:[%s11837_s3 + $0x210] sm:$0xf]  ;;  %v8290_v24 = vld [vmem:[%s11837_s3 + $0x214] sm:$0xf0] }
 0x250   : > { %3982 = vmatpush.bf16.msra.mxu3 %v7305_v9  ;;  %v7153_v15 = vor.u32 %v8240_v20, %v7152_v18  ;;  %v7344_v9 = vld [vmem:[%s11837_s3 + $0x2c0] sm:$0xf]  ;;  %v7274_v18 = vld [vmem:[%s11837_s3 + $0x238] sm:$0xf0]  ;;  %v8310_v20 = vld [vmem:[%s11837_s3 + $0x2b4] sm:$0xf0]  ;;  %v7257_v26 = vor.u32 %v8290_v24, %v7256_v63 }
 0x251   : > { %v7345_v60 = vor.u32 %v8312_v58, %v7344_v9  ;;  %v7337_v32 = vor.u32 %v8310_v20, %v7336_v45  ;;  %v7320_v5 = vld [vmem:[%s11837_s3 + $0x290] sm:$0xf] }
 0x252   : > { %3757 = vmatpush.bf16.msra.mxu0 %v7153_v15  ;;  %3783 = vmatpush.bf16.msra.mxu2 %v7157_v27  ;;  %v7266_v15 = vld [vmem:[%s11837_s3 + $0x228] sm:$0xf0]  ;;  %v8307_v27 = vld [vmem:[%s11837_s3 + $0x2a4] sm:$0xf] }
 0x253   : > { %4011 = vmatpush.bf16.msrb.mxu1 %v7285_v21  ;;  %v7314_v21 = vld [vmem:[%s11837_s3 + $0x288] sm:$0xf0] }
 0x254   : > { %3983 = vmatpush.bf16.msra.mxu3 %v7297_v53  ;;  %v8293_v53 = vld [vmem:[%s11837_s3 + $0x234] sm:$0xf]  ;;  %v7317_v9 = vor.u32 %v8303_v47, %v7314_v21 }
 0x255   : > { %v7277_v19 = vor.u32 %v8293_v53, %v7274_v18 }
 0x256   : > { %v3201_v22 = vpop.f32.mrf.mxu2  ;;  %3995 = vmatpush.bf16.msrb.mxu0 %v7369_v28  ;;  %4021 = vmatpush.bf16.msrb.mxu2 %v7373_v17  ;;  %v7333_v17 = vor.u32 %v8307_v27, %v7330_v34 }
 0x257   : > { %v8296_v22 = vld [vmem:[%s11837_s3 + $0x244] sm:$0xf0]  ;;  %4012 = vmatpush.bf16.msrb.mxu1 %v7277_v19 }
 0x258   : > { %3984 = vmatpush.bf16.msra.mxu3 %v7289_v33  ;;  %v7281_v46 = vor.u32 %v8296_v22, %v7280_v62  ;;  %v7269_v33 = vor.u32 %v8291_v25, %v7266_v15  ;;  %v7248_v62 = vld [vmem:[%s11837_s3 + $0x200] sm:$0xf]  ;;  %v8288_v22 = vld [vmem:[%s11837_s3 + $0x204] sm:$0xf0] }
 0x259   : > { %v7249_v57 = vor.u32 %v8288_v22, %v7248_v62  ;;  %v6921_v62 = vld [vmem:[%s11838_s4 + $0x3] ss:$8 sm:$0x3] }
 0x25a   : > { %3996 = vmatpush.bf16.msrb.mxu0 %v7361_v50  ;;  %4022 = vmatpush.bf16.msrb.mxu2 %v7365_v49  ;;  %v8306_v50 = vld [vmem:[%s11837_s3 + $0x294] sm:$0xf0]  ;;  %v8305_v49 = vld [vmem:[%s11837_s3 + $0x294] sm:$0xf] }
 0x25b   : > { %4013 = vmatpush.bf16.msrb.mxu1 %v7269_v33  ;;  %v7321_v54 = vor.u32 %v8306_v50, %v7320_v5  ;;  %v7325_v37 = vor.u32 %v8305_v49, %v7322_v6  ;;  %v3215_v50 = vperm.slane %v6921_v62, 0 }
 0x25c   : > { %3985 = vmatpush.bf16.msra.mxu3 %v7281_v46  ;;  %v7261_v46 = vor.u32 %v8289_v41, %v7258_v42 }
 0x25e   : > { %3997 = vmatpush.bf16.msrb.mxu0 %v7353_v52  ;;  %4023 = vmatpush.bf16.msrb.mxu2 %v7357_v40  ;;  %v7250_v52 = vld [vmem:[%s11837_s3 + $0x208] sm:$0xf0] }
 0x25f   : > { %4014 = vmatpush.bf16.msrb.mxu1 %v7261_v46  ;;  %v7253_v40 = vor.u32 %v8287_v8, %v7250_v52  ;;  %v4060_v52 = vadd.s32 4294967295, %v8660_v3 }
 0x260   : > { %3986 = vmatpush.bf16.msra.mxu3 %v7273_v61 }
 0x261   : > { %vm4061_vm8 = vcmp.eq.s32.totalorder %v8657_v2, %v4060_v52  ;;  %v8326_v2 = vld [vmem:[%s11839_s5 + $0x38] sm:$0xff]  ;;  %v8327_v52 = vld [vmem:[%s11839_s5 + $0x40] sm:$0xff] }
 0x262   : > { %3998 = vmatpush.bf16.msrb.mxu0 %v7345_v60  ;;  %4024 = vmatpush.bf16.msrb.mxu2 %v7349_v43 }
 0x263   : > { %4015 = vmatpush.bf16.msrb.mxu1 %v7253_v40 }
 0x264   : > { %3987 = vmatpush.bf16.msra.mxu3 %v7265_v10 }
 0x266   : > { %3999 = vmatpush.bf16.msrb.mxu0 %v7337_v32  ;;  %4025 = vmatpush.bf16.msrb.mxu2 %v7341_v16 }
 0x268   : > { %3988 = vmatpush.bf16.msra.mxu3 %v7257_v26 }
 0x26a   : > { %4000 = vmatpush.bf16.msrb.mxu0 %v7329_v31  ;;  %4026 = vmatpush.bf16.msrb.mxu2 %v7333_v17  ;;  %v6920_v31 = vld [vmem:[%s11838_s4 + $0x2] ss:$8 sm:$0x3]  ;;  %v7374_v17 = vld [vmem:[%s11838_s4 + $0x4] ss:$8 sm:$0x3] }
 0x26b   : > { %v3206_v34 = vperm.slane %v6920_v31, 0  ;;  %v4039_v46 = vperm.slane %v7374_v17, 0  ;;  %v3207_v6 = vperm.slane %v6920_v31, 1  ;;  %v8331_v31 = vld [vmem:[%s11839_s5 + $0x60] sm:$0xff] }
 0x26c   : > { %v11333_v13 = vpop.f32.mrf.mxu1  ;;  %3989 = vmatpush.bf16.msra.mxu3 %v7249_v57 }
 0x26d   : > { %v3298_v58 = vpack.c.bf16 %v11333_v13, %v11333_v13  ;;  %v3210_v5 = vmul.f32 %v3206_v34, %v11000_v12  ;;  %v3211_v21 = vmul.f32 %v3207_v6, %v11160_v39  ;;  %v8337_v34 = vld [vmem:[%s11839_s5 + $0x90] sm:$0xff] }
 0x26e   : > { %4001 = vmatpush.bf16.msrb.mxu0 %v7321_v54  ;;  %4027 = vmatpush.bf16.msrb.mxu2 %v7325_v37  ;;  %v8357_v6 = vld [vmem:[%s11839_s5 + $0x130] sm:$0xff] }
 0x26f   : > { %v3219_v40 = vadd.f32 %v3215_v50, %v3210_v5  ;;  %v8358_v5 = vld [vmem:[%s11839_s5 + $0x138] sm:$0xff] }
 0x270   : > { %v8374_v50 = vld [vmem:[%s11840_s6 + $0x38] sm:$0xff] }
 0x272   : > { %v3246_v28 = vpop.f32.mrf.mxu3  ;;  %4002 = vmatpush.bf16.msrb.mxu0 %v7313_v56  ;;  %4028 = vmatpush.bf16.msrb.mxu2 %v7317_v9  ;;  %v4040_v56 = vperm.slane %v7374_v17, 1  ;;  %v3216_v9 = vperm.slane %v6921_v62, 1  ;;  %v8321_v17 = vld [vmem:[%s11839_s5 + $0x10] sm:$0xff]  ;;  %v8330_v62 = vld [vmem:[%s11839_s5 + $0x58] sm:$0xff] }
 0x273   : > { %v3263_v36 = vpack.c.bf16 %v3246_v28, %v3246_v28 }
 0x274   : > { %v3283_v38 = vpop.f32.mrf.mxu1  ;;  %v3220_v3 = vadd.f32 %v3216_v9, %v3211_v21  ;;  %v8371_v21 = vld [vmem:[%s11840_s6 + $0x20] sm:$0xff] }
 0x275   : > { %3745 = vmatmul.bf16.vlgmr.msrb.gmra.mxu3 %v3263_v36  ;;  %3771 = vmatmul.bf16.vlgmr.msra.gmra.mxu1 %v3263_v36  ;;  %v7375_v38 = vld [vmem:[%s11838_s4 + $0x5] ss:$8 sm:$0x3] }
 0x276   : > { %v4048_v54 = vperm.slane %v7375_v38, 0  ;;  %v4049_v12 = vperm.slane %v7375_v38, 1  ;;  %v8320_v38 = vld [vmem:[%s11839_s5 + $0x8] sm:$0xff]  ;;  %v8379_v9 = vld [vmem:[%s11840_s6 + $0x60] sm:$0xff] }
 0x27a   : > { %v3248_v61 = vpop.f32.mrf.mxu3 }
 0x285   : > { %3990 = vmatmul.bf16.vlgmr.msra.gmra.mxu3 %v3298_v58  ;;  %4016 = vmatmul.bf16.vlgmr.msrb.gmra.mxu1 %v3298_v58 }
 0x28c   : > { %v3560_v59 = vpop.f32.mrf.mxu1 }
 0x28e   : > { %v3259_v60 = vpop.f32.mrf.mxu0 }
 0x28f   : > { %v3264_v0 = vpack.c.bf16 %v3259_v60, %v3259_v60 }
 0x291   : > { %3758 = vmatmul.bf16.vlgmr.msra.gmra.mxu0 %v3264_v0  ;;  %3784 = vmatmul.bf16.vlgmr.msra.gmra.mxu2 %v3264_v0 }
 0x292   : > { %v3534_v43 = vpop.f32.mrf.mxu3 }
 0x294   : > { %v3294_v48 = vpop.f32.mrf.mxu2  ;;  %v3562_v14 = vpop.f32.mrf.mxu1 }
 0x295   : > { %v3299_v19 = vpack.c.bf16 %v3294_v48, %v3294_v48  ;;  %v4062_v48 = vsel %vm4061_vm8, 1.0, %v8534_v30 }
 0x296   : > { %v3261_v53 = vpop.f32.mrf.mxu0 }
 0x29a   : > { %v3536_v10 = vpop.f32.mrf.mxu3 }
 0x29b   : > { %v8342_v10 = vld [vmem:[%s11839_s5 + $0xb8] sm:$0xff] }
 0x29c   : > { %v3296_v18 = vpop.f32.mrf.mxu2 }
 0x2a1   : > { %4003 = vmatmul.bf16.vlgmr.msrb.gmra.mxu0 %v3299_v19  ;;  %4029 = vmatmul.bf16.vlgmr.msrb.gmra.mxu2 %v3299_v19  ;;  %v4063_v19 = vpack.c.bf16 %v4062_v48, %v4062_v48  ;;  %v8369_v48 = vld [vmem:[%s11840_s6 + $0x10] sm:$0xff] }
 0x2ae   : > { %v3547_v45 = vpop.f32.mrf.mxu0 }
 0x2af   : > { %v3548_v20 = vadd.f32 %v3547_v45, %v3534_v43 }
 0x2b4   : > { %v3573_v23 = vpop.f32.mrf.mxu2 }
 0x2b5   : > { %v3574_v13 = vadd.f32 %v3573_v23, %v3560_v59 }
 0x2b6   : > { %v3549_v32 = vpop.f32.mrf.mxu0 }
 0x2b7   : > { %v8325_v32 = vld [vmem:[%s11839_s5 + $0x30] sm:$0xff] }
 0x2bc   : > { %v3575_v4 = vpop.f32.mrf.mxu2 }
 0x2f2   : > { %v3772_v16 = vpop.f32.mrf.mxu1 }
 0x2f3   : > { %v3773_v37 = vadd.f32 %v3772_v16, %v3574_v13  ;;  %v8350_v13 = vld [vmem:[%s11839_s5 + $0xf8] sm:$0xff] }
 0x2f4   : > { %v8334_v16 = vld [vmem:[%s11839_s5 + $0x78] sm:$0xff] }
 0x2f8   : > { %v3746_v63 = vpop.f32.mrf.mxu3 }
 0x2f9   : > { %v3747_v22 = vadd.f32 %v3746_v63, %v3548_v20  ;;  %v8341_v20 = vld [vmem:[%s11839_s5 + $0xb0] sm:$0xff]  ;;  %v8340_v63 = vld [vmem:[%s11839_s5 + $0xa8] sm:$0xff] }
 0x2fa   : > { %v3774_v24 = vpop.f32.mrf.mxu1 }
 0x2fb   : > { %v8349_v24 = vld [vmem:[%s11839_s5 + $0xf0] sm:$0xff] }
 0x300   : > { %v3748_v25 = vpop.f32.mrf.mxu3 }
 0x301   : > { %v8324_v25 = vld [vmem:[%s11839_s5 + $0x28] sm:$0xff] }
 0x302   : > { %v4017_v26 = vpop.f32.mrf.mxu1 }
 0x308   : > { %v3991_v15 = vpop.f32.mrf.mxu3 }
 0x30a   : > { %v4019_v33 = vpop.f32.mrf.mxu1 }
 0x30b   : > { %v8348_v33 = vld [vmem:[%s11839_s5 + $0xe8] sm:$0xff] }
 0x30e   : > { %v3759_v55 = vpop.f32.mrf.mxu0 }
 0x30f   : > { %v3760_v57 = vadd.f32 %v3759_v55, %v3747_v22  ;;  %v8332_v55 = vld [vmem:[%s11839_s5 + $0x68] sm:$0xff] }
 0x310   : > { %v3993_v51 = vpop.f32.mrf.mxu3  ;;  %v8336_v22 = vld [vmem:[%s11839_s5 + $0x88] sm:$0xff] }
 0x311   : > { %v8338_v51 = vld [vmem:[%s11839_s5 + $0x98] sm:$0xff] }
 0x314   : > { %v3785_v27 = vpop.f32.mrf.mxu2 }
 0x315   : > { %v3786_v29 = vadd.f32 %v3785_v27, %v3773_v37  ;;  %v8347_v27 = vld [vmem:[%s11839_s5 + $0xe0] sm:$0xff]  ;;  %v8366_v37 = vld [vmem:[%s11839_s5 + $0x178] sm:$0xff] }
 0x316   : > { %v3761_v28 = vpop.f32.mrf.mxu0 }
 0x317   : > { %v8322_v28 = vld [vmem:[%s11839_s5 + $0x18] sm:$0xff] }
 0x31c   : > { %v3787_v36 = vpop.f32.mrf.mxu2 }
 0x31d   : > { %v8346_v36 = vld [vmem:[%s11839_s5 + $0xd8] sm:$0xff] }
 0x31e   : > { %v4004_v41 = vpop.f32.mrf.mxu0 }
 0x31f   : > { %v4005_v42 = vadd.f32 %v4004_v41, %v3991_v15  ;;  %v8339_v15 = vld [vmem:[%s11839_s5 + $0xa0] sm:$0xff]  ;;  %v8345_v41 = vld [vmem:[%s11839_s5 + $0xd0] sm:$0xff] }
 0x321   : > { %v4034_v49 = vadd.f32 %v4005_v42, %v3760_v57  ;;  %v8329_v57 = vld [vmem:[%s11839_s5 + $0x50] sm:$0xff]  ;;  %v8335_v42 = vld [vmem:[%s11839_s5 + $0x80] sm:$0xff] }
 0x323   : > { %v4043_v8 = vmul.f32 %v4039_v46, %v4034_v49  ;;  %v8344_v46 = vld [vmem:[%s11839_s5 + $0xc8] sm:$0xff] }
 0x324   : > { %v4030_v1 = vpop.f32.mrf.mxu2  ;;  %v8328_v49 = vld [vmem:[%s11839_s5 + $0x48] sm:$0xff] }
 0x325   : > { %v4052_v47 = vadd.f32 %v4048_v54, %v4043_v8  ;;  %v4031_v61 = vadd.f32 %v4030_v1, %v4017_v26  ;;  %v8333_v26 = vld [vmem:[%s11839_s5 + $0x70] sm:$0xff]  ;;  %v8343_v54 = vld [vmem:[%s11839_s5 + $0xc0] sm:$0xff] }
 0x326   : > { %v4006_v58 = vpop.f32.mrf.mxu0  ;;  %v8373_v8 = vld [vmem:[%s11840_s6 + $0x30] sm:$0xff] }
 0x327   : > { %v4035_v59 = vadd.f32 %v4031_v61, %v3786_v29  ;;  %v4054_v60 = vadd.f32 %v4052_v47, %v3219_v40  ;;  %v8382_v40 = vld [vmem:[%s11840_s6 + $0x78] sm:$0xff]  ;;  %v8365_v1 = vld [vmem:[%s11839_s5 + $0x170] sm:$0xff]  ;;  %v8372_v29 = vld [vmem:[%s11840_s6 + $0x28] sm:$0xff] }
 0x328   : > { %v8381_v47 = vld [vmem:[%s11840_s6 + $0x70] sm:$0xff]  ;;  %v8380_v61 = vld [vmem:[%s11840_s6 + $0x68] sm:$0xff] }
 0x329   : > { %v4044_v0 = vmul.f32 %v4040_v56, %v4035_v59  ;;  %v4056_v43 = vmax.f32 %v4054_v60, 0.0  ;;  %v8356_v56 = vld [vmem:[%s11839_s5 + $0x128] sm:$0xff]  ;;  %v8355_v59 = vld [vmem:[%s11839_s5 + $0x120] sm:$0xff]  ;;  %v8378_v60 = vld [vmem:[%s11840_s6 + $0x58] sm:$0xff] }
 0x32a   : > { %v8364_v58 = vld [vmem:[%s11839_s5 + $0x168] sm:$0xff] }
 0x32b   : > { %v4053_v14 = vadd.f32 %v4049_v12, %v4044_v0  ;;  %v4058_v53 = vpack.c.bf16 %v4056_v43, %v4056_v43  ;;  %v8370_v12 = vld [vmem:[%s11840_s6 + $0x18] sm:$0xff]  ;;  %v8363_v0 = vld [vmem:[%s11839_s5 + $0x160] sm:$0xff] }
 0x32c   : > { %v4032_v18 = vpop.f32.mrf.mxu2  ;;  %v8354_v43 = vld [vmem:[%s11839_s5 + $0x118] sm:$0xff] }
 0x32d   : > { %v4068_v39 = vsel %vm500_vm0, %v4058_v53, 0  ;;  %v4055_v45 = vadd.f32 %v4053_v14, %v3220_v3  ;;  %v8377_v3 = vld [vmem:[%s11840_s6 + $0x50] sm:$0xff]  ;;  %v8362_v14 = vld [vmem:[%s11839_s5 + $0x158] sm:$0xff]  ;;  %v8376_v18 = vld [vmem:[%s11840_s6 + $0x48] sm:$0xff] }
 0x32e   : > { %4080 = vmatpush.bf16.msrb.mxu3 %v4068_v39  ;;  %4110 = vmatpush.bf16.msra.mxu1 %v4068_v39  ;;  %v8353_v53 = vld [vmem:[%s11839_s5 + $0x110] sm:$0xff] }
 0x32f   : > { %v4057_v30 = vmax.f32 %v4055_v45, 0.0  ;;  %v8367_v45 = vld [vmem:[%s11840_s6] sm:$0xff] }
 0x331   : > { %7376 = vmatmul.msk.bf16.vlgmr.msrb.gmra.mxu3 %vm3227_vm7, %v4063_v19  ;;  %v4059_v23 = vpack.c.bf16 %v4057_v30, %v4057_v30  ;;  %7378 = vmatmul.msk.bf16.vlgmr.msra.gmra.mxu1 %vm3227_vm7, %v8688_v35  ;;  %v8360_v30 = vld [vmem:[%s11839_s5 + $0x148] sm:$0xff] }
 0x332   : > { %4140 = vmatpush.bf16.msra.mxu3 %v4068_v39  ;;  %4322 = vmatpush.bf16.msrb.mxu1 %v8342_v10  ;;  %v8368_v10 = vld [vmem:[%s11840_s6 + $0x8] sm:$0xff]  ;;  %v8361_v39 = vld [vmem:[%s11839_s5 + $0x150] sm:$0xff] }
 0x333   : > { %v4071_v4 = vsel %vm500_vm0, %v4059_v23, 0  ;;  %v8359_v23 = vld [vmem:[%s11839_s5 + $0x140] sm:$0xff] }
 0x334   : > { %4093 = vmatpush.bf16.msra.mxu0 %v4071_v4  ;;  %4123 = vmatpush.bf16.msra.mxu2 %v4071_v4 }
 0x336   : > { %4444 = vmatpush.bf16.msrb.mxu3 %v8326_v2  ;;  %4323 = vmatpush.bf16.msrb.mxu1 %v8341_v20  ;;  %v8375_v2 = vld [vmem:[%s11840_s6 + $0x40] sm:$0xff] }
 0x337   : > { %7377 = vmatmul.msk.bf16.vlgmr.msra.gmra.mxu0 %vm3227_vm7, %v4063_v19  ;;  %7379 = vmatmul.msk.bf16.vlgmr.msra.gmra.mxu2 %vm3227_vm7, %v8688_v35  ;;  %v8323_v35 = vld [vmem:[%s11839_s5 + $0x20] sm:$0xff]  ;;  %v8352_v19 = vld [vmem:[%s11839_s5 + $0x108] sm:$0xff] }
 0x338   : > { %4153 = vmatpush.bf16.msrb.mxu0 %v4071_v4  ;;  %4335 = vmatpush.bf16.msrb.mxu2 %v8350_v13  ;;  %v8351_v20 = vld [vmem:[%s11839_s5 + $0x100] sm:$0xff] }
 0x33a   : > { %4445 = vmatpush.bf16.msrb.mxu3 %v8325_v32  ;;  %4324 = vmatpush.bf16.msrb.mxu1 %v8340_v63 }
 0x33c   : > { %4457 = vmatpush.bf16.msra.mxu0 %v8334_v16  ;;  %4336 = vmatpush.bf16.msrb.mxu2 %v8349_v24 }
 0x33e   : > { %4446 = vmatpush.bf16.msrb.mxu3 %v8324_v25  ;;  %4325 = vmatpush.bf16.msrb.mxu1 %v8339_v15 }
 0x340   : > { %4458 = vmatpush.bf16.msra.mxu0 %v8333_v26  ;;  %4337 = vmatpush.bf16.msrb.mxu2 %v8348_v33 }
 0x341   : > { %7380 = vmatmul.msk.bf16.vlgmr.msra.gmra.mxu3 %vm3227_vm7, %v8710_v44 }
 0x342   : > { %4447 = vmatpush.bf16.msrb.mxu3 %v8323_v35  ;;  %4326 = vmatpush.bf16.msrb.mxu1 %v8338_v51 }
 0x344   : > { %4459 = vmatpush.bf16.msra.mxu0 %v8332_v55  ;;  %4338 = vmatpush.bf16.msrb.mxu2 %v8347_v27 }
 0x346   : > { %4448 = vmatpush.bf16.msrb.mxu3 %v8322_v28  ;;  %4327 = vmatpush.bf16.msrb.mxu1 %v8337_v34 }
 0x347   : > { %7381 = vmatmul.msk.bf16.vlgmr.msrb.gmra.mxu0 %vm3227_vm7, %v8710_v44  ;;  %v8319_v44 = vld [vmem:[%s11839_s5] sm:$0xff] }
 0x348   : > { %4460 = vmatpush.bf16.msra.mxu0 %v8331_v31  ;;  %4339 = vmatpush.bf16.msrb.mxu2 %v8346_v36 }
 0x34a   : > { %4449 = vmatpush.bf16.msrb.mxu3 %v8321_v17  ;;  %4328 = vmatpush.bf16.msrb.mxu1 %v8336_v22  ;;  %v8390_v17 = vld [vmem:[%s11841_s7 + $0x38] sm:$0xff]  ;;  %v8389_v22 = vld [vmem:[%s11841_s7 + $0x30] sm:$0xff] }
 0x34c   : > { %4461 = vmatpush.bf16.msra.mxu0 %v8330_v62  ;;  %4340 = vmatpush.bf16.msrb.mxu2 %v8345_v41 }
 0x34e   : > { %4450 = vmatpush.bf16.msrb.mxu3 %v8320_v38  ;;  %4329 = vmatpush.bf16.msrb.mxu1 %v8335_v42  ;;  %v8388_v38 = vld [vmem:[%s11841_s7 + $0x28] sm:$0xff]  ;;  %v8387_v42 = vld [vmem:[%s11841_s7 + $0x20] sm:$0xff] }
 0x350   : > { %4462 = vmatpush.bf16.msra.mxu0 %v8329_v57  ;;  %4341 = vmatpush.bf16.msrb.mxu2 %v8344_v46 }
 0x352   : > { %4599 = vmatpush.bf16.msra.mxu1 %v8358_v5  ;;  %4451 = vmatpush.bf16.msrb.mxu3 %v8319_v44 }
 0x354   : > { %4463 = vmatpush.bf16.msra.mxu0 %v8328_v49  ;;  %4342 = vmatpush.bf16.msrb.mxu2 %v8343_v54  ;;  %v8385_v54 = vld [vmem:[%s11841_s7 + $0x10] sm:$0xff] }
 0x356   : > { %4761 = vmatpush.bf16.msra.mxu3 %v8374_v50  ;;  %4600 = vmatpush.bf16.msra.mxu1 %v8357_v6  ;;  %v8386_v50 = vld [vmem:[%s11841_s7 + $0x18] sm:$0xff] }
 0x358   : > { %4612 = vmatpush.bf16.msra.mxu2 %v8366_v37  ;;  %4464 = vmatpush.bf16.msra.mxu0 %v8327_v52 }
 0x35a   : > { %4762 = vmatpush.bf16.msra.mxu3 %v8373_v8  ;;  %4601 = vmatpush.bf16.msra.mxu1 %v8356_v56  ;;  %v8384_v8 = vld [vmem:[%s11841_s7 + $0x8] sm:$0xff] }
 0x35c   : > { %4774 = vmatpush.bf16.msrb.mxu0 %v8382_v40  ;;  %4613 = vmatpush.bf16.msra.mxu2 %v8365_v1 }
 0x35e   : > { %4763 = vmatpush.bf16.msra.mxu3 %v8372_v29  ;;  %4602 = vmatpush.bf16.msra.mxu1 %v8355_v59  ;;  %v8460_v59 = vld [vmem:[%s11842_s8] ss:$0 sm:$0xff] }
 0x360   : > { %4775 = vmatpush.bf16.msrb.mxu0 %v8381_v47  ;;  %4614 = vmatpush.bf16.msra.mxu2 %v8364_v58 }
 0x362   : > { %4764 = vmatpush.bf16.msra.mxu3 %v8371_v21  ;;  %4603 = vmatpush.bf16.msra.mxu1 %v8354_v43 }
 0x364   : > { %4776 = vmatpush.bf16.msrb.mxu0 %v8380_v61  ;;  %4615 = vmatpush.bf16.msra.mxu2 %v8363_v0  ;;  %v8461_v0 = vld [vmem:[%s11842_s8 + $0x1] ss:$0 sm:$0xff] }
 0x366   : > { %4765 = vmatpush.bf16.msra.mxu3 %v8370_v12  ;;  %4604 = vmatpush.bf16.msra.mxu1 %v8353_v53 }
 0x368   : > { %4777 = vmatpush.bf16.msrb.mxu0 %v8379_v9  ;;  %4616 = vmatpush.bf16.msra.mxu2 %v8362_v14 }
 0x36a   : > { %4766 = vmatpush.bf16.msra.mxu3 %v8369_v48  ;;  %4605 = vmatpush.bf16.msra.mxu1 %v8352_v19  ;;  %v8383_v19 = vld [vmem:[%s11841_s7] sm:$0xff] }
 0x36c   : > { %4778 = vmatpush.bf16.msrb.mxu0 %v8378_v60  ;;  %4617 = vmatpush.bf16.msra.mxu2 %v8361_v39  ;;  %v8393_v39 = vld [vmem:[%s11841_s7 + $0x50] sm:$0xff] }
 0x36e   : > { %4767 = vmatpush.bf16.msra.mxu3 %v8368_v10  ;;  %4606 = vmatpush.bf16.msra.mxu1 %v8351_v20  ;;  %v8394_v10 = vld [vmem:[%s11841_s7 + $0x58] sm:$0xff] }
 0x370   : > { %4779 = vmatpush.bf16.msrb.mxu0 %v8377_v3  ;;  %4618 = vmatpush.bf16.msra.mxu2 %v8360_v30 }
 0x372   : > { %4768 = vmatpush.bf16.msra.mxu3 %v8367_v45  ;;  %v8392_v45 = vld [vmem:[%s11841_s7 + $0x48] sm:$0xff] }
 0x374   : > { %4780 = vmatpush.bf16.msrb.mxu0 %v8376_v18  ;;  %4619 = vmatpush.bf16.msra.mxu2 %v8359_v23 }
 0x378   : > { %4781 = vmatpush.bf16.msrb.mxu0 %v8375_v2  ;;  %v8391_v2 = vld [vmem:[%s11841_s7 + $0x40] sm:$0xff] }
 0x3ae   : > { %v4112_v13 = vpop.f32.mrf.mxu1 }
 0x3af   : > { %v4129_v32 = vpack.c.bf16 %v4112_v13, %v4112_v13 }
 0x3b1   : > { %4330 = vmatmul.bf16.vlgmr.msrb.gmra.mxu1 %v4129_v32 }
 0x3b4   : > { %v4082_v4 = vpop.f32.mrf.mxu3  ;;  %v4095_v16 = vpop.f32.mrf.mxu0 }
 0x3b5   : > { %v4099_v63 = vpack.c.bf16 %v4082_v4, %v4082_v4  ;;  %v4100_v24 = vpack.c.bf16 %v4095_v16, %v4095_v16 }
 0x3b6   : > { %v4114_v25 = vpop.f32.mrf.mxu1 }
 0x3b7   : > { %4452 = vmatmul.bf16.vlgmr.msrb.gmra.mxu3 %v4099_v63  ;;  %4465 = vmatmul.bf16.vlgmr.msra.gmra.mxu0 %v4100_v24  ;;  %v8402_v24 = vld [vmem:[%s11843_s9 + $0x38] sm:$0xff]  ;;  %v8401_v25 = vld [vmem:[%s11843_s9 + $0x30] sm:$0xff] }
 0x3b8   : > { %4879 = vmatpush.bf16.msrb.mxu3 %v8390_v17  ;;  %4919 = vmatpush.bf16.msra.mxu0 %v8386_v50  ;;  %v8398_v17 = vld [vmem:[%s11843_s9 + $0x18] sm:$0xff] }
 0x3b9   : > { %v8406_v50 = vld [vmem:[%s11843_s9 + $0x58] sm:$0xff] }
 0x3ba   : > { %v4125_v26 = vpop.f32.mrf.mxu2 }
 0x3bb   : > { %v4130_v15 = vpack.c.bf16 %v4125_v26, %v4125_v26  ;;  %v8400_v26 = vld [vmem:[%s11843_s9 + $0x28] sm:$0xff] }
 0x3bc   : > { %v4097_v33 = vpop.f32.mrf.mxu0  ;;  %v4084_v35 = vpop.f32.mrf.mxu3  ;;  %4880 = vmatpush.bf16.msrb.mxu3 %v8389_v22  ;;  %4920 = vmatpush.bf16.msra.mxu0 %v8385_v54  ;;  %v8409_v54 = vld [vmem:[%s11844_s10 + $0x10] sm:$0xff] }
 0x3bd   : > { %4343 = vmatmul.bf16.vlgmr.msrb.gmra.mxu2 %v4130_v15  ;;  %v8458_v35 = vld [vmem:[%s11842_s8 + $0x2] ss:$0 sm:$0xff] }
 0x3c0   : > { %4881 = vmatpush.bf16.msrb.mxu3 %v8388_v38  ;;  %4921 = vmatpush.bf16.msra.mxu0 %v8384_v8  ;;  %v8397_v8 = vld [vmem:[%s11843_s9 + $0x10] sm:$0xff] }
 0x3c2   : > { %v4127_v55 = vpop.f32.mrf.mxu2 }
 0x3c4   : > { %v4155_v51 = vpop.f32.mrf.mxu0  ;;  %v4142_v27 = vpop.f32.mrf.mxu3  ;;  %4882 = vmatpush.bf16.msrb.mxu3 %v8387_v42  ;;  %4922 = vmatpush.bf16.msra.mxu0 %v8383_v19 }
 0x3c5   : > { %v4159_v28 = vpack.c.bf16 %v4142_v27, %v4142_v27  ;;  %v4160_v31 = vpack.c.bf16 %v4155_v51, %v4155_v51  ;;  %v8462_v51 = vld [vmem:[%s11842_s8 + $0x4] ss:$0 sm:$0xff] }
 0x3c7   : > { %4769 = vmatmul.bf16.vlgmr.msra.gmra.mxu3 %v4129_v32  ;;  %4782 = vmatmul.bf16.vlgmr.msrb.gmra.mxu0 %v4130_v15  ;;  %v8399_v15 = vld [vmem:[%s11843_s9 + $0x20] sm:$0xff] }
 0x3c8   : > { %4607 = vmatmul.bf16.vlgmr.msra.gmra.mxu1 %v4159_v28  ;;  %5065 = vmatpush.bf16.msrb.mxu0 %v8402_v24  ;;  %v8415_v24 = vld [vmem:[%s11845_s11 + $0x20] sm:$0xff] }
 0x3cc   : > { %v4157_v34 = vpop.f32.mrf.mxu0  ;;  %v4144_v36 = vpop.f32.mrf.mxu3  ;;  %5066 = vmatpush.bf16.msrb.mxu0 %v8401_v25 }
 0x3cd   : > { %4620 = vmatmul.bf16.vlgmr.msra.gmra.mxu2 %v4160_v31  ;;  %v8459_v31 = vld [vmem:[%s11842_s8 + $0x3] ss:$0 sm:$0xff]  ;;  %v8463_v36 = vld [vmem:[%s11842_s8 + $0x5] ss:$0 sm:$0xff] }
 0x3d0   : > { %5067 = vmatpush.bf16.msrb.mxu0 %v8400_v26 }
 0x3d4   : > { %5068 = vmatpush.bf16.msrb.mxu0 %v8399_v15 }
 0x42e   : > { %v4331_v62 = vpop.f32.mrf.mxu1 }
 0x434   : > { %v4466_v41 = vpop.f32.mrf.mxu0 }
 0x436   : > { %v4333_v57 = vpop.f32.mrf.mxu1 }
 0x43a   : > { %v4453_v46 = vpop.f32.mrf.mxu3 }
 0x43c   : > { %v4468_v5 = vpop.f32.mrf.mxu0 }
 0x440   : > { %v4344_v44 = vpop.f32.mrf.mxu2 }
 0x441   : > { %v4345_v40 = vadd.f32 %v4344_v44, %v4331_v62  ;;  %v8410_v44 = vld [vmem:[%s11844_s10 + $0x18] sm:$0xff] }
 0x442   : > { %v4455_v49 = vpop.f32.mrf.mxu3 }
 0x443   : > { %v4454_v61 = vadd.f32 %v4453_v46, %v4345_v40  ;;  %v8396_v40 = vld [vmem:[%s11843_s9 + $0x8] sm:$0xff] }
 0x444   : > { %v4783_v6 = vpop.f32.mrf.mxu0 }
 0x445   : > { %v4608_v37 = vpop.f32.mrf.mxu1  ;;  %v4467_v9 = vadd.f32 %v4466_v41, %v4454_v61 }
 0x448   : > { %v4346_v52 = vpop.f32.mrf.mxu2 }
 0x449   : > { %v8405_v52 = vld [vmem:[%s11843_s9 + $0x50] sm:$0xff] }
 0x44a   : > { %v4770_v1 = vpop.f32.mrf.mxu3 }
 0x44b   : > { %v4784_v29 = vadd.f32 %v4783_v6, %v4770_v1  ;;  %v8408_v6 = vld [vmem:[%s11844_s10 + $0x8] sm:$0xff] }
 0x44c   : > { %v4785_v47 = vpop.f32.mrf.mxu0  ;;  %v8404_v1 = vld [vmem:[%s11843_s9 + $0x48] sm:$0xff] }
 0x44d   : > { %v4610_v56 = vpop.f32.mrf.mxu1  ;;  %v4789_v28 = vmul.f32 %v8458_v35, %v4784_v29  ;;  %v8395_v29 = vld [vmem:[%s11843_s9] sm:$0xff] }
 0x44e   : > { %v8403_v47 = vld [vmem:[%s11843_s9 + $0x40] sm:$0xff] }
 0x44f   : > { %v4792_v41 = vadd.f32 %v8459_v31, %v4789_v28 }
 0x450   : > { %v4621_v21 = vpop.f32.mrf.mxu2 }
 0x451   : > { %v4622_v58 = vadd.f32 %v4621_v21, %v4608_v37  ;;  %v8407_v37 = vld [vmem:[%s11844_s10] sm:$0xff] }
 0x452   : > { %v4772_v12 = vpop.f32.mrf.mxu3 }
 0x453   : > { %v4625_v60 = vadd.f32 %v4622_v58, %v4467_v9 }
 0x455   : > { %v4628_v43 = vmul.f32 %v8460_v59, %v4625_v60 }
 0x457   : > { %v4631_v48 = vadd.f32 %v8461_v0, %v4628_v43 }
 0x458   : > { %v4623_v3 = vpop.f32.mrf.mxu2 }
 0x459   : > { %v4632_v14 = vmax.f32 %v4631_v48, 0.0  ;;  %v8414_v48 = vld [vmem:[%s11845_s11 + $0x18] sm:$0xff]  ;;  %v8413_v3 = vld [vmem:[%s11845_s11 + $0x10] sm:$0xff] }
 0x45b   : > { %v4793_v53 = vpack.c.bf16 %v4632_v14, %v4632_v14  ;;  %v8412_v14 = vld [vmem:[%s11845_s11 + $0x8] sm:$0xff] }
 0x45d   : > { %7728 = vmatmul.msk.bf16.vlgmr.msrb.gmra.mxu3 %vm4872_vm9, %v4793_v53  ;;  %v4799_v18 = vsel %vm4797_vm10, %v4793_v53, 0 }
 0x45e   : > { %4808 = vmatpush.bf16.msrb.mxu1 %v4799_v18  ;;  %4824 = vmatpush.bf16.msrb.mxu2 %v4799_v18  ;;  %v8466_v18 = vld [vmem:[%s11846_s12] ss:$0 sm:$0xff] }
 0x461   : > { %7702 = vmatmul.msk.bf16.vlgmr.msrb.gmra.mxu1 %vm4794_vm11, %v10834_v7  ;;  %7703 = vmatmul.msk.bf16.vlgmr.msrb.gmra.mxu2 %vm4794_vm11, %v10836_v11 }
 0x462   : > { %4968 = vmatpush.bf16.msra.mxu1 %v8394_v10 }
 0x466   : > { %4969 = vmatpush.bf16.msra.mxu1 %v8393_v39 }
 0x46a   : > { %4970 = vmatpush.bf16.msra.mxu1 %v8392_v45  ;;  %v8467_v45 = vld [vmem:[%s11846_s12 + $0x1] ss:$0 sm:$0xff] }
 0x46e   : > { %4971 = vmatpush.bf16.msra.mxu1 %v8391_v2 }
 0x472   : > { %5105 = vmatpush.bf16.msrb.mxu1 %v8398_v17 }
 0x476   : > { %5106 = vmatpush.bf16.msrb.mxu1 %v8397_v8 }
 0x47a   : > { %5107 = vmatpush.bf16.msrb.mxu1 %v8396_v40 }
 0x47e   : > { %5108 = vmatpush.bf16.msrb.mxu1 %v8395_v29 }
 0x4de   : > { %v4810_v30 = vpop.f32.mrf.mxu1 }
 0x4df   : > { %v4814_v20 = vpack.c.bf16 %v4810_v30, %v4810_v30 }
 0x4e0   : > { %v4884_v23 = vpop.f32.mrf.mxu3 }
 0x4e1   : > { %7745 = vmatmul.msk.bf16.vlgmr.msra.gmra.mxu0 %vm4872_vm9, %v4814_v20 }
 0x4e4   : > { %v4826_v13 = vpop.f32.mrf.mxu2 }
 0x4e5   : > { %v4830_v32 = vpack.c.bf16 %v4826_v13, %v4826_v13 }
 0x4e6   : > { %v4812_v4 = vpop.f32.mrf.mxu1 }
 0x4e7   : > { %7770 = vmatmul.msk.bf16.vlgmr.msra.gmra.mxu1 %vm4872_vm9, %v4830_v32 }
 0x4e8   : > { %v4886_v16 = vpop.f32.mrf.mxu3 }
 0x4e9   : > { %v8416_v16 = vld [vmem:[%s11845_s11 + $0x28] sm:$0xff] }
 0x4ec   : > { %v4828_v63 = vpop.f32.mrf.mxu2 }
 0x4ed   : > { %v8411_v63 = vld [vmem:[%s11845_s11] sm:$0xff] }
 0x55e   : > { %v4924_v33 = vpop.f32.mrf.mxu0 }
 0x55f   : > { %v4925_v55 = vadd.f32 %v4924_v33, %v4884_v23 }
 0x564   : > { %v4973_v27 = vpop.f32.mrf.mxu1 }
 0x565   : > { %v4977_v34 = vadd.f32 %v4973_v27, %v4925_v55  ;;  %v8464_v27 = vld [vmem:[%s11846_s12 + $0x2] ss:$0 sm:$0xff] }
 0x566   : > { %v4926_v62 = vpop.f32.mrf.mxu0 }
 0x567   : > { %v4980_v22 = vmul.f32 %v8462_v51, %v4977_v34  ;;  %v8468_v34 = vld [vmem:[%s11846_s12 + $0x4] ss:$0 sm:$0xff]  ;;  %v8465_v62 = vld [vmem:[%s11846_s12 + $0x3] ss:$0 sm:$0xff] }
 0x569   : > { %v4983_v38 = vadd.f32 %v8463_v36, %v4980_v22 }
 0x56b   : > { %v4984_v57 = vadd.f32 %v4983_v38, %v4792_v41  ;;  %v8469_v41 = vld [vmem:[%s11846_s12 + $0x5] ss:$0 sm:$0xff] }
 0x56c   : > { %v4975_v42 = vpop.f32.mrf.mxu1 }
 0x56d   : > { %v4985_v46 = vmax.f32 %v4984_v57, 0.0 }
 0x56f   : > { %v4986_v5 = vpack.c.bf16 %v4985_v46, %v4985_v46 }
 0x571   : > { %7797 = vmatmul.msk.bf16.vlgmr.msrb.gmra.mxu0 %vm4872_vm9, %v4986_v5  ;;  %v4988_v49 = vsel %vm4797_vm10, %v4986_v5, 0 }
 0x572   : > { %4997 = vmatpush.bf16.msra.mxu2 %v4988_v49  ;;  %5011 = vmatpush.bf16.msra.mxu3 %v4988_v49 }
 0x575   : > { %7771 = vmatmul.msk.bf16.vlgmr.msra.gmra.mxu2 %vm4794_vm11, %v10834_v7  ;;  %7772 = vmatmul.msk.bf16.vlgmr.msra.gmra.mxu3 %vm4794_vm11, %v10836_v11 }
 0x576   : > { %5207 = vmatpush.bf16.msrb.mxu3 %v8410_v44  ;;  %5154 = vmatpush.bf16.msrb.mxu2 %v8406_v50 }
 0x57a   : > { %5208 = vmatpush.bf16.msrb.mxu3 %v8409_v54  ;;  %5155 = vmatpush.bf16.msrb.mxu2 %v8405_v52 }
 0x57e   : > { %5209 = vmatpush.bf16.msrb.mxu3 %v8408_v6  ;;  %5156 = vmatpush.bf16.msrb.mxu2 %v8404_v1 }
 0x582   : > { %5210 = vmatpush.bf16.msrb.mxu3 %v8407_v37  ;;  %5157 = vmatpush.bf16.msrb.mxu2 %v8403_v47 }
 0x585   : > { %7856 = vmatmul.msk.bf16.vlgmr.msrb.gmra.mxu3 %vm4872_vm9, %v4986_v5 }
 0x586   : > { %5284 = vmatpush.bf16.msra.mxu2 %v8414_v48  ;;  %5312 = vmatpush.bf16.msra.mxu3 %v8412_v14 }
 0x58a   : > { %5285 = vmatpush.bf16.msra.mxu2 %v8413_v3  ;;  %5313 = vmatpush.bf16.msra.mxu3 %v8411_v63 }
 0x5ee   : > { %v5070_v61 = vpop.f32.mrf.mxu0 }
 0x5f6   : > { %v5072_v56 = vpop.f32.mrf.mxu0 }
 0x5f8   : > { %v4999_v21 = vpop.f32.mrf.mxu2  ;;  %v5013_v9 = vpop.f32.mrf.mxu3 }
 0x5f9   : > { %v5003_v58 = vpack.c.bf16 %v4999_v21, %v4999_v21  ;;  %v5017_v59 = vpack.c.bf16 %v5013_v9, %v5013_v9 }
 0x5fb   : > { %7814 = vmatmul.msk.bf16.vlgmr.msrb.gmra.mxu1 %vm4872_vm9, %v5003_v58  ;;  %7839 = vmatmul.msk.bf16.vlgmr.msrb.gmra.mxu2 %vm4872_vm9, %v5017_v59 }
 0x600   : > { %v5001_v12 = vpop.f32.mrf.mxu2  ;;  %v5015_v60 = vpop.f32.mrf.mxu3 }
 0x608   : > { %v5212_v0 = vpop.f32.mrf.mxu3 }
 0x609   : > { %v5218_v17 = vmul.f32 %v8464_v27, %v5212_v0 }
 0x60b   : > { %v5221_v57 = vadd.f32 %v8465_v62, %v5218_v17 }
 0x610   : > { %v5214_v43 = vpop.f32.mrf.mxu3 }
 0x678   : > { %v5110_v53 = vpop.f32.mrf.mxu1 }
 0x679   : > { %v5111_v10 = vadd.f32 %v5110_v53, %v5070_v61 }
 0x67e   : > { %v5159_v39 = vpop.f32.mrf.mxu2 }
 0x67f   : > { %v5163_v19 = vadd.f32 %v5159_v39, %v5111_v10 }
 0x680   : > { %v5112_v2 = vpop.f32.mrf.mxu1 }
 0x681   : > { %v5166_v30 = vmul.f32 %v8466_v18, %v5163_v19 }
 0x683   : > { %v5169_v20 = vadd.f32 %v8467_v45, %v5166_v30 }
 0x685   : > { %v5170_v23 = vmax.f32 %v5169_v20, 0.0 }
 0x686   : > { %v5161_v13 = vpop.f32.mrf.mxu2 }
 0x687   : > { %v5222_v32 = vpack.c.bf16 %v5170_v23, %v5170_v23 }
 0x689   : > { %7871 = vmatmul.msk.bf16.vlgmr.msra.gmra.mxu2 %vm5275_vm12, %v5222_v32  ;;  %v5224_v4 = vsel %vm4797_vm10, %v5222_v32, 0 }
 0x68a   : > { %5233 = vmatpush.bf16.msra.mxu0 %v5224_v4  ;;  %5247 = vmatpush.bf16.msra.mxu1 %v5224_v4 }
 0x68d   : > { %7857 = vmatmul.msk.bf16.vlgmr.msra.gmra.mxu0 %vm4794_vm11, %v10834_v7  ;;  %7858 = vmatmul.msk.bf16.vlgmr.msra.gmra.mxu1 %vm4794_vm11, %v10836_v11 }
 0x68e   : > { %5345 = vmatpush.bf16.msrb.mxu0 %v8416_v16 }
 0x692   : > { %5346 = vmatpush.bf16.msrb.mxu0 %v8415_v24 }
 0x70a   : > { %v5235_v7 = vpop.f32.mrf.mxu0  ;;  %v5249_v25 = vpop.f32.mrf.mxu1 }
 0x70b   : > { %v5239_v26 = vpack.c.bf16 %v5235_v7, %v5235_v7  ;;  %v5253_v11 = vpack.c.bf16 %v5249_v25, %v5249_v25 }
 0x70c   : > { %v5287_v15 = vpop.f32.mrf.mxu2 }
 0x70d   : > { %7880 = vmatmul.msk.bf16.vlgmr.msra.gmra.mxu3 %vm5275_vm12, %v5239_v26  ;;  %7893 = vmatmul.msk.bf16.vlgmr.msrb.gmra.mxu0 %vm5275_vm12, %v5253_v11 }
 0x712   : > { %v5237_v33 = vpop.f32.mrf.mxu0  ;;  %v5251_v35 = vpop.f32.mrf.mxu1 }
 0x714   : > { %v5289_v55 = vpop.f32.mrf.mxu2 }
 0x78a   : > { %v5348_v51 = vpop.f32.mrf.mxu0 }
 0x790   : > { %v5315_v28 = vpop.f32.mrf.mxu3 }
 0x791   : > { %v5316_v31 = vadd.f32 %v5315_v28, %v5287_v15 }
 0x792   : > { %v5350_v36 = vpop.f32.mrf.mxu0 }
 0x793   : > { %v5352_v22 = vadd.f32 %v5348_v51, %v5316_v31 }
 0x795   : > { %v5355_v38 = vmul.f32 %v8468_v34, %v5352_v22 }
 0x797   : > { %v5358_v42 = vadd.f32 %v8469_v41, %v5355_v38 }
 0x798   : > { %v5317_v46 = vpop.f32.mrf.mxu3 }
 0x799   : > { %v5359_v5 = vadd.f32 %v5358_v42, %v5221_v57 }
 0x79b   : > { %v5360_v44 = vmax.f32 %v5359_v5, 0.0 }
 0x79d   : > { %5362 = vst.msk [vmem:[%s433_s29] sm:$0xf] %vm5361_vm13, %v5360_v44 }
 0x79e   : > { %8497 = shalt.err (!%p8494_p3)
}
 0x79f   : > { %8418 = dma.vmem_to_hbm [thread:$0]  (%p8643_p5), %s5377_s20, 64, %s5379_s27, %s5364_s17  }
 0x7a0 PF: > { %p8424_p4 = scmp.ge.s32.totalorder %s8532_s28, 2  ;;  %s5390_s16 = sand.u32 1, %s8520_s25  }
 0x7a1   : > { %s5391_s15 = scalar_lea.sflag [#allocation3], %s5390_s16 }
 0x7a2   : > { %p8421_p7 = pnand %p8424_p4, %p8647_p6 }
 0x7a4   : > { %p8422_p8 = pneg %p8421_p7 }
 0x7a6   : > { %8515 = dma.done.wait (%p8422_p8), %s5391_s15, 64  }
 0x7a7   : > { %8517 = vsyncadd (%p8422_p8), %s5391_s15, 4294967232  ;;  %s11858_s28 = sld [smem:[#allocation6_spill]]  ;;  %s11861_s25 = smov %s8524_s26 }
 0x7a8   : > { %s11859_s29 = sld [smem:[#allocation5_spill]] }
 0x7a9   : > { %s11860_s27 = sld [smem:[#allocation7_spill]] }
 0x7ad   : > { %p23_p9 = scmp.ge.s32.totalorder %s11858_s28, 4  }
 0x7ae   : > { %s11862_s26 = smov %s11859_s29 }
 0x7af   :  { %25 = sbr.rel (!%p23_p9) target bundleno = 5 (0x5), region = 124 }
 0x7b4   :  { %5397 = vsyncpa [#allocation3], 1 }
 0x7b5   :  { %5399 = vsyncpa [#allocation3 + $0x1], 1 }

</bundles_post_ra>
